<compile_context>
chip_gen: v5e
topology: v5e:2x2
jax: 0.10.0
libtpu: 0.0.40
codegen_flags: <defaults>
</compile_context>

<pallas_src>
import functools
import math

import jax
import jax.numpy as jnp
from jax import lax
from jax.experimental import pallas as pl
from jax.experimental.pallas import tpu as pltpu


_VMEM_SPEC = pl.BlockSpec(memory_space=pltpu.MemorySpace.VMEM)


def _round_up(x, m):
    return ((x + m - 1) // m) * m


# ---------------------------------------------------------------------------
# Fused Pallas kernel (all layers + directions + fc_out in one kernel body)
# ---------------------------------------------------------------------------

def _make_fused_lstm_kernel(T, B_pad, H, ndir, num_layers, din_max):
    """Fused kernel for static (T, B_pad, H, ndir, num_layers, din_max).

    Ref order: x, w_ih_slab, w_hh_slab, misc_slab, out, xg_scratch,
               (act_scratch if num_layers > 1).
    Layouts (gate-major, direction-minor columns, gate order [i, f, o, g]):
      x          : (T*B_pad, din_max)        time-major rows (row = t*B_pad+b)
      w_ih_slab  : (L, din_max, NW)          per-layer hoisted-projection weight
      w_hh_slab  : (L, GW, NG)               per-layer block-diag recurrent wt
      misc_slab  : (L+1, 1, NW)              rows 0..L-1 bias, row L = [fc_w|fc_b]
      out        : (B_pad, 1)
      xg_scratch : (T*B_pad, NW)             hoisted projection (per layer)
      act_scratch: (T*B_pad, GW)             inter-layer activations [fwd|bwd]
    with GW = ndir*H, NG = 4*GW, NW = ndir*NG.
    """
    GW = ndir * H          # per-gate width ([fwd | bwd] lanes)
    NG = 4 * GW            # gate pre-activation width per step  [i | f | o | g]
    NW = ndir * NG         # hoisted-projection width (fwd half | bwd half)

    def kernel(*refs):
        if num_layers > 1:
            x_ref, w_ih_ref, w_hh_ref, misc_ref, o_ref, xg_ref, act_ref = refs
        else:
            x_ref, w_ih_ref, w_hh_ref, misc_ref, o_ref, xg_ref = refs
            act_ref = None

        # Static lane masks, built once (JAX does not CSE broadcasts).
        lane_g = lax.broadcasted_iota(jnp.int32, (B_pad, NG), 1)
        sig_mask = lane_g < 3 * GW           # i, f, o -> sigmoid ; g -> tanh
        if ndir == 2:
            lane_h = lax.broadcasted_iota(jnp.int32, (B_pad, GW), 1)

        layer_in = x_ref[...]                # (T*B_pad, din_max)
        h_first = None                       # last layer: bwd hidden at t=T-1
        h_last = None                        # last layer: state after step T-1

        for layer in range(num_layers):
            last_layer = layer == num_layers - 1

            # --- hoisted full-sequence input projection + bias (one matmul,
            #     off the serial recurrence path), stored to VMEM scratch so
            #     per-step reads are sublane-aligned tile loads.
            w_ih_l = w_ih_ref[layer]                         # (din_max, NW)
            if layer > 0 and GW != din_max:
                w_ih_l = w_ih_l[0:GW, :]
            bias_l = misc_ref[layer]                         # (1, NW)
            xg_ref[...] = (
                jnp.dot(layer_in, w_ih_l, preferred_element_type=jnp.float32)
                + bias_l)

            w_hh_l = w_hh_ref[layer]                         # (GW, NG)

            h = jnp.zeros((B_pad, GW), jnp.float32)          # [h_fwd | h_bwd]
            c = jnp.zeros((B_pad, GW), jnp.float32)

            # Fully unrolled time loop: fwd direction processes time s, bwd
            # direction processes time T-1-s in the SAME step; both share one
            # block-diagonal (B, 2H) @ (2H, 8H) MXU pass.
            for s in range(T):
                xg = xg_ref[pl.ds(s * B_pad, B_pad), pl.ds(0, NG)]
                if ndir == 2:
                    xg = xg + xg_ref[pl.ds((T - 1 - s) * B_pad, B_pad),
                                     pl.ds(NG, NG)]
                gates = xg + jnp.dot(h, w_hh_l,
                                     preferred_element_type=jnp.float32)
                # Full-width EUP + single lane-mask select (no per-gate slices
                # ahead of the transcendentals).
                act = jnp.where(sig_mask, jax.nn.sigmoid(gates),
                                jnp.tanh(gates))
                i_g = act[:, 0 * GW:1 * GW]
                f_g = act[:, 1 * GW:2 * GW]
                o_g = act[:, 2 * GW:3 * GW]
                g_g = act[:, 3 * GW:4 * GW]
                c = f_g * c + i_g * g_g
                h = o_g * jnp.tanh(c)

                if last_layer:
                    if ndir == 2 and s == 0:
                        h_first = h      # lanes H:2H = bwd hidden at t = T-1
                else:
                    # Stash inter-layer activations (feature order [fwd|bwd]);
                    # off the recurrence critical chain.
                    act_ref[pl.ds(s * B_pad, B_pad), pl.ds(0, H)] = h[:, 0:H]
                    if ndir == 2:
                        act_ref[pl.ds((T - 1 - s) * B_pad, B_pad),
                                pl.ds(H, H)] = h[:, H:2 * H]

            if last_layer:
                h_last = h
            else:
                layer_in = act_ref[...]                      # (T*B_pad, GW)

        # --- fused fc_out on output[:, -1, :] = [h_fwd(T-1) | h_bwd(T-1)] ---
        if ndir == 2:
            h_sel = jnp.where(lane_h < H, h_last, h_first)   # (B_pad, GW)
        else:
            h_sel = h_last
        fc_row = misc_ref[num_layers]                        # (1, NW)
        fc_w = fc_row[:, 0:GW]                               # (1, GW)
        fc_b = fc_row[:, GW:GW + 1]                          # (1, 1)
        o_ref[...] = jnp.sum(h_sel * fc_w, axis=1, keepdims=True) + fc_b

    return kernel


# ---------------------------------------------------------------------------
# Wrapper: one pallas_call (4 input DMAs) for the whole forward pass
# ---------------------------------------------------------------------------

def lstm_model_forward(x, params, *, num_layers, bidir):
    """Equivalent of LSTM.forward: fc_out(lstm(x)[0])[:, -1, :] -> (B, 1)."""
    B, T, D = x.shape
    ndir = 2 if bidir else 1
    H = params["l0_d0"][1].shape[1]                          # w_hh: (4H, H)
    GW = ndir * H
    NG = 4 * GW
    NW = ndir * NG
    B_pad = _round_up(B, 8)                                  # f32 sublane mult
    din_max = max(D, GW)
    f32 = jnp.float32

    # Time-major, batch/feature padded input so per-step row blocks are
    # sublane-aligned and the w_ih slab stacks across layers.
    xt = jnp.transpose(x, (1, 0, 2)).astype(f32)             # (T, B, D)
    xt = jnp.pad(xt, ((0, 0), (0, B_pad - B), (0, din_max - D)))
    x_flat = xt.reshape(T * B_pad, din_max)

    def gate_blocks(w_t):
        # Columns of w_t are in PyTorch order [i, f, g, o] -> return [i, f, o, g].
        return (w_t[..., 0:H], w_t[..., H:2 * H],
                w_t[..., 3 * H:4 * H], w_t[..., 2 * H:3 * H])

    def placed(blocks, d, k_rows):
        # Gate-major / direction-minor column layout
        # [i_f i_b | f_f f_b | o_f o_b | g_f g_b]; zeros for the other dir.
        z = jnp.zeros((k_rows, H), f32)
        cols = []
        for blk in blocks:
            for dd in range(ndir):
                cols.append(blk if dd == d else z)
        return jnp.concatenate(cols, axis=1)                 # (k_rows, NG)

    w_ih_layers, w_hh_layers, bias_layers = [], [], []
    for layer in range(num_layers):
        din_l = D if layer == 0 else GW
        ih_halves, hh_rows, b_halves = [], [], []
        for d in range(ndir):
            w_ih, w_hh, b_ih, b_hh = params[f"l{layer}_d{d}"]
            ih_halves.append(placed(gate_blocks(w_ih.T.astype(f32)), d, din_l))
            hh_rows.append(placed(gate_blocks(w_hh.T.astype(f32)), d, H))
            b = (b_ih + b_hh).astype(f32)[None, :]
            b_halves.append(placed(gate_blocks(b), d, 1))
        w_ih_l = jnp.concatenate(ih_halves, axis=1)          # (din_l, NW)
        w_ih_l = jnp.pad(w_ih_l, ((0, din_max - din_l), (0, 0)))
        w_ih_layers.append(w_ih_l)
        w_hh_layers.append(jnp.concatenate(hh_rows, axis=0))     # (GW, NG)
        bias_layers.append(jnp.concatenate(b_halves, axis=1))    # (1, NW)

    fc_w, fc_b = params["fc"]                                # (1, GW), (1,)
    fc_row = jnp.zeros((1, NW), f32)
    fc_row = fc_row.at[0, 0:GW].set(fc_w.astype(f32).reshape(GW))
    fc_row = fc_row.at[0, GW].set(fc_b.astype(f32).reshape(()))

    w_ih_slab = jnp.stack(w_ih_layers, axis=0)               # (L, din_max, NW)
    w_hh_slab = jnp.stack(w_hh_layers, axis=0)               # (L, GW, NG)
    misc_slab = jnp.stack(bias_layers + [fc_row], axis=0)    # (L+1, 1, NW)

    scratch = [pltpu.VMEM((T * B_pad, NW), f32)]             # hoisted xg
    if num_layers > 1:
        scratch.append(pltpu.VMEM((T * B_pad, GW), f32))     # inter-layer acts

    kernel = _make_fused_lstm_kernel(T, B_pad, H, ndir, num_layers, din_max)
    out = pl.pallas_call(
        kernel,
        out_shape=jax.ShapeDtypeStruct((B_pad, 1), f32),
        in_specs=[_VMEM_SPEC] * 4,
        out_specs=_VMEM_SPEC,
        scratch_shapes=scratch,
    )(x_flat, w_ih_slab, w_hh_slab, misc_slab)
    return out[:B]


# ---------------------------------------------------------------------------
# Pure-JAX reference (same math, for verification)
# ---------------------------------------------------------------------------

def _lstm_layer_ref(x_seq, w_ih_t, w_hh_t, b):
    T, B, _ = x_seq.shape
    H = w_hh_t.shape[0]

    def step(carry, x_t):
        h, c = carry
        gates = x_t @ w_ih_t + h @ w_hh_t + b
        i = jax.nn.sigmoid(gates[:, 0 * H:1 * H])
        f = jax.nn.sigmoid(gates[:, 1 * H:2 * H])
        g = jnp.tanh(gates[:, 2 * H:3 * H])
        o = jax.nn.sigmoid(gates[:, 3 * H:4 * H])
        c = f * c + i * g
        h = o * jnp.tanh(c)
        return (h, c), h

    (_, _), hs = lax.scan(step,
                          (jnp.zeros((B, H)), jnp.zeros((B, H))), x_seq)
    return hs


def lstm_model_ref(x, params, *, num_layers, bidir):
    seq = jnp.transpose(x, (1, 0, 2))
    inp = seq
    ndir = 2 if bidir else 1
    for layer in range(num_layers):
        outs = []
        for d in range(ndir):
            w_ih, w_hh, b_ih, b_hh = params[f"l{layer}_d{d}"]
            xin = inp if d == 0 else jnp.flip(inp, axis=0)
            h_seq = _lstm_layer_ref(xin, w_ih.T, w_hh.T, (b_ih + b_hh)[None, :])
            if d == 1:
                h_seq = jnp.flip(h_seq, axis=0)
            outs.append(h_seq)
        inp = jnp.concatenate(outs, axis=-1) if bidir else outs[0]
    fc_w, fc_b = params["fc"]
    return inp[-1] @ fc_w.T + fc_b[None, :]


# ---------------------------------------------------------------------------
# Deterministic parameter init (mirrors PyTorch nn.LSTM / nn.Linear defaults)
# ---------------------------------------------------------------------------

def init_params(key, *, in_dim, hid_size, num_layers, bidir):
    params = {}
    ndir = 2 if bidir else 1
    k_lstm = 1.0 / math.sqrt(hid_size)
    for layer in range(num_layers):
        din = in_dim if layer == 0 else ndir * hid_size
        for d in range(ndir):
            key, k1, k2, k3, k4 = jax.random.split(key, 5)
            w_ih = jax.random.uniform(k1, (4 * hid_size, din),
                                      minval=-k_lstm, maxval=k_lstm)
            w_hh = jax.random.uniform(k2, (4 * hid_size, hid_size),
                                      minval=-k_lstm, maxval=k_lstm)
            b_ih = jax.random.uniform(k3, (4 * hid_size,),
                                      minval=-k_lstm, maxval=k_lstm)
            b_hh = jax.random.uniform(k4, (4 * hid_size,),
                                      minval=-k_lstm, maxval=k_lstm)
            params[f"l{layer}_d{d}"] = (w_ih, w_hh, b_ih, b_hh)
    fc_in = ndir * hid_size
    k_fc = 1.0 / math.sqrt(fc_in)
    key, k1, k2 = jax.random.split(key, 3)
    fc_w = jax.random.uniform(k1, (1, fc_in), minval=-k_fc, maxval=k_fc)
    fc_b = jax.random.uniform(k2, (1,), minval=-k_fc, maxval=k_fc)
    params["fc"] = (fc_w, fc_b)
    return params


# ---------------------------------------------------------------------------

if __name__ == "__main__":
    # config: in_dim=4, hid_size=32, num_layers=2, bidir=True
    B, T, IN_DIM, HID, NUM_LAYERS, BIDIR = 2, 8, 4, 32, 2, True

    key = jax.random.PRNGKey(0)
    key, kx = jax.random.split(key)
    x = jax.random.normal(kx, (B, T, IN_DIM), dtype=jnp.float32)

    params = init_params(key, in_dim=IN_DIM, hid_size=HID,
                         num_layers=NUM_LAYERS, bidir=BIDIR)

    fwd = jax.jit(functools.partial(lstm_model_forward,
                                    num_layers=NUM_LAYERS, bidir=BIDIR))
    out = jax.block_until_ready(fwd(x, params))
    assert out.shape == (B, 1), out.shape

    ref = jax.block_until_ready(
        lstm_model_ref(x, params, num_layers=NUM_LAYERS, bidir=BIDIR))
    assert jnp.allclose(out, ref, atol=3e-4, rtol=3e-4), (out, ref)

    print("KERNEL_OK")
</pallas_src>

<mosaic_0001>
module attributes {stable_mosaic.version = 11 : i64} {
  func.func @kernel(%arg0: memref<64x64xf32, #tpu.memory_space<vmem>>, %arg1: memref<2x64x512xf32, #tpu.memory_space<vmem>>, %arg2: memref<2x64x256xf32, #tpu.memory_space<vmem>>, %arg3: memref<3x1x512xf32, #tpu.memory_space<vmem>>, %arg4: memref<8x1xf32, #tpu.memory_space<vmem>>, %arg5: memref<64x512xf32, #tpu.memory_space<vmem>>, %arg6: memref<64x64xf32, #tpu.memory_space<vmem>>) attributes {dimension_semantics = [], scalar_prefetch = 0 : i64, scratch_operands = 2 : i64, tpu.core_type = #tpu.core_type<tc>} {
    %0 = tpu.iota {dimensions = array<i32: 1>} : vector<8x256xi32>
    %c192_i32 = arith.constant 192 : i32
    %1 = vector.broadcast %c192_i32 : i32 to vector<8x256xi32>
    %2 = arith.cmpi slt, %0, %1 : vector<8x256xi32>
    %3 = tpu.iota {dimensions = array<i32: 1>} : vector<8x64xi32>
    %c0 = arith.constant 0 : index
    %c0_0 = arith.constant 0 : index
    %4 = vector.load %arg0[%c0, %c0_0] : memref<64x64xf32, #tpu.memory_space<vmem>>, vector<64x64xf32>
    %c0_1 = arith.constant 0 : index
    %c0_2 = arith.constant 0 : index
    %c0_3 = arith.constant 0 : index
    %5 = vector.load %arg1[%c0_1, %c0_2, %c0_3] : memref<2x64x512xf32, #tpu.memory_space<vmem>>, vector<1x64x512xf32>
    %6 = vector.shape_cast %5 : vector<1x64x512xf32> to vector<64x512xf32>
    %c0_4 = arith.constant 0 : index
    %c0_5 = arith.constant 0 : index
    %c0_6 = arith.constant 0 : index
    %7 = vector.load %arg3[%c0_4, %c0_5, %c0_6] : memref<3x1x512xf32, #tpu.memory_space<vmem>>, vector<1x1x512xf32>
    %8 = vector.shape_cast %7 : vector<1x1x512xf32> to vector<1x512xf32>
    %cst = arith.constant dense<0.000000e+00> : vector<64x512xf32>
    %9 = tpu.matmul %4, %6, %cst {dimension_numbers = #tpu.dot_dimension_numbers<[1], [0], [0], [1], [0, 0, 1, 1], [], []>} : vector<64x64xf32>, vector<64x512xf32>, vector<64x512xf32> -> vector<64x512xf32>
    %10 = vector.broadcast %8 : vector<1x512xf32> to vector<64x512xf32>
    %11 = arith.addf %9, %10 : vector<64x512xf32>
    %c0_7 = arith.constant 0 : index
    %c0_8 = arith.constant 0 : index
    %12 = vector.load %arg5[%c0_7, %c0_8] : memref<64x512xf32, #tpu.memory_space<vmem>>, vector<64x512xf32>
    tpu.vector_store %arg5[%c0_7, %c0_8], %11 {strides = array<i32>} : memref<64x512xf32, #tpu.memory_space<vmem>>, vector<64x512xf32>,
    %c0_9 = arith.constant 0 : index
    %c0_10 = arith.constant 0 : index
    %c0_11 = arith.constant 0 : index
    %13 = vector.load %arg2[%c0_9, %c0_10, %c0_11] : memref<2x64x256xf32, #tpu.memory_space<vmem>>, vector<1x64x256xf32>
    %14 = vector.shape_cast %13 : vector<1x64x256xf32> to vector<64x256xf32>
    %cst_12 = arith.constant 0.000000e+00 : f32
    %15 = vector.broadcast %cst_12 : f32 to vector<8x64xf32>
    %cst_13 = arith.constant 0.000000e+00 : f32
    %16 = vector.broadcast %cst_13 : f32 to vector<8x64xf32>
    %c0_14 = arith.constant 0 : index
    %c0_15 = arith.constant 0 : index
    %17 = vector.load %arg5[%c0_14, %c0_15] : memref<64x512xf32, #tpu.memory_space<vmem>>, vector<8x256xf32>
    %c56 = arith.constant 56 : index
    %c256 = arith.constant 256 : index
    %18 = vector.load %arg5[%c56, %c256] : memref<64x512xf32, #tpu.memory_space<vmem>>, vector<8x256xf32>
    %19 = arith.addf %17, %18 : vector<8x256xf32>
    %cst_16 = arith.constant dense<0.000000e+00> : vector<8x256xf32>
    %20 = tpu.matmul %15, %14, %cst_16 {dimension_numbers = #tpu.dot_dimension_numbers<[1], [0], [0], [1], [0, 0, 1, 1], [], []>} : vector<8x64xf32>, vector<64x256xf32>, vector<8x256xf32> -> vector<8x256xf32>
    %21 = arith.addf %19, %20 : vector<8x256xf32>
    %22 = arith.negf %21 : vector<8x256xf32>
    %23 = math.exp %22 : vector<8x256xf32>
    %cst_17 = arith.constant 1.000000e+00 : f32
    %24 = vector.broadcast %cst_17 : f32 to vector<8x256xf32>
    %25 = arith.addf %24, %23 : vector<8x256xf32>
    %26 = arith.divf %24, %25 : vector<8x256xf32>
    %27 = math.tanh %21 : vector<8x256xf32>
    %28 = arith.select %2, %26, %27 : vector<8x256xi1>, vector<8x256xf32>
    %29 = vector.extract_strided_slice %28 {offsets = [0, 0], sizes = [8, 64], strides = [1, 1]} : vector<8x256xf32> to vector<8x64xf32>
    %30 = vector.extract_strided_slice %28 {offsets = [0, 64], sizes = [8, 64], strides = [1, 1]} : vector<8x256xf32> to vector<8x64xf32>
    %31 = vector.extract_strided_slice %28 {offsets = [0, 128], sizes = [8, 64], strides = [1, 1]} : vector<8x256xf32> to vector<8x64xf32>
    %32 = vector.extract_strided_slice %28 {offsets = [0, 192], sizes = [8, 64], strides = [1, 1]} : vector<8x256xf32> to vector<8x64xf32>
    %33 = arith.mulf %30, %16 : vector<8x64xf32>
    %34 = arith.mulf %29, %32 : vector<8x64xf32>
    %35 = arith.addf %33, %34 : vector<8x64xf32>
    %36 = math.tanh %35 : vector<8x64xf32>
    %37 = arith.mulf %31, %36 : vector<8x64xf32>
    %38 = vector.extract_strided_slice %37 {offsets = [0, 0], sizes = [8, 32], strides = [1, 1]} : vector<8x64xf32> to vector<8x32xf32>
    %c0_18 = arith.constant 0 : index
    %c0_19 = arith.constant 0 : index
    %39 = vector.load %arg6[%c0_18, %c0_19] : memref<64x64xf32, #tpu.memory_space<vmem>>, vector<8x32xf32>
    tpu.vector_store %arg6[%c0_18, %c0_19], %38 {strides = array<i32>} : memref<64x64xf32, #tpu.memory_space<vmem>>, vector<8x32xf32>,
    %40 = vector.extract_strided_slice %37 {offsets = [0, 32], sizes = [8, 32], strides = [1, 1]} : vector<8x64xf32> to vector<8x32xf32>
    %c56_20 = arith.constant 56 : index
    %c32 = arith.constant 32 : index
    %41 = vector.load %arg6[%c56_20, %c32] : memref<64x64xf32, #tpu.memory_space<vmem>>, vector<8x32xf32>
    tpu.vector_store %arg6[%c56_20, %c32], %40 {strides = array<i32>} : memref<64x64xf32, #tpu.memory_space<vmem>>, vector<8x32xf32>,
    %c8 = arith.constant 8 : index
    %c0_21 = arith.constant 0 : index
    %42 = vector.load %arg5[%c8, %c0_21] : memref<64x512xf32, #tpu.memory_space<vmem>>, vector<8x256xf32>
    %c48 = arith.constant 48 : index
    %c256_22 = arith.constant 256 : index
    %43 = vector.load %arg5[%c48, %c256_22] : memref<64x512xf32, #tpu.memory_space<vmem>>, vector<8x256xf32>
    %44 = arith.addf %42, %43 : vector<8x256xf32>
    %cst_23 = arith.constant dense<0.000000e+00> : vector<8x256xf32>
    %45 = tpu.matmul %37, %14, %cst_23 {dimension_numbers = #tpu.dot_dimension_numbers<[1], [0], [0], [1], [0, 0, 1, 1], [], []>} : vector<8x64xf32>, vector<64x256xf32>, vector<8x256xf32> -> vector<8x256xf32>
    %46 = arith.addf %44, %45 : vector<8x256xf32>
    %47 = arith.negf %46 : vector<8x256xf32>
    %48 = math.exp %47 : vector<8x256xf32>
    %cst_24 = arith.constant 1.000000e+00 : f32
    %49 = vector.broadcast %cst_24 : f32 to vector<8x256xf32>
    %50 = arith.addf %49, %48 : vector<8x256xf32>
    %51 = arith.divf %49, %50 : vector<8x256xf32>
    %52 = math.tanh %46 : vector<8x256xf32>
    %53 = arith.select %2, %51, %52 : vector<8x256xi1>, vector<8x256xf32>
    %54 = vector.extract_strided_slice %53 {offsets = [0, 0], sizes = [8, 64], strides = [1, 1]} : vector<8x256xf32> to vector<8x64xf32>
    %55 = vector.extract_strided_slice %53 {offsets = [0, 64], sizes = [8, 64], strides = [1, 1]} : vector<8x256xf32> to vector<8x64xf32>
    %56 = vector.extract_strided_slice %53 {offsets = [0, 128], sizes = [8, 64], strides = [1, 1]} : vector<8x256xf32> to vector<8x64xf32>
    %57 = vector.extract_strided_slice %53 {offsets = [0, 192], sizes = [8, 64], strides = [1, 1]} : vector<8x256xf32> to vector<8x64xf32>
    %58 = arith.mulf %55, %35 : vector<8x64xf32>
    %59 = arith.mulf %54, %57 : vector<8x64xf32>
    %60 = arith.addf %58, %59 : vector<8x64xf32>
    %61 = math.tanh %60 : vector<8x64xf32>
    %62 = arith.mulf %56, %61 : vector<8x64xf32>
    %63 = vector.extract_strided_slice %62 {offsets = [0, 0], sizes = [8, 32], strides = [1, 1]} : vector<8x64xf32> to vector<8x32xf32>
    %c8_25 = arith.constant 8 : index
    %c0_26 = arith.constant 0 : index
    %64 = vector.load %arg6[%c8_25, %c0_26] : memref<64x64xf32, #tpu.memory_space<vmem>>, vector<8x32xf32>
    tpu.vector_store %arg6[%c8_25, %c0_26], %63 {strides = array<i32>} : memref<64x64xf32, #tpu.memory_space<vmem>>, vector<8x32xf32>,
    %65 = vector.extract_strided_slice %62 {offsets = [0, 32], sizes = [8, 32], strides = [1, 1]} : vector<8x64xf32> to vector<8x32xf32>
    %c48_27 = arith.constant 48 : index
    %c32_28 = arith.constant 32 : index
    %66 = vector.load %arg6[%c48_27, %c32_28] : memref<64x64xf32, #tpu.memory_space<vmem>>, vector<8x32xf32>
    tpu.vector_store %arg6[%c48_27, %c32_28], %65 {strides = array<i32>} : memref<64x64xf32, #tpu.memory_space<vmem>>, vector<8x32xf32>,
    %c16 = arith.constant 16 : index
    %c0_29 = arith.constant 0 : index
    %67 = vector.load %arg5[%c16, %c0_29] : memref<64x512xf32, #tpu.memory_space<vmem>>, vector<8x256xf32>
    %c40 = arith.constant 40 : index
    %c256_30 = arith.constant 256 : index
    %68 = vector.load %arg5[%c40, %c256_30] : memref<64x512xf32, #tpu.memory_space<vmem>>, vector<8x256xf32>
    %69 = arith.addf %67, %68 : vector<8x256xf32>
    %cst_31 = arith.constant dense<0.000000e+00> : vector<8x256xf32>
    %70 = tpu.matmul %62, %14, %cst_31 {dimension_numbers = #tpu.dot_dimension_numbers<[1], [0], [0], [1], [0, 0, 1, 1], [], []>} : vector<8x64xf32>, vector<64x256xf32>, vector<8x256xf32> -> vector<8x256xf32>
    %71 = arith.addf %69, %70 : vector<8x256xf32>
    %72 = arith.negf %71 : vector<8x256xf32>
    %73 = math.exp %72 : vector<8x256xf32>
    %cst_32 = arith.constant 1.000000e+00 : f32
    %74 = vector.broadcast %cst_32 : f32 to vector<8x256xf32>
    %75 = arith.addf %74, %73 : vector<8x256xf32>
    %76 = arith.divf %74, %75 : vector<8x256xf32>
    %77 = math.tanh %71 : vector<8x256xf32>
    %78 = arith.select %2, %76, %77 : vector<8x256xi1>, vector<8x256xf32>
    %79 = vector.extract_strided_slice %78 {offsets = [0, 0], sizes = [8, 64], strides = [1, 1]} : vector<8x256xf32> to vector<8x64xf32>
    %80 = vector.extract_strided_slice %78 {offsets = [0, 64], sizes = [8, 64], strides = [1, 1]} : vector<8x256xf32> to vector<8x64xf32>
    %81 = vector.extract_strided_slice %78 {offsets = [0, 128], sizes = [8, 64], strides = [1, 1]} : vector<8x256xf32> to vector<8x64xf32>
    %82 = vector.extract_strided_slice %78 {offsets = [0, 192], sizes = [8, 64], strides = [1, 1]} : vector<8x256xf32> to vector<8x64xf32>
    %83 = arith.mulf %80, %60 : vector<8x64xf32>
    %84 = arith.mulf %79, %82 : vector<8x64xf32>
    %85 = arith.addf %83, %84 : vector<8x64xf32>
    %86 = math.tanh %85 : vector<8x64xf32>
    %87 = arith.mulf %81, %86 : vector<8x64xf32>
    %88 = vector.extract_strided_slice %87 {offsets = [0, 0], sizes = [8, 32], strides = [1, 1]} : vector<8x64xf32> to vector<8x32xf32>
    %c16_33 = arith.constant 16 : index
    %c0_34 = arith.constant 0 : index
    %89 = vector.load %arg6[%c16_33, %c0_34] : memref<64x64xf32, #tpu.memory_space<vmem>>, vector<8x32xf32>
    tpu.vector_store %arg6[%c16_33, %c0_34], %88 {strides = array<i32>} : memref<64x64xf32, #tpu.memory_space<vmem>>, vector<8x32xf32>,
    %90 = vector.extract_strided_slice %87 {offsets = [0, 32], sizes = [8, 32], strides = [1, 1]} : vector<8x64xf32> to vector<8x32xf32>
    %c40_35 = arith.constant 40 : index
    %c32_36 = arith.constant 32 : index
    %91 = vector.load %arg6[%c40_35, %c32_36] : memref<64x64xf32, #tpu.memory_space<vmem>>, vector<8x32xf32>
    tpu.vector_store %arg6[%c40_35, %c32_36], %90 {strides = array<i32>} : memref<64x64xf32, #tpu.memory_space<vmem>>, vector<8x32xf32>,
    %c24 = arith.constant 24 : index
    %c0_37 = arith.constant 0 : index
    %92 = vector.load %arg5[%c24, %c0_37] : memref<64x512xf32, #tpu.memory_space<vmem>>, vector<8x256xf32>
    %c32_38 = arith.constant 32 : index
    %c256_39 = arith.constant 256 : index
    %93 = vector.load %arg5[%c32_38, %c256_39] : memref<64x512xf32, #tpu.memory_space<vmem>>, vector<8x256xf32>
    %94 = arith.addf %92, %93 : vector<8x256xf32>
    %cst_40 = arith.constant dense<0.000000e+00> : vector<8x256xf32>
    %95 = tpu.matmul %87, %14, %cst_40 {dimension_numbers = #tpu.dot_dimension_numbers<[1], [0], [0], [1], [0, 0, 1, 1], [], []>} : vector<8x64xf32>, vector<64x256xf32>, vector<8x256xf32> -> vector<8x256xf32>
    %96 = arith.addf %94, %95 : vector<8x256xf32>
    %97 = arith.negf %96 : vector<8x256xf32>
    %98 = math.exp %97 : vector<8x256xf32>
    %cst_41 = arith.constant 1.000000e+00 : f32
    %99 = vector.broadcast %cst_41 : f32 to vector<8x256xf32>
    %100 = arith.addf %99, %98 : vector<8x256xf32>
    %101 = arith.divf %99, %100 : vector<8x256xf32>
    %102 = math.tanh %96 : vector<8x256xf32>
    %103 = arith.select %2, %101, %102 : vector<8x256xi1>, vector<8x256xf32>
    %104 = vector.extract_strided_slice %103 {offsets = [0, 0], sizes = [8, 64], strides = [1, 1]} : vector<8x256xf32> to vector<8x64xf32>
    %105 = vector.extract_strided_slice %103 {offsets = [0, 64], sizes = [8, 64], strides = [1, 1]} : vector<8x256xf32> to vector<8x64xf32>
    %106 = vector.extract_strided_slice %103 {offsets = [0, 128], sizes = [8, 64], strides = [1, 1]} : vector<8x256xf32> to vector<8x64xf32>
    %107 = vector.extract_strided_slice %103 {offsets = [0, 192], sizes = [8, 64], strides = [1, 1]} : vector<8x256xf32> to vector<8x64xf32>
    %108 = arith.mulf %105, %85 : vector<8x64xf32>
    %109 = arith.mulf %104, %107 : vector<8x64xf32>
    %110 = arith.addf %108, %109 : vector<8x64xf32>
    %111 = math.tanh %110 : vector<8x64xf32>
    %112 = arith.mulf %106, %111 : vector<8x64xf32>
    %113 = vector.extract_strided_slice %112 {offsets = [0, 0], sizes = [8, 32], strides = [1, 1]} : vector<8x64xf32> to vector<8x32xf32>
    %c24_42 = arith.constant 24 : index
    %c0_43 = arith.constant 0 : index
    %114 = vector.load %arg6[%c24_42, %c0_43] : memref<64x64xf32, #tpu.memory_space<vmem>>, vector<8x32xf32>
    tpu.vector_store %arg6[%c24_42, %c0_43], %113 {strides = array<i32>} : memref<64x64xf32, #tpu.memory_space<vmem>>, vector<8x32xf32>,
    %115 = vector.extract_strided_slice %112 {offsets = [0, 32], sizes = [8, 32], strides = [1, 1]} : vector<8x64xf32> to vector<8x32xf32>
    %c32_44 = arith.constant 32 : index
    %c32_45 = arith.constant 32 : index
    %116 = vector.load %arg6[%c32_44, %c32_45] : memref<64x64xf32, #tpu.memory_space<vmem>>, vector<8x32xf32>
    tpu.vector_store %arg6[%c32_44, %c32_45], %115 {strides = array<i32>} : memref<64x64xf32, #tpu.memory_space<vmem>>, vector<8x32xf32>,
    %c32_46 = arith.constant 32 : index
    %c0_47 = arith.constant 0 : index
    %117 = vector.load %arg5[%c32_46, %c0_47] : memref<64x512xf32, #tpu.memory_space<vmem>>, vector<8x256xf32>
    %c24_48 = arith.constant 24 : index
    %c256_49 = arith.constant 256 : index
    %118 = vector.load %arg5[%c24_48, %c256_49] : memref<64x512xf32, #tpu.memory_space<vmem>>, vector<8x256xf32>
    %119 = arith.addf %117, %118 : vector<8x256xf32>
    %cst_50 = arith.constant dense<0.000000e+00> : vector<8x256xf32>
    %120 = tpu.matmul %112, %14, %cst_50 {dimension_numbers = #tpu.dot_dimension_numbers<[1], [0], [0], [1], [0, 0, 1, 1], [], []>} : vector<8x64xf32>, vector<64x256xf32>, vector<8x256xf32> -> vector<8x256xf32>
    %121 = arith.addf %119, %120 : vector<8x256xf32>
    %122 = arith.negf %121 : vector<8x256xf32>
    %123 = math.exp %122 : vector<8x256xf32>
    %cst_51 = arith.constant 1.000000e+00 : f32
    %124 = vector.broadcast %cst_51 : f32 to vector<8x256xf32>
    %125 = arith.addf %124, %123 : vector<8x256xf32>
    %126 = arith.divf %124, %125 : vector<8x256xf32>
    %127 = math.tanh %121 : vector<8x256xf32>
    %128 = arith.select %2, %126, %127 : vector<8x256xi1>, vector<8x256xf32>
    %129 = vector.extract_strided_slice %128 {offsets = [0, 0], sizes = [8, 64], strides = [1, 1]} : vector<8x256xf32> to vector<8x64xf32>
    %130 = vector.extract_strided_slice %128 {offsets = [0, 64], sizes = [8, 64], strides = [1, 1]} : vector<8x256xf32> to vector<8x64xf32>
    %131 = vector.extract_strided_slice %128 {offsets = [0, 128], sizes = [8, 64], strides = [1, 1]} : vector<8x256xf32> to vector<8x64xf32>
    %132 = vector.extract_strided_slice %128 {offsets = [0, 192], sizes = [8, 64], strides = [1, 1]} : vector<8x256xf32> to vector<8x64xf32>
    %133 = arith.mulf %130, %110 : vector<8x64xf32>
    %134 = arith.mulf %129, %132 : vector<8x64xf32>
    %135 = arith.addf %133, %134 : vector<8x64xf32>
    %136 = math.tanh %135 : vector<8x64xf32>
    %137 = arith.mulf %131, %136 : vector<8x64xf32>
    %138 = vector.extract_strided_slice %137 {offsets = [0, 0], sizes = [8, 32], strides = [1, 1]} : vector<8x64xf32> to vector<8x32xf32>
    %c32_52 = arith.constant 32 : index
    %c0_53 = arith.constant 0 : index
    %139 = vector.load %arg6[%c32_52, %c0_53] : memref<64x64xf32, #tpu.memory_space<vmem>>, vector<8x32xf32>
    tpu.vector_store %arg6[%c32_52, %c0_53], %138 {strides = array<i32>} : memref<64x64xf32, #tpu.memory_space<vmem>>, vector<8x32xf32>,
    %140 = vector.extract_strided_slice %137 {offsets = [0, 32], sizes = [8, 32], strides = [1, 1]} : vector<8x64xf32> to vector<8x32xf32>
    %c24_54 = arith.constant 24 : index
    %c32_55 = arith.constant 32 : index
    %141 = vector.load %arg6[%c24_54, %c32_55] : memref<64x64xf32, #tpu.memory_space<vmem>>, vector<8x32xf32>
    tpu.vector_store %arg6[%c24_54, %c32_55], %140 {strides = array<i32>} : memref<64x64xf32, #tpu.memory_space<vmem>>, vector<8x32xf32>,
    %c40_56 = arith.constant 40 : index
    %c0_57 = arith.constant 0 : index
    %142 = vector.load %arg5[%c40_56, %c0_57] : memref<64x512xf32, #tpu.memory_space<vmem>>, vector<8x256xf32>
    %c16_58 = arith.constant 16 : index
    %c256_59 = arith.constant 256 : index
    %143 = vector.load %arg5[%c16_58, %c256_59] : memref<64x512xf32, #tpu.memory_space<vmem>>, vector<8x256xf32>
    %144 = arith.addf %142, %143 : vector<8x256xf32>
    %cst_60 = arith.constant dense<0.000000e+00> : vector<8x256xf32>
    %145 = tpu.matmul %137, %14, %cst_60 {dimension_numbers = #tpu.dot_dimension_numbers<[1], [0], [0], [1], [0, 0, 1, 1], [], []>} : vector<8x64xf32>, vector<64x256xf32>, vector<8x256xf32> -> vector<8x256xf32>
    %146 = arith.addf %144, %145 : vector<8x256xf32>
    %147 = arith.negf %146 : vector<8x256xf32>
    %148 = math.exp %147 : vector<8x256xf32>
    %cst_61 = arith.constant 1.000000e+00 : f32
    %149 = vector.broadcast %cst_61 : f32 to vector<8x256xf32>
    %150 = arith.addf %149, %148 : vector<8x256xf32>
    %151 = arith.divf %149, %150 : vector<8x256xf32>
    %152 = math.tanh %146 : vector<8x256xf32>
    %153 = arith.select %2, %151, %152 : vector<8x256xi1>, vector<8x256xf32>
    %154 = vector.extract_strided_slice %153 {offsets = [0, 0], sizes = [8, 64], strides = [1, 1]} : vector<8x256xf32> to vector<8x64xf32>
    %155 = vector.extract_strided_slice %153 {offsets = [0, 64], sizes = [8, 64], strides = [1, 1]} : vector<8x256xf32> to vector<8x64xf32>
    %156 = vector.extract_strided_slice %153 {offsets = [0, 128], sizes = [8, 64], strides = [1, 1]} : vector<8x256xf32> to vector<8x64xf32>
    %157 = vector.extract_strided_slice %153 {offsets = [0, 192], sizes = [8, 64], strides = [1, 1]} : vector<8x256xf32> to vector<8x64xf32>
    %158 = arith.mulf %155, %135 : vector<8x64xf32>
    %159 = arith.mulf %154, %157 : vector<8x64xf32>
    %160 = arith.addf %158, %159 : vector<8x64xf32>
    %161 = math.tanh %160 : vector<8x64xf32>
    %162 = arith.mulf %156, %161 : vector<8x64xf32>
    %163 = vector.extract_strided_slice %162 {offsets = [0, 0], sizes = [8, 32], strides = [1, 1]} : vector<8x64xf32> to vector<8x32xf32>
    %c40_62 = arith.constant 40 : index
    %c0_63 = arith.constant 0 : index
    %164 = vector.load %arg6[%c40_62, %c0_63] : memref<64x64xf32, #tpu.memory_space<vmem>>, vector<8x32xf32>
    tpu.vector_store %arg6[%c40_62, %c0_63], %163 {strides = array<i32>} : memref<64x64xf32, #tpu.memory_space<vmem>>, vector<8x32xf32>,
    %165 = vector.extract_strided_slice %162 {offsets = [0, 32], sizes = [8, 32], strides = [1, 1]} : vector<8x64xf32> to vector<8x32xf32>
    %c16_64 = arith.constant 16 : index
    %c32_65 = arith.constant 32 : index
    %166 = vector.load %arg6[%c16_64, %c32_65] : memref<64x64xf32, #tpu.memory_space<vmem>>, vector<8x32xf32>
    tpu.vector_store %arg6[%c16_64, %c32_65], %165 {strides = array<i32>} : memref<64x64xf32, #tpu.memory_space<vmem>>, vector<8x32xf32>,
    %c48_66 = arith.constant 48 : index
    %c0_67 = arith.constant 0 : index
    %167 = vector.load %arg5[%c48_66, %c0_67] : memref<64x512xf32, #tpu.memory_space<vmem>>, vector<8x256xf32>
    %c8_68 = arith.constant 8 : index
    %c256_69 = arith.constant 256 : index
    %168 = vector.load %arg5[%c8_68, %c256_69] : memref<64x512xf32, #tpu.memory_space<vmem>>, vector<8x256xf32>
    %169 = arith.addf %167, %168 : vector<8x256xf32>
    %cst_70 = arith.constant dense<0.000000e+00> : vector<8x256xf32>
    %170 = tpu.matmul %162, %14, %cst_70 {dimension_numbers = #tpu.dot_dimension_numbers<[1], [0], [0], [1], [0, 0, 1, 1], [], []>} : vector<8x64xf32>, vector<64x256xf32>, vector<8x256xf32> -> vector<8x256xf32>
    %171 = arith.addf %169, %170 : vector<8x256xf32>
    %172 = arith.negf %171 : vector<8x256xf32>
    %173 = math.exp %172 : vector<8x256xf32>
    %cst_71 = arith.constant 1.000000e+00 : f32
    %174 = vector.broadcast %cst_71 : f32 to vector<8x256xf32>
    %175 = arith.addf %174, %173 : vector<8x256xf32>
    %176 = arith.divf %174, %175 : vector<8x256xf32>
    %177 = math.tanh %171 : vector<8x256xf32>
    %178 = arith.select %2, %176, %177 : vector<8x256xi1>, vector<8x256xf32>
    %179 = vector.extract_strided_slice %178 {offsets = [0, 0], sizes = [8, 64], strides = [1, 1]} : vector<8x256xf32> to vector<8x64xf32>
    %180 = vector.extract_strided_slice %178 {offsets = [0, 64], sizes = [8, 64], strides = [1, 1]} : vector<8x256xf32> to vector<8x64xf32>
    %181 = vector.extract_strided_slice %178 {offsets = [0, 128], sizes = [8, 64], strides = [1, 1]} : vector<8x256xf32> to vector<8x64xf32>
    %182 = vector.extract_strided_slice %178 {offsets = [0, 192], sizes = [8, 64], strides = [1, 1]} : vector<8x256xf32> to vector<8x64xf32>
    %183 = arith.mulf %180, %160 : vector<8x64xf32>
    %184 = arith.mulf %179, %182 : vector<8x64xf32>
    %185 = arith.addf %183, %184 : vector<8x64xf32>
    %186 = math.tanh %185 : vector<8x64xf32>
    %187 = arith.mulf %181, %186 : vector<8x64xf32>
    %188 = vector.extract_strided_slice %187 {offsets = [0, 0], sizes = [8, 32], strides = [1, 1]} : vector<8x64xf32> to vector<8x32xf32>
    %c48_72 = arith.constant 48 : index
    %c0_73 = arith.constant 0 : index
    %189 = vector.load %arg6[%c48_72, %c0_73] : memref<64x64xf32, #tpu.memory_space<vmem>>, vector<8x32xf32>
    tpu.vector_store %arg6[%c48_72, %c0_73], %188 {strides = array<i32>} : memref<64x64xf32, #tpu.memory_space<vmem>>, vector<8x32xf32>,
    %190 = vector.extract_strided_slice %187 {offsets = [0, 32], sizes = [8, 32], strides = [1, 1]} : vector<8x64xf32> to vector<8x32xf32>
    %c8_74 = arith.constant 8 : index
    %c32_75 = arith.constant 32 : index
    %191 = vector.load %arg6[%c8_74, %c32_75] : memref<64x64xf32, #tpu.memory_space<vmem>>, vector<8x32xf32>
    tpu.vector_store %arg6[%c8_74, %c32_75], %190 {strides = array<i32>} : memref<64x64xf32, #tpu.memory_space<vmem>>, vector<8x32xf32>,
    %c56_76 = arith.constant 56 : index
    %c0_77 = arith.constant 0 : index
    %192 = vector.load %arg5[%c56_76, %c0_77] : memref<64x512xf32, #tpu.memory_space<vmem>>, vector<8x256xf32>
    %c0_78 = arith.constant 0 : index
    %c256_79 = arith.constant 256 : index
    %193 = vector.load %arg5[%c0_78, %c256_79] : memref<64x512xf32, #tpu.memory_space<vmem>>, vector<8x256xf32>
    %194 = arith.addf %192, %193 : vector<8x256xf32>
    %cst_80 = arith.constant dense<0.000000e+00> : vector<8x256xf32>
    %195 = tpu.matmul %187, %14, %cst_80 {dimension_numbers = #tpu.dot_dimension_numbers<[1], [0], [0], [1], [0, 0, 1, 1], [], []>} : vector<8x64xf32>, vector<64x256xf32>, vector<8x256xf32> -> vector<8x256xf32>
    %196 = arith.addf %194, %195 : vector<8x256xf32>
    %197 = arith.negf %196 : vector<8x256xf32>
    %198 = math.exp %197 : vector<8x256xf32>
    %cst_81 = arith.constant 1.000000e+00 : f32
    %199 = vector.broadcast %cst_81 : f32 to vector<8x256xf32>
    %200 = arith.addf %199, %198 : vector<8x256xf32>
    %201 = arith.divf %199, %200 : vector<8x256xf32>
    %202 = math.tanh %196 : vector<8x256xf32>
    %203 = arith.select %2, %201, %202 : vector<8x256xi1>, vector<8x256xf32>
    %204 = vector.extract_strided_slice %203 {offsets = [0, 0], sizes = [8, 64], strides = [1, 1]} : vector<8x256xf32> to vector<8x64xf32>
    %205 = vector.extract_strided_slice %203 {offsets = [0, 64], sizes = [8, 64], strides = [1, 1]} : vector<8x256xf32> to vector<8x64xf32>
    %206 = vector.extract_strided_slice %203 {offsets = [0, 128], sizes = [8, 64], strides = [1, 1]} : vector<8x256xf32> to vector<8x64xf32>
    %207 = vector.extract_strided_slice %203 {offsets = [0, 192], sizes = [8, 64], strides = [1, 1]} : vector<8x256xf32> to vector<8x64xf32>
    %208 = arith.mulf %205, %185 : vector<8x64xf32>
    %209 = arith.mulf %204, %207 : vector<8x64xf32>
    %210 = arith.addf %208, %209 : vector<8x64xf32>
    %211 = math.tanh %210 : vector<8x64xf32>
    %212 = arith.mulf %206, %211 : vector<8x64xf32>
    %213 = vector.extract_strided_slice %212 {offsets = [0, 0], sizes = [8, 32], strides = [1, 1]} : vector<8x64xf32> to vector<8x32xf32>
    %c56_82 = arith.constant 56 : index
    %c0_83 = arith.constant 0 : index
    %214 = vector.load %arg6[%c56_82, %c0_83] : memref<64x64xf32, #tpu.memory_space<vmem>>, vector<8x32xf32>
    tpu.vector_store %arg6[%c56_82, %c0_83], %213 {strides = array<i32>} : memref<64x64xf32, #tpu.memory_space<vmem>>, vector<8x32xf32>,
    %215 = vector.extract_strided_slice %212 {offsets = [0, 32], sizes = [8, 32], strides = [1, 1]} : vector<8x64xf32> to vector<8x32xf32>
    %c0_84 = arith.constant 0 : index
    %c32_85 = arith.constant 32 : index
    %216 = vector.load %arg6[%c0_84, %c32_85] : memref<64x64xf32, #tpu.memory_space<vmem>>, vector<8x32xf32>
    tpu.vector_store %arg6[%c0_84, %c32_85], %215 {strides = array<i32>} : memref<64x64xf32, #tpu.memory_space<vmem>>, vector<8x32xf32>,
    %c0_86 = arith.constant 0 : index
    %c0_87 = arith.constant 0 : index
    %217 = vector.load %arg6[%c0_86, %c0_87] : memref<64x64xf32, #tpu.memory_space<vmem>>, vector<64x64xf32>
    %c1 = arith.constant 1 : index
    %c0_88 = arith.constant 0 : index
    %c0_89 = arith.constant 0 : index
    %218 = vector.load %arg1[%c1, %c0_88, %c0_89] : memref<2x64x512xf32, #tpu.memory_space<vmem>>, vector<1x64x512xf32>
    %219 = vector.shape_cast %218 : vector<1x64x512xf32> to vector<64x512xf32>
    %c1_90 = arith.constant 1 : index
    %c0_91 = arith.constant 0 : index
    %c0_92 = arith.constant 0 : index
    %220 = vector.load %arg3[%c1_90, %c0_91, %c0_92] : memref<3x1x512xf32, #tpu.memory_space<vmem>>, vector<1x1x512xf32>
    %221 = vector.shape_cast %220 : vector<1x1x512xf32> to vector<1x512xf32>
    %cst_93 = arith.constant dense<0.000000e+00> : vector<64x512xf32>
    %222 = tpu.matmul %217, %219, %cst_93 {dimension_numbers = #tpu.dot_dimension_numbers<[1], [0], [0], [1], [0, 0, 1, 1], [], []>} : vector<64x64xf32>, vector<64x512xf32>, vector<64x512xf32> -> vector<64x512xf32>
    %223 = vector.broadcast %221 : vector<1x512xf32> to vector<64x512xf32>
    %224 = arith.addf %222, %223 : vector<64x512xf32>
    %c0_94 = arith.constant 0 : index
    %c0_95 = arith.constant 0 : index
    %225 = vector.load %arg5[%c0_94, %c0_95] : memref<64x512xf32, #tpu.memory_space<vmem>>, vector<64x512xf32>
    tpu.vector_store %arg5[%c0_94, %c0_95], %224 {strides = array<i32>} : memref<64x512xf32, #tpu.memory_space<vmem>>, vector<64x512xf32>,
    %c1_96 = arith.constant 1 : index
    %c0_97 = arith.constant 0 : index
    %c0_98 = arith.constant 0 : index
    %226 = vector.load %arg2[%c1_96, %c0_97, %c0_98] : memref<2x64x256xf32, #tpu.memory_space<vmem>>, vector<1x64x256xf32>
    %227 = vector.shape_cast %226 : vector<1x64x256xf32> to vector<64x256xf32>
    %cst_99 = arith.constant 0.000000e+00 : f32
    %228 = vector.broadcast %cst_99 : f32 to vector<8x64xf32>
    %cst_100 = arith.constant 0.000000e+00 : f32
    %229 = vector.broadcast %cst_100 : f32 to vector<8x64xf32>
    %c0_101 = arith.constant 0 : index
    %c0_102 = arith.constant 0 : index
    %230 = vector.load %arg5[%c0_101, %c0_102] : memref<64x512xf32, #tpu.memory_space<vmem>>, vector<8x256xf32>
    %c56_103 = arith.constant 56 : index
    %c256_104 = arith.constant 256 : index
    %231 = vector.load %arg5[%c56_103, %c256_104] : memref<64x512xf32, #tpu.memory_space<vmem>>, vector<8x256xf32>
    %232 = arith.addf %230, %231 : vector<8x256xf32>
    %cst_105 = arith.constant dense<0.000000e+00> : vector<8x256xf32>
    %233 = tpu.matmul %228, %227, %cst_105 {dimension_numbers = #tpu.dot_dimension_numbers<[1], [0], [0], [1], [0, 0, 1, 1], [], []>} : vector<8x64xf32>, vector<64x256xf32>, vector<8x256xf32> -> vector<8x256xf32>
    %234 = arith.addf %232, %233 : vector<8x256xf32>
    %235 = arith.negf %234 : vector<8x256xf32>
    %236 = math.exp %235 : vector<8x256xf32>
    %cst_106 = arith.constant 1.000000e+00 : f32
    %237 = vector.broadcast %cst_106 : f32 to vector<8x256xf32>
    %238 = arith.addf %237, %236 : vector<8x256xf32>
    %239 = arith.divf %237, %238 : vector<8x256xf32>
    %240 = math.tanh %234 : vector<8x256xf32>
    %241 = arith.select %2, %239, %240 : vector<8x256xi1>, vector<8x256xf32>
    %242 = vector.extract_strided_slice %241 {offsets = [0, 0], sizes = [8, 64], strides = [1, 1]} : vector<8x256xf32> to vector<8x64xf32>
    %243 = vector.extract_strided_slice %241 {offsets = [0, 64], sizes = [8, 64], strides = [1, 1]} : vector<8x256xf32> to vector<8x64xf32>
    %244 = vector.extract_strided_slice %241 {offsets = [0, 128], sizes = [8, 64], strides = [1, 1]} : vector<8x256xf32> to vector<8x64xf32>
    %245 = vector.extract_strided_slice %241 {offsets = [0, 192], sizes = [8, 64], strides = [1, 1]} : vector<8x256xf32> to vector<8x64xf32>
    %246 = arith.mulf %243, %229 : vector<8x64xf32>
    %247 = arith.mulf %242, %245 : vector<8x64xf32>
    %248 = arith.addf %246, %247 : vector<8x64xf32>
    %249 = math.tanh %248 : vector<8x64xf32>
    %250 = arith.mulf %244, %249 : vector<8x64xf32>
    %c8_107 = arith.constant 8 : index
    %c0_108 = arith.constant 0 : index
    %251 = vector.load %arg5[%c8_107, %c0_108] : memref<64x512xf32, #tpu.memory_space<vmem>>, vector<8x256xf32>
    %c48_109 = arith.constant 48 : index
    %c256_110 = arith.constant 256 : index
    %252 = vector.load %arg5[%c48_109, %c256_110] : memref<64x512xf32, #tpu.memory_space<vmem>>, vector<8x256xf32>
    %253 = arith.addf %251, %252 : vector<8x256xf32>
    %cst_111 = arith.constant dense<0.000000e+00> : vector<8x256xf32>
    %254 = tpu.matmul %250, %227, %cst_111 {dimension_numbers = #tpu.dot_dimension_numbers<[1], [0], [0], [1], [0, 0, 1, 1], [], []>} : vector<8x64xf32>, vector<64x256xf32>, vector<8x256xf32> -> vector<8x256xf32>
    %255 = arith.addf %253, %254 : vector<8x256xf32>
    %256 = arith.negf %255 : vector<8x256xf32>
    %257 = math.exp %256 : vector<8x256xf32>
    %cst_112 = arith.constant 1.000000e+00 : f32
    %258 = vector.broadcast %cst_112 : f32 to vector<8x256xf32>
    %259 = arith.addf %258, %257 : vector<8x256xf32>
    %260 = arith.divf %258, %259 : vector<8x256xf32>
    %261 = math.tanh %255 : vector<8x256xf32>
    %262 = arith.select %2, %260, %261 : vector<8x256xi1>, vector<8x256xf32>
    %263 = vector.extract_strided_slice %262 {offsets = [0, 0], sizes = [8, 64], strides = [1, 1]} : vector<8x256xf32> to vector<8x64xf32>
    %264 = vector.extract_strided_slice %262 {offsets = [0, 64], sizes = [8, 64], strides = [1, 1]} : vector<8x256xf32> to vector<8x64xf32>
    %265 = vector.extract_strided_slice %262 {offsets = [0, 128], sizes = [8, 64], strides = [1, 1]} : vector<8x256xf32> to vector<8x64xf32>
    %266 = vector.extract_strided_slice %262 {offsets = [0, 192], sizes = [8, 64], strides = [1, 1]} : vector<8x256xf32> to vector<8x64xf32>
    %267 = arith.mulf %264, %248 : vector<8x64xf32>
    %268 = arith.mulf %263, %266 : vector<8x64xf32>
    %269 = arith.addf %267, %268 : vector<8x64xf32>
    %270 = math.tanh %269 : vector<8x64xf32>
    %271 = arith.mulf %265, %270 : vector<8x64xf32>
    %c16_113 = arith.constant 16 : index
    %c0_114 = arith.constant 0 : index
    %272 = vector.load %arg5[%c16_113, %c0_114] : memref<64x512xf32, #tpu.memory_space<vmem>>, vector<8x256xf32>
    %c40_115 = arith.constant 40 : index
    %c256_116 = arith.constant 256 : index
    %273 = vector.load %arg5[%c40_115, %c256_116] : memref<64x512xf32, #tpu.memory_space<vmem>>, vector<8x256xf32>
    %274 = arith.addf %272, %273 : vector<8x256xf32>
    %cst_117 = arith.constant dense<0.000000e+00> : vector<8x256xf32>
    %275 = tpu.matmul %271, %227, %cst_117 {dimension_numbers = #tpu.dot_dimension_numbers<[1], [0], [0], [1], [0, 0, 1, 1], [], []>} : vector<8x64xf32>, vector<64x256xf32>, vector<8x256xf32> -> vector<8x256xf32>
    %276 = arith.addf %274, %275 : vector<8x256xf32>
    %277 = arith.negf %276 : vector<8x256xf32>
    %278 = math.exp %277 : vector<8x256xf32>
    %cst_118 = arith.constant 1.000000e+00 : f32
    %279 = vector.broadcast %cst_118 : f32 to vector<8x256xf32>
    %280 = arith.addf %279, %278 : vector<8x256xf32>
    %281 = arith.divf %279, %280 : vector<8x256xf32>
    %282 = math.tanh %276 : vector<8x256xf32>
    %283 = arith.select %2, %281, %282 : vector<8x256xi1>, vector<8x256xf32>
    %284 = vector.extract_strided_slice %283 {offsets = [0, 0], sizes = [8, 64], strides = [1, 1]} : vector<8x256xf32> to vector<8x64xf32>
    %285 = vector.extract_strided_slice %283 {offsets = [0, 64], sizes = [8, 64], strides = [1, 1]} : vector<8x256xf32> to vector<8x64xf32>
    %286 = vector.extract_strided_slice %283 {offsets = [0, 128], sizes = [8, 64], strides = [1, 1]} : vector<8x256xf32> to vector<8x64xf32>
    %287 = vector.extract_strided_slice %283 {offsets = [0, 192], sizes = [8, 64], strides = [1, 1]} : vector<8x256xf32> to vector<8x64xf32>
    %288 = arith.mulf %285, %269 : vector<8x64xf32>
    %289 = arith.mulf %284, %287 : vector<8x64xf32>
    %290 = arith.addf %288, %289 : vector<8x64xf32>
    %291 = math.tanh %290 : vector<8x64xf32>
    %292 = arith.mulf %286, %291 : vector<8x64xf32>
    %c24_119 = arith.constant 24 : index
    %c0_120 = arith.constant 0 : index
    %293 = vector.load %arg5[%c24_119, %c0_120] : memref<64x512xf32, #tpu.memory_space<vmem>>, vector<8x256xf32>
    %c32_121 = arith.constant 32 : index
    %c256_122 = arith.constant 256 : index
    %294 = vector.load %arg5[%c32_121, %c256_122] : memref<64x512xf32, #tpu.memory_space<vmem>>, vector<8x256xf32>
    %295 = arith.addf %293, %294 : vector<8x256xf32>
    %cst_123 = arith.constant dense<0.000000e+00> : vector<8x256xf32>
    %296 = tpu.matmul %292, %227, %cst_123 {dimension_numbers = #tpu.dot_dimension_numbers<[1], [0], [0], [1], [0, 0, 1, 1], [], []>} : vector<8x64xf32>, vector<64x256xf32>, vector<8x256xf32> -> vector<8x256xf32>
    %297 = arith.addf %295, %296 : vector<8x256xf32>
    %298 = arith.negf %297 : vector<8x256xf32>
    %299 = math.exp %298 : vector<8x256xf32>
    %cst_124 = arith.constant 1.000000e+00 : f32
    %300 = vector.broadcast %cst_124 : f32 to vector<8x256xf32>
    %301 = arith.addf %300, %299 : vector<8x256xf32>
    %302 = arith.divf %300, %301 : vector<8x256xf32>
    %303 = math.tanh %297 : vector<8x256xf32>
    %304 = arith.select %2, %302, %303 : vector<8x256xi1>, vector<8x256xf32>
    %305 = vector.extract_strided_slice %304 {offsets = [0, 0], sizes = [8, 64], strides = [1, 1]} : vector<8x256xf32> to vector<8x64xf32>
    %306 = vector.extract_strided_slice %304 {offsets = [0, 64], sizes = [8, 64], strides = [1, 1]} : vector<8x256xf32> to vector<8x64xf32>
    %307 = vector.extract_strided_slice %304 {offsets = [0, 128], sizes = [8, 64], strides = [1, 1]} : vector<8x256xf32> to vector<8x64xf32>
    %308 = vector.extract_strided_slice %304 {offsets = [0, 192], sizes = [8, 64], strides = [1, 1]} : vector<8x256xf32> to vector<8x64xf32>
    %309 = arith.mulf %306, %290 : vector<8x64xf32>
    %310 = arith.mulf %305, %308 : vector<8x64xf32>
    %311 = arith.addf %309, %310 : vector<8x64xf32>
    %312 = math.tanh %311 : vector<8x64xf32>
    %313 = arith.mulf %307, %312 : vector<8x64xf32>
    %c32_125 = arith.constant 32 : index
    %c0_126 = arith.constant 0 : index
    %314 = vector.load %arg5[%c32_125, %c0_126] : memref<64x512xf32, #tpu.memory_space<vmem>>, vector<8x256xf32>
    %c24_127 = arith.constant 24 : index
    %c256_128 = arith.constant 256 : index
    %315 = vector.load %arg5[%c24_127, %c256_128] : memref<64x512xf32, #tpu.memory_space<vmem>>, vector<8x256xf32>
    %316 = arith.addf %314, %315 : vector<8x256xf32>
    %cst_129 = arith.constant dense<0.000000e+00> : vector<8x256xf32>
    %317 = tpu.matmul %313, %227, %cst_129 {dimension_numbers = #tpu.dot_dimension_numbers<[1], [0], [0], [1], [0, 0, 1, 1], [], []>} : vector<8x64xf32>, vector<64x256xf32>, vector<8x256xf32> -> vector<8x256xf32>
    %318 = arith.addf %316, %317 : vector<8x256xf32>
    %319 = arith.negf %318 : vector<8x256xf32>
    %320 = math.exp %319 : vector<8x256xf32>
    %cst_130 = arith.constant 1.000000e+00 : f32
    %321 = vector.broadcast %cst_130 : f32 to vector<8x256xf32>
    %322 = arith.addf %321, %320 : vector<8x256xf32>
    %323 = arith.divf %321, %322 : vector<8x256xf32>
    %324 = math.tanh %318 : vector<8x256xf32>
    %325 = arith.select %2, %323, %324 : vector<8x256xi1>, vector<8x256xf32>
    %326 = vector.extract_strided_slice %325 {offsets = [0, 0], sizes = [8, 64], strides = [1, 1]} : vector<8x256xf32> to vector<8x64xf32>
    %327 = vector.extract_strided_slice %325 {offsets = [0, 64], sizes = [8, 64], strides = [1, 1]} : vector<8x256xf32> to vector<8x64xf32>
    %328 = vector.extract_strided_slice %325 {offsets = [0, 128], sizes = [8, 64], strides = [1, 1]} : vector<8x256xf32> to vector<8x64xf32>
    %329 = vector.extract_strided_slice %325 {offsets = [0, 192], sizes = [8, 64], strides = [1, 1]} : vector<8x256xf32> to vector<8x64xf32>
    %330 = arith.mulf %327, %311 : vector<8x64xf32>
    %331 = arith.mulf %326, %329 : vector<8x64xf32>
    %332 = arith.addf %330, %331 : vector<8x64xf32>
    %333 = math.tanh %332 : vector<8x64xf32>
    %334 = arith.mulf %328, %333 : vector<8x64xf32>
    %c40_131 = arith.constant 40 : index
    %c0_132 = arith.constant 0 : index
    %335 = vector.load %arg5[%c40_131, %c0_132] : memref<64x512xf32, #tpu.memory_space<vmem>>, vector<8x256xf32>
    %c16_133 = arith.constant 16 : index
    %c256_134 = arith.constant 256 : index
    %336 = vector.load %arg5[%c16_133, %c256_134] : memref<64x512xf32, #tpu.memory_space<vmem>>, vector<8x256xf32>
    %337 = arith.addf %335, %336 : vector<8x256xf32>
    %cst_135 = arith.constant dense<0.000000e+00> : vector<8x256xf32>
    %338 = tpu.matmul %334, %227, %cst_135 {dimension_numbers = #tpu.dot_dimension_numbers<[1], [0], [0], [1], [0, 0, 1, 1], [], []>} : vector<8x64xf32>, vector<64x256xf32>, vector<8x256xf32> -> vector<8x256xf32>
    %339 = arith.addf %337, %338 : vector<8x256xf32>
    %340 = arith.negf %339 : vector<8x256xf32>
    %341 = math.exp %340 : vector<8x256xf32>
    %cst_136 = arith.constant 1.000000e+00 : f32
    %342 = vector.broadcast %cst_136 : f32 to vector<8x256xf32>
    %343 = arith.addf %342, %341 : vector<8x256xf32>
    %344 = arith.divf %342, %343 : vector<8x256xf32>
    %345 = math.tanh %339 : vector<8x256xf32>
    %346 = arith.select %2, %344, %345 : vector<8x256xi1>, vector<8x256xf32>
    %347 = vector.extract_strided_slice %346 {offsets = [0, 0], sizes = [8, 64], strides = [1, 1]} : vector<8x256xf32> to vector<8x64xf32>
    %348 = vector.extract_strided_slice %346 {offsets = [0, 64], sizes = [8, 64], strides = [1, 1]} : vector<8x256xf32> to vector<8x64xf32>
    %349 = vector.extract_strided_slice %346 {offsets = [0, 128], sizes = [8, 64], strides = [1, 1]} : vector<8x256xf32> to vector<8x64xf32>
    %350 = vector.extract_strided_slice %346 {offsets = [0, 192], sizes = [8, 64], strides = [1, 1]} : vector<8x256xf32> to vector<8x64xf32>
    %351 = arith.mulf %348, %332 : vector<8x64xf32>
    %352 = arith.mulf %347, %350 : vector<8x64xf32>
    %353 = arith.addf %351, %352 : vector<8x64xf32>
    %354 = math.tanh %353 : vector<8x64xf32>
    %355 = arith.mulf %349, %354 : vector<8x64xf32>
    %c48_137 = arith.constant 48 : index
    %c0_138 = arith.constant 0 : index
    %356 = vector.load %arg5[%c48_137, %c0_138] : memref<64x512xf32, #tpu.memory_space<vmem>>, vector<8x256xf32>
    %c8_139 = arith.constant 8 : index
    %c256_140 = arith.constant 256 : index
    %357 = vector.load %arg5[%c8_139, %c256_140] : memref<64x512xf32, #tpu.memory_space<vmem>>, vector<8x256xf32>
    %358 = arith.addf %356, %357 : vector<8x256xf32>
    %cst_141 = arith.constant dense<0.000000e+00> : vector<8x256xf32>
    %359 = tpu.matmul %355, %227, %cst_141 {dimension_numbers = #tpu.dot_dimension_numbers<[1], [0], [0], [1], [0, 0, 1, 1], [], []>} : vector<8x64xf32>, vector<64x256xf32>, vector<8x256xf32> -> vector<8x256xf32>
    %360 = arith.addf %358, %359 : vector<8x256xf32>
    %361 = arith.negf %360 : vector<8x256xf32>
    %362 = math.exp %361 : vector<8x256xf32>
    %cst_142 = arith.constant 1.000000e+00 : f32
    %363 = vector.broadcast %cst_142 : f32 to vector<8x256xf32>
    %364 = arith.addf %363, %362 : vector<8x256xf32>
    %365 = arith.divf %363, %364 : vector<8x256xf32>
    %366 = math.tanh %360 : vector<8x256xf32>
    %367 = arith.select %2, %365, %366 : vector<8x256xi1>, vector<8x256xf32>
    %368 = vector.extract_strided_slice %367 {offsets = [0, 0], sizes = [8, 64], strides = [1, 1]} : vector<8x256xf32> to vector<8x64xf32>
    %369 = vector.extract_strided_slice %367 {offsets = [0, 64], sizes = [8, 64], strides = [1, 1]} : vector<8x256xf32> to vector<8x64xf32>
    %370 = vector.extract_strided_slice %367 {offsets = [0, 128], sizes = [8, 64], strides = [1, 1]} : vector<8x256xf32> to vector<8x64xf32>
    %371 = vector.extract_strided_slice %367 {offsets = [0, 192], sizes = [8, 64], strides = [1, 1]} : vector<8x256xf32> to vector<8x64xf32>
    %372 = arith.mulf %369, %353 : vector<8x64xf32>
    %373 = arith.mulf %368, %371 : vector<8x64xf32>
    %374 = arith.addf %372, %373 : vector<8x64xf32>
    %375 = math.tanh %374 : vector<8x64xf32>
    %376 = arith.mulf %370, %375 : vector<8x64xf32>
    %c56_143 = arith.constant 56 : index
    %c0_144 = arith.constant 0 : index
    %377 = vector.load %arg5[%c56_143, %c0_144] : memref<64x512xf32, #tpu.memory_space<vmem>>, vector<8x256xf32>
    %c0_145 = arith.constant 0 : index
    %c256_146 = arith.constant 256 : index
    %378 = vector.load %arg5[%c0_145, %c256_146] : memref<64x512xf32, #tpu.memory_space<vmem>>, vector<8x256xf32>
    %379 = arith.addf %377, %378 : vector<8x256xf32>
    %cst_147 = arith.constant dense<0.000000e+00> : vector<8x256xf32>
    %380 = tpu.matmul %376, %227, %cst_147 {dimension_numbers = #tpu.dot_dimension_numbers<[1], [0], [0], [1], [0, 0, 1, 1], [], []>} : vector<8x64xf32>, vector<64x256xf32>, vector<8x256xf32> -> vector<8x256xf32>
    %381 = arith.addf %379, %380 : vector<8x256xf32>
    %382 = arith.negf %381 : vector<8x256xf32>
    %383 = math.exp %382 : vector<8x256xf32>
    %cst_148 = arith.constant 1.000000e+00 : f32
    %384 = vector.broadcast %cst_148 : f32 to vector<8x256xf32>
    %385 = arith.addf %384, %383 : vector<8x256xf32>
    %386 = arith.divf %384, %385 : vector<8x256xf32>
    %387 = math.tanh %381 : vector<8x256xf32>
    %388 = arith.select %2, %386, %387 : vector<8x256xi1>, vector<8x256xf32>
    %389 = vector.extract_strided_slice %388 {offsets = [0, 0], sizes = [8, 64], strides = [1, 1]} : vector<8x256xf32> to vector<8x64xf32>
    %390 = vector.extract_strided_slice %388 {offsets = [0, 64], sizes = [8, 64], strides = [1, 1]} : vector<8x256xf32> to vector<8x64xf32>
    %391 = vector.extract_strided_slice %388 {offsets = [0, 128], sizes = [8, 64], strides = [1, 1]} : vector<8x256xf32> to vector<8x64xf32>
    %392 = vector.extract_strided_slice %388 {offsets = [0, 192], sizes = [8, 64], strides = [1, 1]} : vector<8x256xf32> to vector<8x64xf32>
    %393 = arith.mulf %390, %374 : vector<8x64xf32>
    %394 = arith.mulf %389, %392 : vector<8x64xf32>
    %395 = arith.addf %393, %394 : vector<8x64xf32>
    %396 = math.tanh %395 : vector<8x64xf32>
    %397 = arith.mulf %391, %396 : vector<8x64xf32>
    %c32_i32 = arith.constant 32 : i32
    %398 = vector.broadcast %c32_i32 : i32 to vector<8x64xi32>
    %399 = arith.cmpi slt, %3, %398 : vector<8x64xi32>
    %400 = arith.select %399, %397, %250 : vector<8x64xi1>, vector<8x64xf32>
    %c2 = arith.constant 2 : index
    %c0_149 = arith.constant 0 : index
    %c0_150 = arith.constant 0 : index
    %401 = vector.load %arg3[%c2, %c0_149, %c0_150] : memref<3x1x512xf32, #tpu.memory_space<vmem>>, vector<1x1x512xf32>
    %402 = vector.shape_cast %401 : vector<1x1x512xf32> to vector<1x512xf32>
    %403 = vector.extract_strided_slice %402 {offsets = [0, 0], sizes = [1, 64], strides = [1, 1]} : vector<1x512xf32> to vector<1x64xf32>
    %404 = vector.extract_strided_slice %402 {offsets = [0, 64], sizes = [1, 1], strides = [1, 1]} : vector<1x512xf32> to vector<1x1xf32>
    %405 = vector.broadcast %403 : vector<1x64xf32> to vector<8x64xf32>
    %406 = arith.mulf %400, %405 : vector<8x64xf32>
    %cst_151 = arith.constant dense<0.000000e+00> : vector<8xf32>
    %407 = vector.multi_reduction <add>, %406, %cst_151 [1] : vector<8x64xf32> to vector<8xf32>
    %408 = vector.shape_cast %407 : vector<8xf32> to vector<8x1xf32>
    %409 = vector.broadcast %404 : vector<1x1xf32> to vector<8x1xf32>
    %410 = arith.addf %408, %409 : vector<8x1xf32>
    %c0_152 = arith.constant 0 : index
    %c0_153 = arith.constant 0 : index
    %411 = vector.load %arg4[%c0_152, %c0_153] : memref<8x1xf32, #tpu.memory_space<vmem>>, vector<8x1xf32>
    tpu.vector_store %arg4[%c0_152, %c0_153], %410 {strides = array<i32>} : memref<8x1xf32, #tpu.memory_space<vmem>>, vector<8x1xf32>,
    return
  }
}

</mosaic_0001>

<bundles_post_ra>
// kernel: lstm_model_forward.1
= control target key start
LH: loop header
LB: loop body
LE: loop exit
PB: predicated region body
PF: predicated region fallthrough
CT: control target
= control target key end

     0   :  { %vm72_vm0 = vcmask 523264   ;;  %v2763_v56 = vmov 0.0   ;;  %s2764_s24 = smov 64   ;;  %vm419_vm10 = vcmask 261120   ;;  %vm421_vm11 = vcmask 523520   ;;  %s3865_s1 = inlined_call_operand.vmem [shape: f32[2,64,512], index: 1, kind: input, shape index: {}]   ;;  %s3866_s0 = inlined_call_operand.vmem [shape: f32[64,64], index: 0, kind: input, shape index: {}]   ;;  %s3867_s2 = inlined_call_operand.vmem [shape: f32[2,64,256], index: 2, kind: input, shape index: {}]   ;;  %s3868_s3 = inlined_call_operand.vmem [shape: f32[3,1,512], index: 3, kind: input, shape index: {}]   ;;  %s3869_s4 = inlined_call_operand.vmem [shape: f32[8,1], index: 4, kind: output, shape index: {}]  }
   0x1   :  { %v59_v0 = vld [vmem:[%s3865_s1 + $0xe8] sm:$0xff]  ;;  %v61_v1 = vld [vmem:[%s3865_s1 + $0xf8] sm:$0xff]  ;;  %v60_v12 = vld [vmem:[%s3865_s1 + $0xf0] sm:$0xff] }
   0x2   :  { %v55_v2 = vld [vmem:[%s3865_s1 + $0xc8] sm:$0xff]  ;;  %146 = vmatpush.msra.mxu1 %v59_v0  ;;  %228 = vmatpush.msra.mxu3 %v61_v1  ;;  %v57_v3 = vld [vmem:[%s3865_s1 + $0xd8] sm:$0xff]  ;;  %v58_v13 = vld [vmem:[%s3865_s1 + $0xe0] sm:$0xff] }
   0x3   :  { %v51_v4 = vld [vmem:[%s3865_s1 + $0xa8] sm:$0xff]  ;;  %v53_v5 = vld [vmem:[%s3865_s1 + $0xb8] sm:$0xff]  ;;  %v56_v14 = vld [vmem:[%s3865_s1 + $0xd0] sm:$0xff]  ;;  %187 = vmatpush.msra.mxu2 %v60_v12  ;;  %105 = vmatpush.msra.mxu0 %v58_v13 }
   0x4   :  { %147 = vmatpush.msra.mxu1 %v55_v2  ;;  %229 = vmatpush.msra.mxu3 %v57_v3  ;;  %v47_v6 = vld [vmem:[%s3865_s1 + $0x88] sm:$0xff]  ;;  %v49_v7 = vld [vmem:[%s3865_s1 + $0x98] sm:$0xff]  ;;  %v54_v15 = vld [vmem:[%s3865_s1 + $0xc0] sm:$0xff] }
   0x5   :  { %v43_v8 = vld [vmem:[%s3865_s1 + $0x68] sm:$0xff]  ;;  %v45_v9 = vld [vmem:[%s3865_s1 + $0x78] sm:$0xff]  ;;  %188 = vmatpush.msra.mxu2 %v56_v14  ;;  %106 = vmatpush.msra.mxu0 %v54_v15  ;;  %v22_v20 = vld [vmem:[%s3866_s0] sm:$0xff] }
   0x6   :  { %148 = vmatpush.msra.mxu1 %v51_v4  ;;  %230 = vmatpush.msra.mxu3 %v53_v5  ;;  %v39_v10 = vld [vmem:[%s3865_s1 + $0x48] sm:$0xff]  ;;  %v41_v11 = vld [vmem:[%s3865_s1 + $0x58] sm:$0xff]  ;;  %v52_v22 = vld [vmem:[%s3865_s1 + $0xb0] sm:$0xff] }
   0x7   :  { %v35_v16 = vld [vmem:[%s3865_s1 + $0x28] sm:$0xff]  ;;  %v37_v17 = vld [vmem:[%s3865_s1 + $0x38] sm:$0xff]  ;;  %v50_v24 = vld [vmem:[%s3865_s1 + $0xa0] sm:$0xff]  ;;  %189 = vmatpush.msra.mxu2 %v52_v22 }
   0x8   :  { %149 = vmatpush.msra.mxu1 %v47_v6  ;;  %231 = vmatpush.msra.mxu3 %v49_v7  ;;  %v31_v18 = vld [vmem:[%s3865_s1 + $0x8] sm:$0xff]  ;;  %v33_v19 = vld [vmem:[%s3865_s1 + $0x18] sm:$0xff]  ;;  %v48_v25 = vld [vmem:[%s3865_s1 + $0x90] sm:$0xff] }
   0x9   :  { %v2856_v21 = vld [vmem:[%s3867_s2 + $0x78] sm:$0xff]  ;;  %v2866_v23 = vld [vmem:[%s3867_s2 + $0x68] sm:$0xff]  ;;  %v46_v26 = vld [vmem:[%s3865_s1 + $0x80] sm:$0xff]  ;;  %107 = vmatpush.msra.mxu0 %v50_v24  ;;  %190 = vmatpush.msra.mxu2 %v48_v25 }
   0xa   :  { %150 = vmatpush.msra.mxu1 %v43_v8  ;;  %232 = vmatpush.msra.mxu3 %v45_v9  ;;  %v2881_v27 = vld [vmem:[%s3867_s2 + $0x58] sm:$0xff]  ;;  %v44_v28 = vld [vmem:[%s3865_s1 + $0x70] sm:$0xff]  ;;  %v42_v29 = vld [vmem:[%s3865_s1 + $0x60] sm:$0xff] }
   0xb   :  { %v2894_v30 = vld [vmem:[%s3867_s2 + $0x48] sm:$0xff]  ;;  %108 = vmatpush.msra.mxu0 %v46_v26  ;;  %v40_v31 = vld [vmem:[%s3865_s1 + $0x50] sm:$0xff]  ;;  %191 = vmatpush.msra.mxu2 %v44_v28  ;;  %v2907_v33 = vld [vmem:[%s3867_s2 + $0x38] sm:$0xff] }
   0xc   :  { %151 = vmatpush.msra.mxu1 %v39_v10  ;;  %233 = vmatpush.msra.mxu3 %v41_v11  ;;  %v23_v32 = vld [vmem:[%s3866_s0 + $0x8] sm:$0xff]  ;;  %v38_v34 = vld [vmem:[%s3865_s1 + $0x40] sm:$0xff]  ;;  %v36_v35 = vld [vmem:[%s3865_s1 + $0x30] sm:$0xff] }
   0xd   :  { %109 = vmatpush.msra.mxu0 %v42_v29  ;;  %192 = vmatpush.msra.mxu2 %v40_v31  ;;  %v34_v36 = vld [vmem:[%s3865_s1 + $0x20] sm:$0xff]  ;;  %v2925_v37 = vld [vmem:[%s3867_s2 + $0x28] sm:$0xff]  ;;  %v32_v38 = vld [vmem:[%s3865_s1 + $0x10] sm:$0xff] }
   0xe   :  { %152 = vmatpush.msra.mxu1 %v35_v16  ;;  %234 = vmatpush.msra.mxu3 %v37_v17  ;;  %v30_v39 = vld [vmem:[%s3865_s1] sm:$0xff]  ;;  %v24_v40 = vld [vmem:[%s3866_s0 + $0x10] sm:$0xff]  ;;  %v2948_v41 = vld [vmem:[%s3867_s2 + $0x18] sm:$0xff] }
   0xf   :  { %110 = vmatpush.msra.mxu0 %v38_v34  ;;  %193 = vmatpush.msra.mxu2 %v36_v35  ;;  %v25_v42 = vld [vmem:[%s3866_s0 + $0x18] sm:$0xff]  ;;  %v2962_v43 = vld [vmem:[%s3867_s2 + $0x8] sm:$0xff]  ;;  %v26_v44 = vld [vmem:[%s3866_s0 + $0x20] sm:$0xff] }
  0x10   :  { %153 = vmatpush.msra.mxu1 %v31_v18  ;;  %235 = vmatpush.msra.mxu3 %v33_v19  ;;  %v2982_v45 = vld [vmem:[%s3867_s2 + $0x70] sm:$0xff]  ;;  %v2987_v46 = vld [vmem:[%s3867_s2 + $0x60] sm:$0xff]  ;;  %v27_v48 = vld [vmem:[%s3866_s0 + $0x28] sm:$0xff] }
  0x11   :  { %2403 = vmatmul.msk.f32.vlgmr.msra.gmra.mxu1 %vm72_vm0, %v22_v20  ;;  %2419 = vmatmul.msk.f32.vlgmr.msra.gmra.mxu3 %vm72_vm0, %v22_v20  ;;  %v2994_v47 = vld [vmem:[%s3867_s2 + $0x50] sm:$0xff]  ;;  %v3010_v49 = vld [vmem:[%s3867_s2 + $0x40] sm:$0xff]  ;;  %v29_v55 = vld [vmem:[%s3866_s0 + $0x38] sm:$0xff] }
  0x12   :  { %346 = vmatpush.msrb.mxu1 %v2856_v21  ;;  %460 = vmatpush.msrb.mxu3 %v2856_v21  ;;  %v3016_v50 = vld [vmem:[%s3867_s2 + $0x30] sm:$0xff]  ;;  %v3026_v51 = vld [vmem:[%s3867_s2 + $0x20] sm:$0xff] }
  0x13   :  { %111 = vmatpush.msra.mxu0 %v34_v36  ;;  %194 = vmatpush.msra.mxu2 %v32_v38  ;;  %v3033_v52 = vld [vmem:[%s3867_s2 + $0x10] sm:$0xff]  ;;  %v3042_v53 = vld [vmem:[%s3867_s2] sm:$0xff] }
  0x14   :  { %347 = vmatpush.msrb.mxu1 %v2866_v23  ;;  %461 = vmatpush.msrb.mxu3 %v2866_v23  ;;  %v28_v54 = vld [vmem:[%s3866_s0 + $0x30] sm:$0xff]  ;;  %v62_v58 = vld [vmem:[%s3868_s3] sm:$0xf] }
  0x15   :  { %2411 = vmatmul.msk.f32.vlgmr.msra.gmra.mxu2 %vm72_vm0, %v22_v20  ;;  %112 = vmatpush.msra.mxu0 %v30_v39  ;;  %v3109_v59 = vperm.slane %v62_v58, 3  ;;  %v65_v61 = vperm.slane %v62_v58, 1  ;;  %v3115_v6 = vperm.slane %v62_v58, 2  ;;  %v3120_v9 = vperm.slane %v62_v58, 0 }
  0x16   :  { %348 = vmatpush.msrb.mxu1 %v2881_v27  ;;  %462 = vmatpush.msrb.mxu3 %v2881_v27 }
  0x17   :  { %2395 = vmatmul.msk.f32.vlgmr.msra.gmra.mxu0 %vm72_vm0, %v22_v20  ;;  %440 = vmatpush.msrb.mxu2 %v2982_v45 }
  0x18   :  { %349 = vmatpush.msrb.mxu1 %v2894_v30  ;;  %463 = vmatpush.msrb.mxu3 %v2894_v30 }
  0x19   :  { %2404 = vmatmul.msk.f32.gmra.mxu1 %vm72_vm0, %v23_v32  ;;  %2420 = vmatmul.msk.f32.gmra.mxu3 %vm72_vm0, %v23_v32 }
  0x1a   :  { %350 = vmatpush.msrb.mxu1 %v2907_v33  ;;  %464 = vmatpush.msrb.mxu3 %v2907_v33 }
  0x1b   :  { %326 = vmatpush.msrb.mxu0 %v2982_v45  ;;  %441 = vmatpush.msrb.mxu2 %v2987_v46 }
  0x1c   :  { %351 = vmatpush.msrb.mxu1 %v2925_v37  ;;  %465 = vmatpush.msrb.mxu3 %v2925_v37 }
  0x1d   :  { %2412 = vmatmul.msk.f32.gmra.mxu2 %vm72_vm0, %v23_v32  ;;  %327 = vmatpush.msrb.mxu0 %v2987_v46 }
  0x1e   :  { %352 = vmatpush.msrb.mxu1 %v2948_v41  ;;  %466 = vmatpush.msrb.mxu3 %v2948_v41 }
  0x1f   :  { %2396 = vmatmul.msk.f32.gmra.mxu0 %vm72_vm0, %v23_v32  ;;  %442 = vmatpush.msrb.mxu2 %v2994_v47 }
  0x20   :  { %353 = vmatpush.msrb.mxu1 %v2962_v43  ;;  %467 = vmatpush.msrb.mxu3 %v2962_v43 }
  0x21   :  { %2405 = vmatmul.msk.f32.gmra.mxu1 %vm72_vm0, %v24_v40  ;;  %2421 = vmatmul.msk.f32.gmra.mxu3 %vm72_vm0, %v24_v40 }
  0x22   :  { %572 = vmatpush.msra.mxu1 %v2856_v21  ;;  %684 = vmatpush.msra.mxu3 %v2856_v21 }
  0x23   :  { %328 = vmatpush.msrb.mxu0 %v2994_v47  ;;  %443 = vmatpush.msrb.mxu2 %v3010_v49 }
  0x24   :  { %573 = vmatpush.msra.mxu1 %v2866_v23  ;;  %685 = vmatpush.msra.mxu3 %v2866_v23 }
  0x25   :  { %2413 = vmatmul.msk.f32.gmra.mxu2 %vm72_vm0, %v24_v40  ;;  %329 = vmatpush.msrb.mxu0 %v3010_v49 }
  0x26   :  { %574 = vmatpush.msra.mxu1 %v2881_v27  ;;  %686 = vmatpush.msra.mxu3 %v2881_v27 }
  0x27   :  { %2397 = vmatmul.msk.f32.gmra.mxu0 %vm72_vm0, %v24_v40  ;;  %444 = vmatpush.msrb.mxu2 %v3016_v50 }
  0x28   :  { %575 = vmatpush.msra.mxu1 %v2894_v30  ;;  %687 = vmatpush.msra.mxu3 %v2894_v30 }
  0x29   :  { %2406 = vmatmul.msk.f32.gmra.mxu1 %vm72_vm0, %v25_v42  ;;  %2422 = vmatmul.msk.f32.gmra.mxu3 %vm72_vm0, %v25_v42 }
  0x2a   :  { %576 = vmatpush.msra.mxu1 %v2907_v33  ;;  %688 = vmatpush.msra.mxu3 %v2907_v33 }
  0x2b   :  { %330 = vmatpush.msrb.mxu0 %v3016_v50  ;;  %445 = vmatpush.msrb.mxu2 %v3026_v51 }
  0x2c   :  { %577 = vmatpush.msra.mxu1 %v2925_v37  ;;  %689 = vmatpush.msra.mxu3 %v2925_v37 }
  0x2d   :  { %2414 = vmatmul.msk.f32.gmra.mxu2 %vm72_vm0, %v25_v42  ;;  %331 = vmatpush.msrb.mxu0 %v3026_v51 }
  0x2e   :  { %578 = vmatpush.msra.mxu1 %v2948_v41  ;;  %690 = vmatpush.msra.mxu3 %v2948_v41 }
  0x2f   :  { %2398 = vmatmul.msk.f32.gmra.mxu0 %vm72_vm0, %v25_v42  ;;  %446 = vmatpush.msrb.mxu2 %v3033_v52 }
  0x30   :  { %579 = vmatpush.msra.mxu1 %v2962_v43  ;;  %332 = vmatpush.msrb.mxu0 %v3033_v52 }
  0x31   :  { %2407 = vmatmul.msk.f32.gmra.mxu1 %vm72_vm0, %v26_v44  ;;  %2423 = vmatmul.msk.f32.gmra.mxu3 %vm72_vm0, %v26_v44 }
  0x32   :  { %333 = vmatpush.msrb.mxu0 %v3042_v53  ;;  %691 = vmatpush.msra.mxu3 %v2962_v43 }
  0x33   :  { %447 = vmatpush.msrb.mxu2 %v3042_v53 }
  0x34   :  { %552 = vmatpush.msra.mxu0 %v2982_v45 }
  0x35   :  { %2415 = vmatmul.msk.f32.gmra.mxu2 %vm72_vm0, %v26_v44 }
  0x36   :  { %553 = vmatpush.msra.mxu0 %v2987_v46  ;;  %664 = vmatpush.msra.mxu2 %v2982_v45 }
  0x37   :  { %2399 = vmatmul.msk.f32.gmra.mxu0 %vm72_vm0, %v26_v44 }
  0x38   :  { %554 = vmatpush.msra.mxu0 %v2994_v47  ;;  %665 = vmatpush.msra.mxu2 %v2987_v46 }
  0x39   :  { %2408 = vmatmul.msk.f32.gmra.mxu1 %vm72_vm0, %v27_v48  ;;  %2424 = vmatmul.msk.f32.gmra.mxu3 %vm72_vm0, %v27_v48 }
  0x3a   :  { %555 = vmatpush.msra.mxu0 %v3010_v49  ;;  %666 = vmatpush.msra.mxu2 %v2994_v47 }
  0x3c   :  { %556 = vmatpush.msra.mxu0 %v3016_v50  ;;  %667 = vmatpush.msra.mxu2 %v3010_v49 }
  0x3d   :  { %2416 = vmatmul.msk.f32.gmra.mxu2 %vm72_vm0, %v27_v48 }
  0x3e   :  { %557 = vmatpush.msra.mxu0 %v3026_v51  ;;  %668 = vmatpush.msra.mxu2 %v3016_v50 }
  0x3f   :  { %2400 = vmatmul.msk.f32.gmra.mxu0 %vm72_vm0, %v27_v48 }
  0x40   :  { %558 = vmatpush.msra.mxu0 %v3033_v52  ;;  %669 = vmatpush.msra.mxu2 %v3026_v51 }
  0x41   :  { %2409 = vmatmul.msk.f32.gmra.mxu1 %vm72_vm0, %v28_v54  ;;  %2425 = vmatmul.msk.f32.gmra.mxu3 %vm72_vm0, %v28_v54 }
  0x42   :  { %559 = vmatpush.msra.mxu0 %v3042_v53  ;;  %670 = vmatpush.msra.mxu2 %v3033_v52 }
  0x44   :  { %671 = vmatpush.msra.mxu2 %v3042_v53 }
  0x45   :  { %2417 = vmatmul.msk.f32.gmra.mxu2 %vm72_vm0, %v28_v54 }
  0x47   :  { %2401 = vmatmul.msk.f32.gmra.mxu0 %vm72_vm0, %v28_v54 }
  0x49   :  { %2410 = vmatmul.msk.f32.gmra.mxu1 %vm72_vm0, %v29_v55  ;;  %2426 = vmatmul.msk.f32.gmra.mxu3 %vm72_vm0, %v29_v55 }
  0x4d   :  { %2418 = vmatmul.msk.f32.gmra.mxu2 %vm72_vm0, %v29_v55 }
  0x4f   :  { %2402 = vmatmul.msk.f32.gmra.mxu0 %vm72_vm0, %v29_v55 }
  0x51   :  { %354 = vmatmul.f32.vlgmr.msrb.gmra.mxu1 %v2763_v56 }
  0x52   :  { %796 = vmatpush.msrb.mxu1 %v2856_v21 }
  0x54   :  { %797 = vmatpush.msrb.mxu1 %v2866_v23 }
  0x56   :  { %798 = vmatpush.msrb.mxu1 %v2881_v27 }
  0x57   :  { %334 = vmatmul.f32.vlgmr.msrb.gmra.mxu0 %v2763_v56 }
  0x58   :  { %799 = vmatpush.msrb.mxu1 %v2894_v30  ;;  %776 = vmatpush.msrb.mxu0 %v2982_v45 }
  0x5a   :  { %800 = vmatpush.msrb.mxu1 %v2907_v33  ;;  %777 = vmatpush.msrb.mxu0 %v2987_v46 }
  0x5c   :  { %801 = vmatpush.msrb.mxu1 %v2925_v37  ;;  %778 = vmatpush.msrb.mxu0 %v2994_v47 }
  0x5e   :  { %802 = vmatpush.msrb.mxu1 %v2948_v41  ;;  %779 = vmatpush.msrb.mxu0 %v3010_v49 }
  0x60   :  { %803 = vmatpush.msrb.mxu1 %v2962_v43  ;;  %780 = vmatpush.msrb.mxu0 %v3016_v50 }
  0x62   :  { %781 = vmatpush.msrb.mxu0 %v3026_v51 }
  0x64   :  { %782 = vmatpush.msrb.mxu0 %v3033_v52 }
  0x66   :  { %783 = vmatpush.msrb.mxu0 %v3042_v53 }
  0x8e   :  { %v3104_v57 = vpop.f32.mrf.mxu1 }
  0x94   :  { %v237_v60 = vpop.f32.mrf.mxu3  ;;  %v3112_v2 = vpop.f32.mrf.mxu0 }
  0x95   :  { %v238_v62 = vadd.f32 %v237_v60, %v3109_v59 }
  0x96   :  { %v158_v63 = vpop.f32.mrf.mxu1 }
  0x97   :  { %v159_v0 = vadd.f32 %v158_v63, %v65_v61 }
  0x98   :  { %v196_v7 = vpop.f32.mrf.mxu2 }
  0x99   :  { %v3118_v8 = vadd.f32 %v196_v7, %v3115_v6 }
  0x9c   :  { %v240_v1 = vpop.f32.mrf.mxu3  ;;  %v117_v11 = vpop.f32.mrf.mxu0 }
  0x9d   :  { %v241_v3 = vadd.f32 %v240_v1, %v3109_v59  ;;  %v3124_v13 = vadd.f32 %v117_v11, %v3120_v9 }
  0x9e   :  { %v161_v4 = vpop.f32.mrf.mxu1 }
  0x9f   :  { %v162_v5 = vadd.f32 %v161_v4, %v65_v61 }
  0xa0   :  { %v199_v16 = vpop.f32.mrf.mxu2 }
  0xa1   :  { %v3127_v17 = vadd.f32 %v199_v16, %v3115_v6 }
  0xa4   :  { %v243_v10 = vpop.f32.mrf.mxu3  ;;  %v120_v19 = vpop.f32.mrf.mxu0 }
  0xa5   :  { %v244_v12 = vadd.f32 %v243_v10, %v3109_v59  ;;  %v3131_v22 = vadd.f32 %v120_v19, %v3120_v9 }
  0xa6   :  { %v164_v14 = vpop.f32.mrf.mxu1 }
  0xa7   :  { %v165_v15 = vadd.f32 %v164_v14, %v65_v61 }
  0xa8   :  { %v202_v26 = vpop.f32.mrf.mxu2 }
  0xa9   :  { %v3136_v29 = vadd.f32 %v202_v26, %v3115_v6  ;;  %v156_v26 = vadd.f32 %v3104_v57, %v65_v61 }
  0xac   :  { %v246_v18 = vpop.f32.mrf.mxu3  ;;  %v123_v32 = vpop.f32.mrf.mxu0 }
  0xad   :  { %v247_v20 = vadd.f32 %v246_v18, %v3109_v59  ;;  %v3145_v55 = vadd.f32 %v123_v32, %v3120_v9 }
  0xae   :  { %v167_v24 = vpop.f32.mrf.mxu1 }
  0xaf   :  { %v168_v25 = vadd.f32 %v167_v24, %v65_v61 }
  0xb0   :  { %v205_v39 = vpop.f32.mrf.mxu2 }
  0xb1   :  { %v3133_v28 = vadd.f32 %v247_v20, %v168_v25  ;;  %v3148_v58 = vadd.f32 %v205_v39, %v3115_v6 }
  0xb4   :  { %v249_v31 = vpop.f32.mrf.mxu3  ;;  %v126_v44 = vpop.f32.mrf.mxu0 }
  0xb5   :  { %v250_v34 = vadd.f32 %v249_v31, %v3109_v59  ;;  %v127_v60 = vadd.f32 %v126_v44, %v3120_v9 }
  0xb6   :  { %v170_v35 = vpop.f32.mrf.mxu1 }
  0xb7   :  { %v171_v36 = vadd.f32 %v170_v35, %v65_v61  ;;  %v3139_v38 = vadd.f32 %v250_v34, %v165_v15 }
  0xb8   :  { %v208_v4 = vpop.f32.mrf.mxu2 }
  0xb9   :  { %v3141_v40 = vadd.f32 %v244_v12, %v171_v36  ;;  %v209_v10 = vadd.f32 %v208_v4, %v3115_v6 }
  0xbc   :  { %v252_v42 = vpop.f32.mrf.mxu3  ;;  %v129_v12 = vpop.f32.mrf.mxu0 }
  0xbd   :  { %v253_v48 = vadd.f32 %v252_v42, %v3109_v59  ;;  %v130_v15 = vadd.f32 %v129_v12, %v3120_v9 }
  0xbe   :  { %v173_v54 = vpop.f32.mrf.mxu1 }
  0xbf   :  { %v174_v63 = vadd.f32 %v173_v54, %v65_v61  ;;  %v3151_v1 = vadd.f32 %v253_v48, %v162_v5 }
  0xc0   :  { %v211_v20 = vpop.f32.mrf.mxu2 }
  0xc1   :  { %v3153_v7 = vadd.f32 %v241_v3, %v174_v63  ;;  %v212_v5 = vadd.f32 %v211_v20, %v3115_v6  ;;  %v17_v63 = vlaneseq }
  0xc4   :  { %v255_v11 = vpop.f32.mrf.mxu3  ;;  %v132_v3 = vpop.f32.mrf.mxu0 }
  0xc5   :  { %v256_v14 = vadd.f32 %v255_v11, %v3109_v59  ;;  %v133_v32 = vadd.f32 %v132_v3, %v3120_v9 }
  0xc6   :  { %v176_v16 = vpop.f32.mrf.mxu1 }
  0xc7   :  { %v177_v18 = vadd.f32 %v176_v16, %v65_v61  ;;  %v3158_v19 = vadd.f32 %v256_v14, %v159_v0  ;;  %v3168_v61 = vand.u32 127, %v17_v63 }
  0xc8   :  { %v214_v39 = vpop.f32.mrf.mxu2 }
  0xc9   :  { %v3160_v24 = vadd.f32 %v238_v62, %v177_v18  ;;  %v215_v0 = vadd.f32 %v214_v39, %v3115_v6  ;;  %v3171_v11 = vadd.s32 128, %v3168_v61  ;;  %v3187_v39 = vadd.f32 %v3127_v17, %v133_v32 }
  0xcb   :  { %vm21_vm3 = vcmp.lt.s32.totalorder %v3171_v11, 192 }
  0xcc   :  { %v258_v25 = vpop.f32.mrf.mxu3  ;;  %v135_v44 = vpop.f32.mrf.mxu0 }
  0xcd   :  { %v259_v31 = vadd.f32 %v258_v25, %v3109_v59  ;;  %v136_v62 = vadd.f32 %v135_v44, %v3120_v9  ;;  %v3193_v44 = vadd.f32 %v209_v10, %v3145_v55 }
  0xce   :  { %v355_v34 = vpop.f32.mrf.mxu1 }
  0xcf   :  { %v314_v35 = vadd.f32 %v259_v31, %v156_v26 }
  0xd1   :  { %v359_v36 = vadd.f32 %v355_v34, %v314_v35  ;;  %v3177_v34 = vadd.f32 %v215_v0, %v3124_v13  ;;  %v3181_v35 = vadd.f32 %v3118_v8, %v136_v62  ;;  %v3196_v13 = vadd.f32 %v3148_v58, %v127_v60  ;;  %v217_v0 = vpop.f32.mrf.mxu2 }
  0xd2   :  { %v115_v8 = vadd.f32 %v3112_v2, %v3120_v9  ;;  %v218_v62 = vadd.f32 %v217_v0, %v3115_v6 }
  0xd3   :  { %v2428_v42 = vmul.f32 -1.442695, %v359_v36 }
  0xd5   :  { %2571 = vpow2.f32 %v2428_v42  ;;  %v3190_v42 = vadd.f32 %v3136_v29, %v130_v15 }
  0xdb   :  { %v2572_v48 = vpop.eup %2571 }
  0xdc   :  { %v367_v54 = vadd.f32 1.0, %v2572_v48 }
  0xde   :  { %2573 = vrcp.f32 %v367_v54  ;;  %v394_v12 = vand.u32 2147483648, %v367_v54  ;;  %v392_v16 = vand.u32 2147483647, %v367_v54  ;;  %vm388_vm2 = vweird.f32 %v367_v54 }
  0xdf   :  { %2575 = vtanh.f32 %v359_v36  ;;  %v3184_v36 = vadd.f32 %v212_v5, %v3131_v22  ;;  %v313_v22 = vadd.f32 %v218_v62, %v115_v8  ;;  %v335_v5 = vpop.f32.mrf.mxu0 }
  0xe0   :  { %v395_v20 = vor.u32 1.1754944e-38, %v394_v12  ;;  %vm393_vm5 = vcmp.eq.f32.partialorder %v392_v16, 8.507059e+37 }
  0xe1   :  { %v358_v48 = vadd.f32 %v335_v5, %v313_v22 }
  0xe3   :  { %v2427_v17 = vmul.f32 -1.442695, %v358_v48 }
  0xe4   :  { %v2574_v57 = vpop.eup %2573 }
  0xe5   :  { %v384_v59 = vmul.f32 %v2574_v57, %v367_v54  ;;  %vm389_vm1 = vweird.f32 %v2574_v57  ;;  %v2576_v3 = vpop.eup %2575  ;;  %2577 = vpow2.f32 %v2427_v17 }
  0xe6   :  { %vm390_vm4 = vmor %vm388_vm2, %vm389_vm1 }
  0xe7   :  { %v385_v4 = vsub.f32 1.0, %v384_v59 }
  0xe9   :  { %v386_v14 = vmul.f32 %v2574_v57, %v385_v4 }
  0xeb   :  { %v387_v18 = vadd.f32 %v2574_v57, %v386_v14  ;;  %v2578_v32 = vpop.eup %2577 }
  0xec   :  { %v366_v29 = vadd.f32 1.0, %v2578_v32 }
  0xed   :  { %v391_v25 = vsel %vm390_vm4, %v2574_v57, %v387_v18 }
  0xee   :  { %v396_v26 = vsel %vm393_vm5, %v395_v20, %v391_v25  ;;  %2579 = vrcp.f32 %v366_v29  ;;  %vm373_vm6 = vweird.f32 %v366_v29  ;;  %v379_v58 = vand.u32 2147483648, %v366_v29 }
  0xef   :  { %v401_v31 = vsel %vm21_vm3, %v396_v26, %v2576_v3  ;;  %v377_v63 = vand.u32 2147483647, %v366_v29 }
  0xf0   :  { %404 = vrot.lane.b32.xlu0 %v401_v31, %s2764_s24  ;;  %v380_v2 = vor.u32 1.1754944e-38, %v379_v58 }
  0xf1   :  { %vm378_vm9 = vcmp.eq.f32.partialorder %v377_v63, 8.507059e+37 }
  0xf4   :  { %v2580_v15 = vpop.eup %2579 }
  0xf5   :  { %v369_v55 = vmul.f32 %v2580_v15, %v366_v29  ;;  %vm374_vm7 = vweird.f32 %v2580_v15 }
  0xf6   :  { %vm375_vm8 = vmor %vm373_vm6, %vm374_vm7 }
  0xf7   :  { %v370_v10 = vsub.f32 1.0, %v369_v55 }
  0xf9   :  { %v371_v54 = vmul.f32 %v2580_v15, %v370_v10 }
  0xfb   :  { %v372_v60 = vadd.f32 %v2580_v15, %v371_v54 }
  0xfd   :  { %v376_v6 = vsel %vm375_vm8, %v2580_v15, %v372_v60 }
  0xfe   :  { %v381_v57 = vsel %vm378_vm9, %v380_v2, %v376_v6 }
  0xff   :  { %v402_v4 = vmul.f32 0.0, %v381_v57 }
 0x162   :  { %v405_v9 = vpop.permute.xlu0 %404 }
 0x163   :  { %v407_v59 = vmul.f32 %v405_v9, %v381_v57 }
 0x165   :  { %409 = vrot.lane.b32.xlu0 %v407_v59, %s2764_s24 }
 0x1d7   :  { %v410_v12 = vpop.permute.xlu0 %409 }
 0x1d8   :  { %v3202_v14 = vadd.f32 %v410_v12, %v402_v4 }
 0x1da   :  { %2581 = vtanh.f32 %v3202_v14 }
 0x1e0   :  { %v2582_v16 = vpop.eup %2581 }
 0x1e1   :  { %415 = vrot.lane.b32.xlu1 %v2582_v16, %s2764_s24 }
 0x253   :  { %v416_v18 = vpop.permute.xlu1 %415 }
 0x254   :  { %v418_v20 = vmul.f32 %v416_v18, %v401_v31 }
 0x256   :  { %2429 = vmatmul.msk.f32.vlgmr.msrb.gmra.mxu2 %vm72_vm0, %v418_v20  ;;  %2430 = vmatmul.msk.f32.vlgmr.msrb.gmra.mxu3 %vm72_vm0, %v418_v20  ;;  %420 = vst.msk [vmem:[#allocation3] sm:$0xff] %vm419_vm10, %v418_v20 }
 0x257   :  { %422 = vst.msk [vmem:[#allocation3 + $0x38] sm:$0xff] %vm421_vm11, %v418_v20  ;;  %888 = vmatpush.msrb.mxu2 %v2982_v45  ;;  %908 = vmatpush.msrb.mxu3 %v2856_v21 }
 0x259   :  { %889 = vmatpush.msrb.mxu2 %v2987_v46  ;;  %909 = vmatpush.msrb.mxu3 %v2866_v23 }
 0x25b   :  { %890 = vmatpush.msrb.mxu2 %v2994_v47  ;;  %910 = vmatpush.msrb.mxu3 %v2881_v27 }
 0x25d   :  { %891 = vmatpush.msrb.mxu2 %v3010_v49  ;;  %911 = vmatpush.msrb.mxu3 %v2894_v30 }
 0x25f   :  { %892 = vmatpush.msrb.mxu2 %v3016_v50  ;;  %912 = vmatpush.msrb.mxu3 %v2907_v33 }
 0x261   :  { %893 = vmatpush.msrb.mxu2 %v3026_v51  ;;  %913 = vmatpush.msrb.mxu3 %v2925_v37 }
 0x263   :  { %894 = vmatpush.msrb.mxu2 %v3033_v52  ;;  %914 = vmatpush.msrb.mxu3 %v2948_v41 }
 0x265   :  { %895 = vmatpush.msrb.mxu2 %v3042_v53  ;;  %915 = vmatpush.msrb.mxu3 %v2962_v43 }
 0x2d9   :  { %v469_v25 = vpop.f32.mrf.mxu3  ;;  %v449_v54 = vpop.f32.mrf.mxu2 }
 0x2da   :  { %v473_v3 = vadd.f32 %v469_v25, %v3158_v19  ;;  %v472_v58 = vadd.f32 %v449_v54, %v3177_v34 }
 0x2dc   :  { %v2432_v26 = vmul.f32 -1.442695, %v473_v3  ;;  %v2431_v60 = vmul.f32 -1.442695, %v472_v58 }
 0x2de   :  { %2583 = vpow2.f32 %v2432_v26 }
 0x2e4   :  { %v2584_v31 = vpop.eup %2583 }
 0x2e5   :  { %v481_v0 = vadd.f32 1.0, %v2584_v31 }
 0x2e7   :  { %2585 = vrcp.f32 %v481_v0  ;;  %v508_v5 = vand.u32 2147483648, %v481_v0  ;;  %v506_v17 = vand.u32 2147483647, %v481_v0  ;;  %vm502_vm13 = vweird.f32 %v481_v0 }
 0x2e8   :  { %2587 = vtanh.f32 %v473_v3 }
 0x2e9   :  { %v509_v29 = vor.u32 1.1754944e-38, %v508_v5  ;;  %vm507_vm15 = vcmp.eq.f32.partialorder %v506_v17, 8.507059e+37  ;;  %2589 = vpow2.f32 %v2431_v60 }
 0x2ed   :  { %v2586_v8 = vpop.eup %2585 }
 0x2ee   :  { %v498_v62 = vmul.f32 %v2586_v8, %v481_v0  ;;  %vm503_vm12 = vweird.f32 %v2586_v8  ;;  %v2588_v19 = vpop.eup %2587 }
 0x2ef   :  { %vm504_vm14 = vmor %vm502_vm13, %vm503_vm12  ;;  %v2590_v63 = vpop.eup %2589 }
 0x2f0   :  { %v499_v22 = vsub.f32 1.0, %v498_v62  ;;  %v480_v2 = vadd.f32 1.0, %v2590_v63 }
 0x2f2   :  { %v500_v48 = vmul.f32 %v2586_v8, %v499_v22  ;;  %2591 = vrcp.f32 %v480_v2  ;;  %v493_v12 = vand.u32 2147483648, %v480_v2  ;;  %vm487_vm2 = vweird.f32 %v480_v2 }
 0x2f3   :  { %v491_v16 = vand.u32 2147483647, %v480_v2 }
 0x2f4   :  { %v501_v32 = vadd.f32 %v2586_v8, %v500_v48  ;;  %v494_v20 = vor.u32 1.1754944e-38, %v493_v12 }
 0x2f5   :  { %vm492_vm5 = vcmp.eq.f32.partialorder %v491_v16, 8.507059e+37 }
 0x2f6   :  { %v505_v15 = vsel %vm504_vm14, %v2586_v8, %v501_v32 }
 0x2f7   :  { %v510_v55 = vsel %vm507_vm15, %v509_v29, %v505_v15 }
 0x2f8   :  { %v515_v10 = vsel %vm21_vm3, %v510_v55, %v2588_v19  ;;  %v2592_v6 = vpop.eup %2591 }
 0x2f9   :  { %518 = vrot.lane.b32.xlu1 %v515_v10, %s2764_s24  ;;  %v483_v9 = vmul.f32 %v2592_v6, %v480_v2  ;;  %vm488_vm1 = vweird.f32 %v2592_v6 }
 0x2fa   :  { %vm489_vm4 = vmor %vm487_vm2, %vm488_vm1 }
 0x2fb   :  { %v484_v57 = vsub.f32 1.0, %v483_v9 }
 0x2fd   :  { %v485_v59 = vmul.f32 %v2592_v6, %v484_v57 }
 0x2ff   :  { %v486_v4 = vadd.f32 %v2592_v6, %v485_v59 }
 0x301   :  { %v490_v18 = vsel %vm489_vm4, %v2592_v6, %v486_v4 }
 0x302   :  { %v495_v34 = vsel %vm492_vm5, %v494_v20, %v490_v18 }
 0x303   :  { %v516_v26 = vmul.f32 %v495_v34, %v3202_v14 }
 0x36b   :  { %v519_v25 = vpop.permute.xlu1 %518 }
 0x36c   :  { %v521_v3 = vmul.f32 %v519_v25, %v495_v34 }
 0x36e   :  { %523 = vrot.lane.b32.xlu2 %v521_v3, %s2764_s24 }
 0x3c8   :  { %v524_v31 = vpop.permute.xlu2 %523 }
 0x3c9   :  { %v3233_v0 = vadd.f32 %v524_v31, %v516_v26 }
 0x3cb   :  { %2593 = vtanh.f32 %v3233_v0 }
 0x3d1   :  { %v2594_v8 = vpop.eup %2593 }
 0x3d2   :  { %529 = vrot.lane.b32.xlu2 %v2594_v8, %s2764_s24 }
 0x42c   :  { %v530_v62 = vpop.permute.xlu2 %529 }
 0x42d   :  { %v532_v22 = vmul.f32 %v530_v62, %v515_v10 }
 0x42f   :  { %533 = vst.msk [vmem:[#allocation3 + $0x8] sm:$0xff] %vm419_vm10, %v532_v22  ;;  %2433 = vmatmul.msk.f32.vlgmr.msra.gmra.mxu0 %vm72_vm0, %v532_v22  ;;  %2434 = vmatmul.msk.f32.vlgmr.msra.gmra.mxu1 %vm72_vm0, %v532_v22 }
 0x430   :  { %534 = vst.msk [vmem:[#allocation3 + $0x30] sm:$0xff] %vm421_vm11, %v532_v22  ;;  %1000 = vmatpush.msra.mxu0 %v2982_v45  ;;  %1020 = vmatpush.msra.mxu1 %v2856_v21 }
 0x432   :  { %1001 = vmatpush.msra.mxu0 %v2987_v46  ;;  %1021 = vmatpush.msra.mxu1 %v2866_v23 }
 0x434   :  { %1002 = vmatpush.msra.mxu0 %v2994_v47  ;;  %1022 = vmatpush.msra.mxu1 %v2881_v27 }
 0x436   :  { %1003 = vmatpush.msra.mxu0 %v3010_v49  ;;  %1023 = vmatpush.msra.mxu1 %v2894_v30 }
 0x438   :  { %1004 = vmatpush.msra.mxu0 %v3016_v50  ;;  %1024 = vmatpush.msra.mxu1 %v2907_v33 }
 0x43a   :  { %1005 = vmatpush.msra.mxu0 %v3026_v51  ;;  %1025 = vmatpush.msra.mxu1 %v2925_v37 }
 0x43c   :  { %1006 = vmatpush.msra.mxu0 %v3033_v52  ;;  %1026 = vmatpush.msra.mxu1 %v2948_v41 }
 0x43e   :  { %1007 = vmatpush.msra.mxu0 %v3042_v53  ;;  %1027 = vmatpush.msra.mxu1 %v2962_v43 }
 0x4ac   :  { %v581_v14 = vpop.f32.mrf.mxu1  ;;  %v561_v9 = vpop.f32.mrf.mxu0 }
 0x4ad   :  { %v585_v5 = vadd.f32 %v581_v14, %v3151_v1  ;;  %v584_v57 = vadd.f32 %v561_v9, %v3184_v36 }
 0x4af   :  { %v2436_v48 = vmul.f32 -1.442695, %v585_v5  ;;  %v2435_v59 = vmul.f32 -1.442695, %v584_v57 }
 0x4b1   :  { %2595 = vpow2.f32 %v2436_v48 }
 0x4b7   :  { %v2596_v17 = vpop.eup %2595 }
 0x4b8   :  { %v593_v32 = vadd.f32 1.0, %v2596_v17 }
 0x4ba   :  { %2597 = vrcp.f32 %v593_v32  ;;  %v620_v55 = vand.u32 2147483648, %v593_v32  ;;  %v618_v54 = vand.u32 2147483647, %v593_v32  ;;  %vm614_vm7 = vweird.f32 %v593_v32 }
 0x4bb   :  { %2599 = vtanh.f32 %v585_v5 }
 0x4bc   :  { %v621_v60 = vor.u32 1.1754944e-38, %v620_v55  ;;  %vm619_vm9 = vcmp.eq.f32.partialorder %v618_v54, 8.507059e+37  ;;  %2601 = vpow2.f32 %v2435_v59 }
 0x4c0   :  { %v2598_v29 = vpop.eup %2597 }
 0x4c1   :  { %v610_v15 = vmul.f32 %v2598_v29, %v593_v32  ;;  %vm615_vm6 = vweird.f32 %v2598_v29  ;;  %v2600_v1 = vpop.eup %2599 }
 0x4c2   :  { %vm616_vm8 = vmor %vm614_vm7, %vm615_vm6  ;;  %v2602_v4 = vpop.eup %2601 }
 0x4c3   :  { %v611_v19 = vsub.f32 1.0, %v610_v15  ;;  %v592_v12 = vadd.f32 1.0, %v2602_v4 }
 0x4c5   :  { %v612_v10 = vmul.f32 %v2598_v29, %v611_v19  ;;  %2603 = vrcp.f32 %v592_v12  ;;  %v605_v3 = vand.u32 2147483648, %v592_v12  ;;  %vm599_vm13 = vweird.f32 %v592_v12 }
 0x4c6   :  { %v603_v26 = vand.u32 2147483647, %v592_v12 }
 0x4c7   :  { %v613_v58 = vadd.f32 %v2598_v29, %v612_v10  ;;  %v606_v8 = vor.u32 1.1754944e-38, %v605_v3 }
 0x4c8   :  { %vm604_vm15 = vcmp.eq.f32.partialorder %v603_v26, 8.507059e+37 }
 0x4c9   :  { %v617_v63 = vsel %vm616_vm8, %v2598_v29, %v613_v58 }
 0x4ca   :  { %v622_v2 = vsel %vm619_vm9, %v621_v60, %v617_v63 }
 0x4cb   :  { %v627_v6 = vsel %vm21_vm3, %v622_v2, %v2600_v1  ;;  %v2604_v16 = vpop.eup %2603 }
 0x4cc   :  { %630 = vrot.lane.b32.xlu0 %v627_v6, %s2764_s24  ;;  %v595_v18 = vmul.f32 %v2604_v16, %v592_v12  ;;  %vm600_vm12 = vweird.f32 %v2604_v16 }
 0x4cd   :  { %vm601_vm14 = vmor %vm599_vm13, %vm600_vm12 }
 0x4ce   :  { %v596_v20 = vsub.f32 1.0, %v595_v18 }
 0x4d0   :  { %v597_v25 = vmul.f32 %v2604_v16, %v596_v20 }
 0x4d2   :  { %v598_v34 = vadd.f32 %v2604_v16, %v597_v25 }
 0x4d4   :  { %v602_v31 = vsel %vm601_vm14, %v2604_v16, %v598_v34 }
 0x4d5   :  { %v607_v36 = vsel %vm604_vm15, %v606_v8, %v602_v31 }
 0x4d6   :  { %v628_v14 = vmul.f32 %v607_v36, %v3233_v0 }
 0x53e   :  { %v631_v62 = vpop.permute.xlu0 %630 }
 0x53f   :  { %v633_v22 = vmul.f32 %v631_v62, %v607_v36 }
 0x541   :  { %635 = vrot.lane.b32.xlu1 %v633_v22, %s2764_s24 }
 0x5b3   :  { %v636_v5 = vpop.permute.xlu1 %635 }
 0x5b4   :  { %v3264_v48 = vadd.f32 %v636_v5, %v628_v14 }
 0x5b6   :  { %2605 = vtanh.f32 %v3264_v48 }
 0x5bc   :  { %v2606_v17 = vpop.eup %2605 }
 0x5bd   :  { %641 = vrot.lane.b32.xlu2 %v2606_v17, %s2764_s24 }
 0x617   :  { %v642_v32 = vpop.permute.xlu2 %641 }
 0x618   :  { %v644_v29 = vmul.f32 %v642_v32, %v627_v6 }
 0x61a   :  { %645 = vst.msk [vmem:[#allocation3 + $0x10] sm:$0xff] %vm419_vm10, %v644_v29  ;;  %2437 = vmatmul.msk.f32.vlgmr.msra.gmra.mxu2 %vm72_vm0, %v644_v29  ;;  %2438 = vmatmul.msk.f32.vlgmr.msra.gmra.mxu3 %vm72_vm0, %v644_v29 }
 0x61b   :  { %646 = vst.msk [vmem:[#allocation3 + $0x28] sm:$0xff] %vm421_vm11, %v644_v29  ;;  %1112 = vmatpush.msra.mxu2 %v2982_v45  ;;  %1132 = vmatpush.msra.mxu3 %v2856_v21 }
 0x61d   :  { %1113 = vmatpush.msra.mxu2 %v2987_v46  ;;  %1133 = vmatpush.msra.mxu3 %v2866_v23 }
 0x61f   :  { %1114 = vmatpush.msra.mxu2 %v2994_v47  ;;  %1134 = vmatpush.msra.mxu3 %v2881_v27 }
 0x621   :  { %1115 = vmatpush.msra.mxu2 %v3010_v49  ;;  %1135 = vmatpush.msra.mxu3 %v2894_v30 }
 0x623   :  { %1116 = vmatpush.msra.mxu2 %v3016_v50  ;;  %1136 = vmatpush.msra.mxu3 %v2907_v33 }
 0x625   :  { %1117 = vmatpush.msra.mxu2 %v3026_v51  ;;  %1137 = vmatpush.msra.mxu3 %v2925_v37 }
 0x627   :  { %1118 = vmatpush.msra.mxu2 %v3033_v52  ;;  %1138 = vmatpush.msra.mxu3 %v2948_v41 }
 0x629   :  { %1119 = vmatpush.msra.mxu2 %v3042_v53  ;;  %1139 = vmatpush.msra.mxu3 %v2962_v43 }
 0x69d   :  { %v693_v21 = vpop.f32.mrf.mxu3  ;;  %v673_v0 = vpop.f32.mrf.mxu2 }
 0x69e   :  { %v697_v23 = vadd.f32 %v693_v21, %v3139_v38  ;;  %v696_v15 = vadd.f32 %v673_v0, %v3193_v44 }
 0x6a0   :  { %v2440_v27 = vmul.f32 -1.442695, %v697_v23  ;;  %v2439_v19 = vmul.f32 -1.442695, %v696_v15 }
 0x6a2   :  { %2607 = vpow2.f32 %v2440_v27 }
 0x6a8   :  { %v2608_v30 = vpop.eup %2607 }
 0x6a9   :  { %v705_v45 = vadd.f32 1.0, %v2608_v30 }
 0x6ab   :  { %2609 = vrcp.f32 %v705_v45  ;;  %v732_v37 = vand.u32 2147483648, %v705_v45  ;;  %v730_v41 = vand.u32 2147483647, %v705_v45  ;;  %vm726_vm2 = vweird.f32 %v705_v45 }
 0x6ac   :  { %2611 = vtanh.f32 %v697_v23 }
 0x6ad   :  { %v733_v43 = vor.u32 1.1754944e-38, %v732_v37  ;;  %vm731_vm5 = vcmp.eq.f32.partialorder %v730_v41, 8.507059e+37  ;;  %2613 = vpow2.f32 %v2439_v19 }
 0x6b1   :  { %v2610_v33 = vpop.eup %2609 }
 0x6b2   :  { %v722_v46 = vmul.f32 %v2610_v33, %v705_v45  ;;  %vm727_vm1 = vweird.f32 %v2610_v33  ;;  %v2612_v52 = vpop.eup %2611 }
 0x6b3   :  { %vm728_vm4 = vmor %vm726_vm2, %vm727_vm1  ;;  %v2614_v55 = vpop.eup %2613 }
 0x6b4   :  { %v723_v47 = vsub.f32 1.0, %v722_v46  ;;  %v704_v10 = vadd.f32 1.0, %v2614_v55 }
 0x6b6   :  { %v724_v49 = vmul.f32 %v2610_v33, %v723_v47  ;;  %2615 = vrcp.f32 %v704_v10  ;;  %v717_v2 = vand.u32 2147483648, %v704_v10  ;;  %vm711_vm7 = vweird.f32 %v704_v10 }
 0x6b7   :  { %v715_v6 = vand.u32 2147483647, %v704_v10 }
 0x6b8   :  { %v725_v50 = vadd.f32 %v2610_v33, %v724_v49  ;;  %v718_v57 = vor.u32 1.1754944e-38, %v717_v2 }
 0x6b9   :  { %vm716_vm9 = vcmp.eq.f32.partialorder %v715_v6, 8.507059e+37 }
 0x6ba   :  { %v729_v51 = vsel %vm728_vm4, %v2610_v33, %v725_v50 }
 0x6bb   :  { %v734_v53 = vsel %vm731_vm5, %v733_v43, %v729_v51 }
 0x6bc   :  { %v739_v38 = vsel %vm21_vm3, %v734_v53, %v2612_v52  ;;  %v2616_v54 = vpop.eup %2615 }
 0x6bd   :  { %742 = vrot.lane.b32.xlu0 %v739_v38, %s2764_s24  ;;  %v707_v58 = vmul.f32 %v2616_v54, %v704_v10  ;;  %vm712_vm6 = vweird.f32 %v2616_v54 }
 0x6be   :  { %vm713_vm8 = vmor %vm711_vm7, %vm712_vm6 }
 0x6bf   :  { %v708_v60 = vsub.f32 1.0, %v707_v58 }
 0x6c1   :  { %v709_v63 = vmul.f32 %v2616_v54, %v708_v60 }
 0x6c3   :  { %v710_v1 = vadd.f32 %v2616_v54, %v709_v63 }
 0x6c5   :  { %v714_v9 = vsel %vm713_vm8, %v2616_v54, %v710_v1 }
 0x6c6   :  { %v719_v44 = vsel %vm716_vm9, %v718_v57, %v714_v9 }
 0x6c7   :  { %v740_v12 = vmul.f32 %v719_v44, %v3264_v48 }
 0x72f   :  { %v743_v59 = vpop.permute.xlu0 %742 }
 0x730   :  { %v745_v4 = vmul.f32 %v743_v59, %v719_v44 }
 0x732   :  { %747 = vrot.lane.b32.xlu1 %v745_v4, %s2764_s24 }
 0x7a4   :  { %v748_v16 = vpop.permute.xlu1 %747 }
 0x7a5   :  { %v750_v18 = vadd.f32 %v748_v16, %v740_v12 }
 0x7a7   :  { %2617 = vtanh.f32 %v750_v18 }
 0x7ad   :  { %v2618_v20 = vpop.eup %2617 }
 0x7ae   :  { %753 = vrot.lane.b32.xlu2 %v2618_v20, %s2764_s24 }
 0x808   :  { %v754_v25 = vpop.permute.xlu2 %753 }
 0x809   :  { %v756_v34 = vmul.f32 %v754_v25, %v739_v38 }
 0x80b   :  { %757 = vst.msk [vmem:[#allocation3 + $0x18] sm:$0xff] %vm419_vm10, %v756_v34  ;;  %2441 = vmatmul.msk.f32.vlgmr.msrb.gmra.mxu0 %vm72_vm0, %v756_v34  ;;  %2442 = vmatmul.msk.f32.vlgmr.msrb.gmra.mxu1 %vm72_vm0, %v756_v34 }
 0x80c   :  { %758 = vst.msk [vmem:[#allocation3 + $0x20] sm:$0xff] %vm421_vm11, %v756_v34 }
 0x888   :  { %v805_v3 = vpop.f32.mrf.mxu1  ;;  %v785_v30 = vpop.f32.mrf.mxu0 }
 0x889   :  { %v809_v26 = vadd.f32 %v805_v3, %v3133_v28  ;;  %v808_v45 = vadd.f32 %v785_v30, %v3196_v13 }
 0x88b   :  { %v2444_v31 = vmul.f32 -1.442695, %v809_v26  ;;  %v2443_v33 = vmul.f32 -1.442695, %v808_v45 }
 0x88d   :  { %2619 = vpow2.f32 %v2444_v31 }
 0x893   :  { %v2620_v8 = vpop.eup %2619 }
 0x894   :  { %v817_v62 = vadd.f32 1.0, %v2620_v8 }
 0x896   :  { %2621 = vrcp.f32 %v817_v62  ;;  %v844_v5 = vand.u32 2147483648, %v817_v62  ;;  %v842_v17 = vand.u32 2147483647, %v817_v62  ;;  %vm838_vm13 = vweird.f32 %v817_v62 }
 0x897   :  { %2623 = vtanh.f32 %v809_v26 }
 0x898   :  { %v845_v29 = vor.u32 1.1754944e-38, %v844_v5  ;;  %vm843_vm15 = vcmp.eq.f32.partialorder %v842_v17, 8.507059e+37  ;;  %2625 = vpow2.f32 %v2443_v33 }
 0x89c   :  { %v2622_v36 = vpop.eup %2621 }
 0x89d   :  { %v834_v22 = vmul.f32 %v2622_v36, %v817_v62  ;;  %vm839_vm12 = vweird.f32 %v2622_v36  ;;  %v2624_v28 = vpop.eup %2623 }
 0x89e   :  { %vm840_vm14 = vmor %vm838_vm13, %vm839_vm12  ;;  %v2626_v46 = vpop.eup %2625 }
 0x89f   :  { %v835_v14 = vsub.f32 1.0, %v834_v22  ;;  %v816_v47 = vadd.f32 1.0, %v2626_v46 }
 0x8a1   :  { %v836_v48 = vmul.f32 %v2622_v36, %v835_v14  ;;  %2627 = vrcp.f32 %v816_v47  ;;  %v829_v51 = vand.u32 2147483648, %v816_v47  ;;  %vm823_vm2 = vweird.f32 %v816_v47 }
 0x8a2   :  { %v827_v52 = vand.u32 2147483647, %v816_v47 }
 0x8a3   :  { %v837_v32 = vadd.f32 %v2622_v36, %v836_v48  ;;  %v830_v38 = vor.u32 1.1754944e-38, %v829_v51 }
 0x8a4   :  { %vm828_vm5 = vcmp.eq.f32.partialorder %v827_v52, 8.507059e+37 }
 0x8a5   :  { %v841_v21 = vsel %vm840_vm14, %v2622_v36, %v837_v32 }
 0x8a6   :  { %v846_v23 = vsel %vm843_vm15, %v845_v29, %v841_v21 }
 0x8a7   :  { %v851_v27 = vsel %vm21_vm3, %v846_v23, %v2624_v28  ;;  %v2628_v37 = vpop.eup %2627 }
 0x8a8   :  { %854 = vrot.lane.b32.xlu0 %v851_v27, %s2764_s24  ;;  %v819_v49 = vmul.f32 %v2628_v37, %v816_v47  ;;  %vm824_vm1 = vweird.f32 %v2628_v37 }
 0x8a9   :  { %vm825_vm4 = vmor %vm823_vm2, %vm824_vm1 }
 0x8aa   :  { %v820_v41 = vsub.f32 1.0, %v819_v49 }
 0x8ac   :  { %v821_v50 = vmul.f32 %v2628_v37, %v820_v41 }
 0x8ae   :  { %v822_v43 = vadd.f32 %v2628_v37, %v821_v50 }
 0x8b0   :  { %v826_v53 = vsel %vm825_vm4, %v2628_v37, %v822_v43 }
 0x8b1   :  { %v831_v13 = vsel %vm828_vm5, %v830_v38, %v826_v53 }
 0x8b2   :  { %v852_v19 = vmul.f32 %v831_v13, %v750_v18 }
 0x91a   :  { %v855_v0 = vpop.permute.xlu0 %854 }
 0x91b   :  { %v857_v15 = vmul.f32 %v855_v0, %v831_v13 }
 0x91d   :  { %859 = vrot.lane.b32.xlu1 %v857_v15, %s2764_s24 }
 0x98f   :  { %v860_v55 = vpop.permute.xlu1 %859 }
 0x990   :  { %v862_v10 = vadd.f32 %v860_v55, %v852_v19 }
 0x992   :  { %2629 = vtanh.f32 %v862_v10 }
 0x998   :  { %v2630_v54 = vpop.eup %2629 }
 0x999   :  { %865 = vrot.lane.b32.xlu2 %v2630_v54, %s2764_s24 }
 0x9f3   :  { %v866_v58 = vpop.permute.xlu2 %865 }
 0x9f4   :  { %v868_v60 = vmul.f32 %v866_v58, %v851_v27 }
 0x9f6   :  { %869 = vst.msk [vmem:[#allocation3 + $0x20] sm:$0xff] %vm419_vm10, %v868_v60  ;;  %2445 = vmatmul.msk.f32.vlgmr.msrb.gmra.mxu2 %vm72_vm0, %v868_v60  ;;  %2446 = vmatmul.msk.f32.vlgmr.msrb.gmra.mxu3 %vm72_vm0, %v868_v60 }
 0x9f7   :  { %870 = vst.msk [vmem:[#allocation3 + $0x18] sm:$0xff] %vm421_vm11, %v868_v60 }
 0xa79   :  { %v917_v63 = vpop.f32.mrf.mxu3  ;;  %v897_v26 = vpop.f32.mrf.mxu2 }
 0xa7a   :  { %v921_v1 = vadd.f32 %v917_v63, %v3141_v40  ;;  %v920_v31 = vadd.f32 %v897_v26, %v3190_v42 }
 0xa7c   :  { %v2448_v2 = vmul.f32 -1.442695, %v921_v1  ;;  %v2447_v8 = vmul.f32 -1.442695, %v920_v31 }
 0xa7e   :  { %2631 = vpow2.f32 %v2448_v2 }
 0xa84   :  { %v2632_v6 = vpop.eup %2631 }
 0xa85   :  { %v929_v9 = vadd.f32 1.0, %v2632_v6 }
 0xa87   :  { %2633 = vrcp.f32 %v929_v9  ;;  %v956_v4 = vand.u32 2147483648, %v929_v9  ;;  %v954_v16 = vand.u32 2147483647, %v929_v9  ;;  %vm950_vm7 = vweird.f32 %v929_v9 }
 0xa88   :  { %2635 = vtanh.f32 %v921_v1 }
 0xa89   :  { %v957_v20 = vor.u32 1.1754944e-38, %v956_v4  ;;  %vm955_vm9 = vcmp.eq.f32.partialorder %v954_v16, 8.507059e+37  ;;  %2637 = vpow2.f32 %v2447_v8 }
 0xa8d   :  { %v2634_v57 = vpop.eup %2633 }
 0xa8e   :  { %v946_v59 = vmul.f32 %v2634_v57, %v929_v9  ;;  %vm951_vm6 = vweird.f32 %v2634_v57  ;;  %v2636_v40 = vpop.eup %2635 }
 0xa8f   :  { %vm952_vm8 = vmor %vm950_vm7, %vm951_vm6  ;;  %v2638_v62 = vpop.eup %2637 }
 0xa90   :  { %v947_v44 = vsub.f32 1.0, %v946_v59  ;;  %v928_v36 = vadd.f32 1.0, %v2638_v62 }
 0xa92   :  { %v948_v12 = vmul.f32 %v2634_v57, %v947_v44  ;;  %2639 = vrcp.f32 %v928_v36  ;;  %v941_v32 = vand.u32 2147483648, %v928_v36  ;;  %vm935_vm13 = vweird.f32 %v928_v36 }
 0xa93   :  { %v939_v29 = vand.u32 2147483647, %v928_v36 }
 0xa94   :  { %v949_v18 = vadd.f32 %v2634_v57, %v948_v12  ;;  %v942_v28 = vor.u32 1.1754944e-38, %v941_v32 }
 0xa95   :  { %vm940_vm15 = vcmp.eq.f32.partialorder %v939_v29, 8.507059e+37 }
 0xa96   :  { %v953_v25 = vsel %vm952_vm8, %v2634_v57, %v949_v18 }
 0xa97   :  { %v958_v34 = vsel %vm955_vm9, %v957_v20, %v953_v25 }
 0xa98   :  { %v963_v3 = vsel %vm21_vm3, %v958_v34, %v2636_v40  ;;  %v2640_v22 = vpop.eup %2639 }
 0xa99   :  { %966 = vrot.lane.b32.xlu0 %v963_v3, %s2764_s24  ;;  %v931_v14 = vmul.f32 %v2640_v22, %v928_v36  ;;  %vm936_vm12 = vweird.f32 %v2640_v22 }
 0xa9a   :  { %vm937_vm14 = vmor %vm935_vm13, %vm936_vm12 }
 0xa9b   :  { %v932_v5 = vsub.f32 1.0, %v931_v14 }
 0xa9d   :  { %v933_v48 = vmul.f32 %v2640_v22, %v932_v5 }
 0xa9f   :  { %v934_v17 = vadd.f32 %v2640_v22, %v933_v48 }
 0xaa1   :  { %v938_v21 = vsel %vm937_vm14, %v2640_v22, %v934_v17 }
 0xaa2   :  { %v943_v42 = vsel %vm940_vm15, %v942_v28, %v938_v21 }
 0xaa3   :  { %v964_v30 = vmul.f32 %v943_v42, %v862_v10 }
 0xb0b   :  { %v967_v23 = vpop.permute.xlu0 %966 }
 0xb0c   :  { %v969_v27 = vmul.f32 %v967_v23, %v943_v42 }
 0xb0e   :  { %971 = vrot.lane.b32.xlu1 %v969_v27, %s2764_s24 }
 0xb80   :  { %v972_v45 = vpop.permute.xlu1 %971 }
 0xb81   :  { %v974_v33 = vadd.f32 %v972_v45, %v964_v30 }
 0xb83   :  { %2641 = vtanh.f32 %v974_v33 }
 0xb89   :  { %v2642_v46 = vpop.eup %2641 }
 0xb8a   :  { %977 = vrot.lane.b32.xlu2 %v2642_v46, %s2764_s24 }
 0xbe4   :  { %v978_v47 = vpop.permute.xlu2 %977 }
 0xbe5   :  { %v980_v37 = vmul.f32 %v978_v47, %v963_v3 }
 0xbe7   :  { %981 = vst.msk [vmem:[#allocation3 + $0x28] sm:$0xff] %vm419_vm10, %v980_v37  ;;  %2449 = vmatmul.msk.f32.vlgmr.msra.gmra.mxu0 %vm72_vm0, %v980_v37  ;;  %2450 = vmatmul.msk.f32.vlgmr.msra.gmra.mxu1 %vm72_vm0, %v980_v37 }
 0xbe8   :  { %982 = vst.msk [vmem:[#allocation3 + $0x10] sm:$0xff] %vm421_vm11, %v980_v37 }
 0xc64   :  { %v1029_v49 = vpop.f32.mrf.mxu1  ;;  %v1009_v60 = vpop.f32.mrf.mxu0 }
 0xc65   :  { %v1033_v41 = vadd.f32 %v1029_v49, %v3153_v7  ;;  %v1032_v63 = vadd.f32 %v1009_v60, %v3187_v39  ;;  %v2481_v60 = vld [vmem:[%s3865_s1 + $0x1c0] sm:$0xff] }
 0xc67   :  { %v2452_v50 = vmul.f32 -1.442695, %v1033_v41  ;;  %v2451_v1 = vmul.f32 -1.442695, %v1032_v63  ;;  %v2482_v63 = vld [vmem:[%s3865_s1 + $0x1c8] sm:$0xff] }
 0xc69   :  { %2643 = vpow2.f32 %v2452_v50 }
 0xc6f   :  { %v2644_v43 = vpop.eup %2643 }
 0xc70   :  { %v1041_v51 = vadd.f32 1.0, %v2644_v43 }
 0xc72   :  { %2645 = vrcp.f32 %v1041_v51  ;;  %v1068_v0 = vand.u32 2147483648, %v1041_v51  ;;  %v1066_v15 = vand.u32 2147483647, %v1041_v51  ;;  %vm1062_vm2 = vweird.f32 %v1041_v51 }
 0xc73   :  { %2647 = vtanh.f32 %v1033_v41 }
 0xc74   :  { %v1069_v55 = vor.u32 1.1754944e-38, %v1068_v0  ;;  %vm1067_vm5 = vcmp.eq.f32.partialorder %v1066_v15, 8.507059e+37  ;;  %2649 = vpow2.f32 %v2451_v1  ;;  %v2483_v1 = vld [vmem:[%s3865_s1 + $0x1d0] sm:$0xff] }
 0xc78   :  { %v2646_v52 = vpop.eup %2645 }
 0xc79   :  { %v1058_v53 = vmul.f32 %v2646_v52, %v1041_v51  ;;  %vm1063_vm1 = vweird.f32 %v2646_v52  ;;  %v2648_v7 = vpop.eup %2647 }
 0xc7a   :  { %vm1064_vm4 = vmor %vm1062_vm2, %vm1063_vm1  ;;  %v2650_v2 = vpop.eup %2649 }
 0xc7b   :  { %v1059_v38 = vsub.f32 1.0, %v1058_v53  ;;  %v1040_v6 = vadd.f32 1.0, %v2650_v2  ;;  %v2484_v2 = vld [vmem:[%s3865_s1 + $0x1d8] sm:$0xff] }
 0xc7d   :  { %v1060_v13 = vmul.f32 %v2646_v52, %v1059_v38  ;;  %2651 = vrcp.f32 %v1040_v6  ;;  %v1053_v12 = vand.u32 2147483648, %v1040_v6  ;;  %vm1047_vm7 = vweird.f32 %v1040_v6 }
 0xc7e   :  { %v1051_v16 = vand.u32 2147483647, %v1040_v6 }
 0xc7f   :  { %v1061_v19 = vadd.f32 %v2646_v52, %v1060_v13  ;;  %v1054_v20 = vor.u32 1.1754944e-38, %v1053_v12 }
 0xc80   :  { %vm1052_vm9 = vcmp.eq.f32.partialorder %v1051_v16, 8.507059e+37 }
 0xc81   :  { %v1065_v10 = vsel %vm1064_vm4, %v2646_v52, %v1061_v19 }
 0xc82   :  { %v1070_v54 = vsel %vm1067_vm5, %v1069_v55, %v1065_v10  ;;  %v2485_v10 = vld [vmem:[%s3865_s1 + $0x1e0] sm:$0xff] }
 0xc83   :  { %v1075_v58 = vsel %vm21_vm3, %v1070_v54, %v2648_v7  ;;  %v2652_v9 = vpop.eup %2651  ;;  %v2486_v7 = vld [vmem:[%s3865_s1 + $0x1e8] sm:$0xff]  ;;  %v2487_v54 = vld [vmem:[%s3865_s1 + $0x1f0] sm:$0xff]  ;;  %1291 = vmatpush.msrb.mxu0 %v2485_v10 }
 0xc84   :  { %1078 = vrot.lane.b32.xlu0 %v1075_v58, %s2764_s24  ;;  %v1043_v57 = vmul.f32 %v2652_v9, %v1040_v6  ;;  %vm1048_vm6 = vweird.f32 %v2652_v9  ;;  %1332 = vmatpush.msrb.mxu1 %v2486_v7  ;;  %v2477_v6 = vld [vmem:[%s3865_s1 + $0x1a0] sm:$0xff] }
 0xc85   :  { %vm1049_vm8 = vmor %vm1047_vm7, %vm1048_vm6  ;;  %1373 = vmatpush.msrb.mxu2 %v2487_v54  ;;  %1292 = vmatpush.msrb.mxu0 %v2481_v60  ;;  %v2489_v54 = vld [vmem:[%s3868_s3 + $0x4] sm:$0xf] }
 0xc86   :  { %v1044_v59 = vsub.f32 1.0, %v1043_v57  ;;  %1333 = vmatpush.msrb.mxu1 %v2482_v63  ;;  %v2479_v57 = vld [vmem:[%s3865_s1 + $0x1b0] sm:$0xff]  ;;  %v3649_v60 = vperm.slane %v2489_v54, 3  ;;  %v3651_v63 = vperm.slane %v2489_v54, 0 }
 0xc87   :  { %1374 = vmatpush.msrb.mxu2 %v2483_v1  ;;  %1293 = vmatpush.msrb.mxu0 %v2477_v6  ;;  %v3653_v1 = vperm.slane %v2489_v54, 1 }
 0xc88   :  { %v1045_v44 = vmul.f32 %v2652_v9, %v1044_v59  ;;  %v2480_v59 = vld [vmem:[%s3865_s1 + $0x1b8] sm:$0xff] }
 0xc89   :  { %1375 = vmatpush.msrb.mxu2 %v2479_v57 }
 0xc8a   :  { %v1046_v4 = vadd.f32 %v2652_v9, %v1045_v44 }
 0xc8c   :  { %v1050_v18 = vsel %vm1049_vm8, %v2652_v9, %v1046_v4  ;;  %v2478_v9 = vld [vmem:[%s3865_s1 + $0x1a8] sm:$0xff] }
 0xc8d   :  { %v1055_v39 = vsel %vm1052_vm9, %v1054_v20, %v1050_v18  ;;  %1334 = vmatpush.msrb.mxu1 %v2478_v9  ;;  %v2473_v18 = vld [vmem:[%s3865_s1 + $0x180] sm:$0xff]  ;;  %v2474_v20 = vld [vmem:[%s3865_s1 + $0x188] sm:$0xff] }
 0xc8e   :  { %v1076_v34 = vmul.f32 %v1055_v39, %v974_v33  ;;  %1294 = vmatpush.msrb.mxu0 %v2473_v18 }
 0xc8f   :  { %1335 = vmatpush.msrb.mxu1 %v2474_v20 }
 0xcf6   :  { %v1079_v25 = vpop.permute.xlu0 %1078 }
 0xcf7   :  { %v1081_v40 = vmul.f32 %v1079_v25, %v1055_v39  ;;  %v2475_v25 = vld [vmem:[%s3865_s1 + $0x190] sm:$0xff]  ;;  %v2476_v39 = vld [vmem:[%s3865_s1 + $0x198] sm:$0xff] }
 0xcf8   :  { %1376 = vmatpush.msrb.mxu2 %v2475_v25 }
 0xcf9   :  { %1083 = vrot.lane.b32.xlu1 %v1081_v40, %s2764_s24  ;;  %v2469_v40 = vld [vmem:[%s3865_s1 + $0x160] sm:$0xff] }
 0xcfa   :  { %1295 = vmatpush.msrb.mxu0 %v2469_v40 }
 0xd6b   :  { %v1084_v3 = vpop.permute.xlu1 %1083 }
 0xd6c   :  { %v3328_v26 = vadd.f32 %v1084_v3, %v1076_v34  ;;  %v2470_v34 = vld [vmem:[%s3865_s1 + $0x168] sm:$0xff]  ;;  %v2471_v3 = vld [vmem:[%s3865_s1 + $0x170] sm:$0xff] }
 0xd6d   :  { %1336 = vmatpush.msrb.mxu1 %v2470_v34  ;;  %1377 = vmatpush.msrb.mxu2 %v2471_v3 }
 0xd6e   :  { %2653 = vtanh.f32 %v3328_v26 }
 0xd74   :  { %v2654_v31 = vpop.eup %2653 }
 0xd75   :  { %1089 = vrot.lane.b32.xlu2 %v2654_v31, %s2764_s24  ;;  %v2465_v31 = vld [vmem:[%s3865_s1 + $0x140] sm:$0xff] }
 0xd76   :  { %1296 = vmatpush.msrb.mxu0 %v2465_v31 }
 0xdcf   :  { %v1090_v8 = vpop.permute.xlu2 %1089 }
 0xdd0   :  { %v1092_v62 = vmul.f32 %v1090_v8, %v1075_v58  ;;  %v2488_v58 = vld [vmem:[%s3865_s1 + $0x1f8] sm:$0xff]  ;;  %v2466_v8 = vld [vmem:[%s3865_s1 + $0x148] sm:$0xff] }
 0xdd1   :  { %1414 = vmatpush.msrb.mxu3 %v2488_v58  ;;  %1337 = vmatpush.msrb.mxu1 %v2466_v8  ;;  %v3647_v58 = vperm.slane %v2489_v54, 2 }
 0xdd2   :  { %1093 = vst.msk [vmem:[#allocation3 + $0x30] sm:$0xff] %vm419_vm10, %v1092_v62  ;;  %2453 = vmatmul.msk.f32.vlgmr.msra.gmra.mxu2 %vm72_vm0, %v1092_v62  ;;  %2454 = vmatmul.msk.f32.vlgmr.msra.gmra.mxu3 %vm72_vm0, %v1092_v62 }
 0xdd3   :  { %1094 = vst.msk [vmem:[#allocation3 + $0x8] sm:$0xff] %vm421_vm11, %v1092_v62  ;;  %1415 = vmatpush.msrb.mxu3 %v2484_v2  ;;  %v2467_v62 = vld [vmem:[%s3865_s1 + $0x150] sm:$0xff] }
 0xdd4   :  { %1378 = vmatpush.msrb.mxu2 %v2467_v62 }
 0xdd5   :  { %1416 = vmatpush.msrb.mxu3 %v2480_v59 }
 0xdd7   :  { %1417 = vmatpush.msrb.mxu3 %v2476_v39 }
 0xe55   :  { %v1141_v36 = vpop.f32.mrf.mxu3  ;;  %v1121_v46 = vpop.f32.mrf.mxu2 }
 0xe56   :  { %v1145_v22 = vadd.f32 %v1141_v36, %v3160_v24  ;;  %v1144_v47 = vadd.f32 %v1121_v46, %v3181_v35  ;;  %v2468_v36 = vld [vmem:[%s3865_s1 + $0x158] sm:$0xff]  ;;  %v1208_v46 = vld [vmem:[#allocation3 + $0x8] sm:$0xff] }
 0xe58   :  { %v2456_v14 = vmul.f32 -1.442695, %v1145_v22  ;;  %v2455_v37 = vmul.f32 -1.442695, %v1144_v47  ;;  %v3492_v47 = vld [vmem:[%s3867_s2 + $0xa8] sm:$0xff] }
 0xe5a   :  { %2655 = vpow2.f32 %v2456_v14  ;;  %v2462_v14 = vld [vmem:[%s3865_s1 + $0x128] sm:$0xff] }
 0xe5b   :  { %1338 = vmatpush.msrb.mxu1 %v2462_v14 }
 0xe60   :  { %v2656_v5 = vpop.eup %2655 }
 0xe61   :  { %v1153_v48 = vadd.f32 1.0, %v2656_v5  ;;  %v2463_v5 = vld [vmem:[%s3865_s1 + $0x130] sm:$0xff] }
 0xe62   :  { %1379 = vmatpush.msrb.mxu2 %v2463_v5 }
 0xe63   :  { %2657 = vrcp.f32 %v1153_v48  ;;  %v1180_v21 = vand.u32 2147483648, %v1153_v48  ;;  %v1178_v23 = vand.u32 2147483647, %v1153_v48  ;;  %vm1174_vm13 = vweird.f32 %v1153_v48 }
 0xe64   :  { %2659 = vtanh.f32 %v1145_v22  ;;  %v2461_v22 = vld [vmem:[%s3865_s1 + $0x120] sm:$0xff] }
 0xe65   :  { %v1181_v27 = vor.u32 1.1754944e-38, %v1180_v21  ;;  %vm1179_vm15 = vcmp.eq.f32.partialorder %v1178_v23, 8.507059e+37  ;;  %2661 = vpow2.f32 %v2455_v37  ;;  %1297 = vmatpush.msrb.mxu0 %v2461_v22  ;;  %v2460_v21 = vld [vmem:[%s3865_s1 + $0x118] sm:$0xff]  ;;  %v3453_v23 = vld [vmem:[%s3867_s2 + $0xe8] sm:$0xff]  ;;  %v1209_v37 = vld [vmem:[#allocation3 + $0x10] sm:$0xff] }
 0xe69   :  { %v2658_v17 = vpop.eup %2657 }
 0xe6a   :  { %v1170_v32 = vmul.f32 %v2658_v17, %v1153_v48  ;;  %vm1175_vm12 = vweird.f32 %v2658_v17  ;;  %v2660_v24 = vpop.eup %2659  ;;  %v2464_v48 = vld [vmem:[%s3865_s1 + $0x138] sm:$0xff] }
 0xe6b   :  { %vm1176_vm14 = vmor %vm1174_vm13, %vm1175_vm12  ;;  %v2662_v49 = vpop.eup %2661 }
 0xe6c   :  { %v1171_v29 = vsub.f32 1.0, %v1170_v32  ;;  %v1152_v41 = vadd.f32 1.0, %v2662_v49  ;;  %v2458_v32 = vld [vmem:[%s3865_s1 + $0x108] sm:$0xff]  ;;  %v3503_v49 = vld [vmem:[%s3867_s2 + $0x98] sm:$0xff] }
 0xe6d   :  { %1339 = vmatpush.msrb.mxu1 %v2458_v32 }
 0xe6e   :  { %v1172_v28 = vmul.f32 %v2658_v17, %v1171_v29  ;;  %2663 = vrcp.f32 %v1152_v41  ;;  %v1165_v38 = vand.u32 2147483648, %v1152_v41  ;;  %vm1159_vm2 = vweird.f32 %v1152_v41  ;;  %v2459_v29 = vld [vmem:[%s3865_s1 + $0x110] sm:$0xff] }
 0xe6f   :  { %v1163_v0 = vand.u32 2147483647, %v1152_v41  ;;  %1380 = vmatpush.msrb.mxu2 %v2459_v29 }
 0xe70   :  { %v1173_v42 = vadd.f32 %v2658_v17, %v1172_v28  ;;  %v1166_v15 = vor.u32 1.1754944e-38, %v1165_v38  ;;  %v3446_v28 = vld [vmem:[%s3867_s2 + $0xf8] sm:$0xff]  ;;  %v3545_v38 = vld [vmem:[%s3867_s2 + $0xb0] sm:$0xff] }
 0xe71   :  { %vm1164_vm5 = vcmp.eq.f32.partialorder %v1163_v0, 8.507059e+37  ;;  %1530 = vmatpush.msra.mxu1 %v3446_v28  ;;  %v3552_v0 = vld [vmem:[%s3867_s2 + $0xa0] sm:$0xff] }
 0xe72   :  { %v1177_v30 = vsel %vm1176_vm14, %v2658_v17, %v1173_v42  ;;  %v2457_v17 = vld [vmem:[%s3865_s1 + $0x100] sm:$0xff]  ;;  %v3460_v42 = vld [vmem:[%s3867_s2 + $0xd8] sm:$0xff] }
 0xe73   :  { %v1182_v45 = vsel %vm1179_vm15, %v1181_v27, %v1177_v30  ;;  %1298 = vmatpush.msrb.mxu0 %v2457_v17  ;;  %1531 = vmatpush.msra.mxu1 %v3453_v23 }
 0xe74   :  { %v3339_v33 = vsel %vm21_vm3, %v1182_v45, %v2660_v24  ;;  %v2664_v50 = vpop.eup %2663  ;;  %v3470_v24 = vld [vmem:[%s3867_s2 + $0xc8] sm:$0xff] }
 0xe75   :  { %1190 = vrot.lane.b32.xlu0 %v3339_v33, %s2764_s24  ;;  %v1155_v43 = vmul.f32 %v2664_v50, %v1152_v41  ;;  %vm1160_vm1 = vweird.f32 %v2664_v50  ;;  %1532 = vmatpush.msra.mxu1 %v3460_v42  ;;  %v3508_v41 = vld [vmem:[%s3867_s2 + $0xf0] sm:$0xff] }
 0xe76   :  { %vm1161_vm4 = vmor %vm1159_vm2, %vm1160_vm1  ;;  %1510 = vmatpush.msra.mxu0 %v3508_v41  ;;  %1620 = vmatpush.msra.mxu2 %v3508_v41 }
 0xe77   :  { %v1156_v51 = vsub.f32 1.0, %v1155_v43  ;;  %1533 = vmatpush.msra.mxu1 %v3470_v24  ;;  %v3520_v43 = vld [vmem:[%s3867_s2 + $0xd0] sm:$0xff] }
 0xe79   :  { %v1157_v52 = vmul.f32 %v2664_v50, %v1156_v51  ;;  %v1210_v51 = vld [vmem:[#allocation3 + $0x18] sm:$0xff] }
 0xe7b   :  { %v1158_v53 = vadd.f32 %v2664_v50, %v1157_v52  ;;  %v3535_v52 = vld [vmem:[%s3867_s2 + $0xc0] sm:$0xff] }
 0xe7d   :  { %v1162_v13 = vsel %vm1161_vm4, %v2664_v50, %v1158_v53  ;;  %v3513_v50 = vld [vmem:[%s3867_s2 + $0xe0] sm:$0xff]  ;;  %v3540_v53 = vld [vmem:[%s3867_s2 + $0x88] sm:$0xff] }
 0xe7e   :  { %v1167_v35 = vsel %vm1164_vm5, %v1166_v15, %v1162_v13  ;;  %1511 = vmatpush.msra.mxu0 %v3513_v50  ;;  %1621 = vmatpush.msra.mxu2 %v3513_v50  ;;  %v1211_v13 = vld [vmem:[#allocation3 + $0x20] sm:$0xff]  ;;  %v3565_v15 = vld [vmem:[%s3867_s2 + $0x90] sm:$0xff] }
 0xe7f   :  { %v1188_v44 = vmul.f32 %v1167_v35, %v3328_v26  ;;  %v2472_v26 = vld [vmem:[%s3865_s1 + $0x178] sm:$0xff] }
 0xe80   :  { %1418 = vmatpush.msrb.mxu3 %v2472_v26  ;;  %1512 = vmatpush.msra.mxu0 %v3520_v43 }
 0xe81   :  { %1622 = vmatpush.msra.mxu2 %v3520_v43 }
 0xe82   :  { %1419 = vmatpush.msrb.mxu3 %v2468_v36  ;;  %1513 = vmatpush.msra.mxu0 %v3535_v52 }
 0xe83   :  { %1623 = vmatpush.msra.mxu2 %v3535_v52 }
 0xe84   :  { %1420 = vmatpush.msrb.mxu3 %v2464_v48  ;;  %1514 = vmatpush.msra.mxu0 %v3545_v38 }
 0xe85   :  { %1624 = vmatpush.msra.mxu2 %v3545_v38 }
 0xe86   :  { %1421 = vmatpush.msrb.mxu3 %v2460_v21  ;;  %1515 = vmatpush.msra.mxu0 %v3552_v0 }
 0xe87   :  { %1625 = vmatpush.msra.mxu2 %v3552_v0 }
 0xe88   :  { %1640 = vmatpush.msra.mxu3 %v3446_v28  ;;  %1516 = vmatpush.msra.mxu0 %v3565_v15 }
 0xe89   :  { %1626 = vmatpush.msra.mxu2 %v3565_v15 }
 0xe8a   :  { %1641 = vmatpush.msra.mxu3 %v3453_v23 }
 0xe8c   :  { %1642 = vmatpush.msra.mxu3 %v3460_v42 }
 0xe8e   :  { %1643 = vmatpush.msra.mxu3 %v3470_v24 }
 0xee7   :  { %v1191_v19 = vpop.permute.xlu0 %1190 }
 0xee8   :  { %v1193_v55 = vmul.f32 %v1191_v19, %v1167_v35  ;;  %v3576_v19 = vld [vmem:[%s3867_s2 + $0x80] sm:$0xff]  ;;  %v1212_v35 = vld [vmem:[#allocation3 + $0x28] sm:$0xff] }
 0xee9   :  { %1517 = vmatpush.msra.mxu0 %v3576_v19  ;;  %1627 = vmatpush.msra.mxu2 %v3576_v19 }
 0xeea   :  { %1195 = vrot.lane.b32.xlu1 %v1193_v55, %s2764_s24  ;;  %v1213_v55 = vld [vmem:[#allocation3 + $0x30] sm:$0xff] }
 0xf5c   :  { %v1196_v4 = vpop.permute.xlu1 %1195 }
 0xf5d   :  { %v1198_v12 = vadd.f32 %v1196_v4, %v1188_v44 }
 0xf5f   :  { %2665 = vtanh.f32 %v1198_v12 }
 0xf65   :  { %v2666_v16 = vpop.eup %2665 }
 0xf66   :  { %1201 = vrot.lane.b32.xlu2 %v2666_v16, %s2764_s24 }
 0xfc0   :  { %v1202_v27 = vpop.permute.xlu2 %1201 }
 0xfc1   :  { %v1204_v30 = vmul.f32 %v1202_v27, %v3339_v33  ;;  %v3481_v33 = vld [vmem:[%s3867_s2 + $0xb8] sm:$0xff] }
 0xfc2   :  { %1534 = vmatpush.msra.mxu1 %v3481_v33  ;;  %1644 = vmatpush.msra.mxu3 %v3481_v33 }
 0xfc3   :  { %1205 = vst.msk [vmem:[#allocation3 + $0x38] sm:$0xff] %vm419_vm10, %v1204_v30 }
 0xfc4   :  { %1206 = vst.msk [vmem:[#allocation3] sm:$0xff] %vm421_vm11, %v1204_v30  ;;  %1535 = vmatpush.msra.mxu1 %v3492_v47  ;;  %1645 = vmatpush.msra.mxu3 %v3492_v47 }
 0xfc6   :  { %1536 = vmatpush.msra.mxu1 %v3503_v49  ;;  %1646 = vmatpush.msra.mxu3 %v3503_v49 }
 0xfc8   :  { %1537 = vmatpush.msra.mxu1 %v3540_v53  ;;  %1647 = vmatpush.msra.mxu3 %v3540_v53 }
 0xfca   :  { %v1214_v10 = vld [vmem:[#allocation3 + $0x38] sm:$0xff] }
 0xfcb   :  { %v1207_v45 = vld [vmem:[#allocation3] sm:$0xff] }
 0xfcc   :  { %2490 = vmatmul.msk.f32.vlgmr.msrb.gmra.mxu0 %vm72_vm0, %v1207_v45  ;;  %2498 = vmatmul.msk.f32.vlgmr.msrb.gmra.mxu1 %vm72_vm0, %v1207_v45 }
 0xfcd   :  { %2506 = vmatmul.msk.f32.vlgmr.msrb.gmra.mxu2 %vm72_vm0, %v1207_v45  ;;  %2514 = vmatmul.msk.f32.vlgmr.msrb.gmra.mxu3 %vm72_vm0, %v1207_v45 }
 0xfce   :  { %1750 = vmatpush.msrb.mxu1 %v3446_v28  ;;  %1860 = vmatpush.msrb.mxu3 %v3446_v28 }
 0xfcf   :  { %1730 = vmatpush.msrb.mxu0 %v3508_v41  ;;  %1840 = vmatpush.msrb.mxu2 %v3508_v41 }
 0xfd0   :  { %1751 = vmatpush.msrb.mxu1 %v3453_v23  ;;  %1861 = vmatpush.msrb.mxu3 %v3453_v23 }
 0xfd1   :  { %1731 = vmatpush.msrb.mxu0 %v3513_v50  ;;  %1841 = vmatpush.msrb.mxu2 %v3513_v50 }
 0xfd2   :  { %1752 = vmatpush.msrb.mxu1 %v3460_v42  ;;  %1862 = vmatpush.msrb.mxu3 %v3460_v42 }
 0xfd3   :  { %1732 = vmatpush.msrb.mxu0 %v3520_v43  ;;  %1842 = vmatpush.msrb.mxu2 %v3520_v43 }
 0xfd4   :  { %2491 = vmatmul.msk.f32.gmra.mxu0 %vm72_vm0, %v1208_v46  ;;  %2499 = vmatmul.msk.f32.gmra.mxu1 %vm72_vm0, %v1208_v46 }
 0xfd5   :  { %2507 = vmatmul.msk.f32.gmra.mxu2 %vm72_vm0, %v1208_v46  ;;  %2515 = vmatmul.msk.f32.gmra.mxu3 %vm72_vm0, %v1208_v46 }
 0xfd6   :  { %1753 = vmatpush.msrb.mxu1 %v3470_v24  ;;  %1863 = vmatpush.msrb.mxu3 %v3470_v24 }
 0xfd7   :  { %1733 = vmatpush.msrb.mxu0 %v3535_v52  ;;  %1843 = vmatpush.msrb.mxu2 %v3535_v52 }
 0xfd8   :  { %1754 = vmatpush.msrb.mxu1 %v3481_v33  ;;  %1864 = vmatpush.msrb.mxu3 %v3481_v33 }
 0xfd9   :  { %1734 = vmatpush.msrb.mxu0 %v3545_v38  ;;  %1844 = vmatpush.msrb.mxu2 %v3545_v38 }
 0xfda   :  { %1755 = vmatpush.msrb.mxu1 %v3492_v47  ;;  %1865 = vmatpush.msrb.mxu3 %v3492_v47 }
 0xfdb   :  { %1735 = vmatpush.msrb.mxu0 %v3552_v0  ;;  %1845 = vmatpush.msrb.mxu2 %v3552_v0 }
 0xfdc   :  { %2492 = vmatmul.msk.f32.gmra.mxu0 %vm72_vm0, %v1209_v37  ;;  %2500 = vmatmul.msk.f32.gmra.mxu1 %vm72_vm0, %v1209_v37 }
 0xfdd   :  { %2508 = vmatmul.msk.f32.gmra.mxu2 %vm72_vm0, %v1209_v37  ;;  %2516 = vmatmul.msk.f32.gmra.mxu3 %vm72_vm0, %v1209_v37 }
 0xfde   :  { %1756 = vmatpush.msrb.mxu1 %v3503_v49  ;;  %1866 = vmatpush.msrb.mxu3 %v3503_v49 }
 0xfdf   :  { %1736 = vmatpush.msrb.mxu0 %v3565_v15  ;;  %1846 = vmatpush.msrb.mxu2 %v3565_v15 }
 0xfe0   :  { %1757 = vmatpush.msrb.mxu1 %v3540_v53  ;;  %1867 = vmatpush.msrb.mxu3 %v3540_v53 }
 0xfe1   :  { %1737 = vmatpush.msrb.mxu0 %v3576_v19  ;;  %1847 = vmatpush.msrb.mxu2 %v3576_v19 }
 0xfe4   :  { %2493 = vmatmul.msk.f32.gmra.mxu0 %vm72_vm0, %v1210_v51  ;;  %2501 = vmatmul.msk.f32.gmra.mxu1 %vm72_vm0, %v1210_v51 }
 0xfe5   :  { %2509 = vmatmul.msk.f32.gmra.mxu2 %vm72_vm0, %v1210_v51  ;;  %2517 = vmatmul.msk.f32.gmra.mxu3 %vm72_vm0, %v1210_v51 }
 0xfec   :  { %2494 = vmatmul.msk.f32.gmra.mxu0 %vm72_vm0, %v1211_v13  ;;  %2502 = vmatmul.msk.f32.gmra.mxu1 %vm72_vm0, %v1211_v13 }
 0xfed   :  { %2510 = vmatmul.msk.f32.gmra.mxu2 %vm72_vm0, %v1211_v13  ;;  %2518 = vmatmul.msk.f32.gmra.mxu3 %vm72_vm0, %v1211_v13 }
 0xff4   :  { %2495 = vmatmul.msk.f32.gmra.mxu0 %vm72_vm0, %v1212_v35  ;;  %2503 = vmatmul.msk.f32.gmra.mxu1 %vm72_vm0, %v1212_v35 }
 0xff5   :  { %2511 = vmatmul.msk.f32.gmra.mxu2 %vm72_vm0, %v1212_v35  ;;  %2519 = vmatmul.msk.f32.gmra.mxu3 %vm72_vm0, %v1212_v35 }
 0xffc   :  { %2496 = vmatmul.msk.f32.gmra.mxu0 %vm72_vm0, %v1213_v55  ;;  %2504 = vmatmul.msk.f32.gmra.mxu1 %vm72_vm0, %v1213_v55 }
 0xffd   :  { %2512 = vmatmul.msk.f32.gmra.mxu2 %vm72_vm0, %v1213_v55  ;;  %2520 = vmatmul.msk.f32.gmra.mxu3 %vm72_vm0, %v1213_v55 }
0x1004   :  { %2497 = vmatmul.msk.f32.gmra.mxu0 %vm72_vm0, %v1214_v10  ;;  %2505 = vmatmul.msk.f32.gmra.mxu1 %vm72_vm0, %v1214_v10 }
0x1005   :  { %2513 = vmatmul.msk.f32.gmra.mxu2 %vm72_vm0, %v1214_v10  ;;  %2521 = vmatmul.msk.f32.gmra.mxu3 %vm72_vm0, %v1214_v10 }
0x100c   :  { %1518 = vmatmul.f32.vlgmr.msra.gmra.mxu0 %v2763_v56  ;;  %1538 = vmatmul.f32.vlgmr.msra.gmra.mxu1 %v2763_v56 }
0x100d   :  { %1950 = vmatpush.msra.mxu0 %v3508_v41  ;;  %1970 = vmatpush.msra.mxu1 %v3446_v28 }
0x100f   :  { %1951 = vmatpush.msra.mxu0 %v3513_v50  ;;  %1971 = vmatpush.msra.mxu1 %v3453_v23 }
0x1011   :  { %1952 = vmatpush.msra.mxu0 %v3520_v43  ;;  %1972 = vmatpush.msra.mxu1 %v3460_v42 }
0x1013   :  { %1953 = vmatpush.msra.mxu0 %v3535_v52  ;;  %1973 = vmatpush.msra.mxu1 %v3470_v24 }
0x1015   :  { %1954 = vmatpush.msra.mxu0 %v3545_v38  ;;  %1974 = vmatpush.msra.mxu1 %v3481_v33 }
0x1017   :  { %1955 = vmatpush.msra.mxu0 %v3552_v0  ;;  %1975 = vmatpush.msra.mxu1 %v3492_v47 }
0x1019   :  { %1956 = vmatpush.msra.mxu0 %v3565_v15  ;;  %1976 = vmatpush.msra.mxu1 %v3503_v49 }
0x101b   :  { %1957 = vmatpush.msra.mxu0 %v3576_v19  ;;  %1977 = vmatpush.msra.mxu1 %v3540_v53 }
0x1049   :  { %v3640_v56 = vpop.f32.mrf.mxu0  ;;  %v3642_v7 = vpop.f32.mrf.mxu1 }
0x1050   :  { %v1382_v2 = vpop.f32.mrf.mxu2  ;;  %v1423_v6 = vpop.f32.mrf.mxu3 }
0x1051   :  { %v3656_v9 = vadd.f32 %v1382_v2, %v3647_v58  ;;  %v3659_v57 = vadd.f32 %v1423_v6, %v3649_v60  ;;  %v1303_v59 = vpop.f32.mrf.mxu0  ;;  %v1344_v44 = vpop.f32.mrf.mxu1 }
0x1052   :  { %v1304_v4 = vadd.f32 %v1303_v59, %v3651_v63  ;;  %v1345_v12 = vadd.f32 %v1344_v44, %v3653_v1 }
0x1058   :  { %v1385_v16 = vpop.f32.mrf.mxu2  ;;  %v1426_v18 = vpop.f32.mrf.mxu3 }
0x1059   :  { %v1386_v20 = vadd.f32 %v1385_v16, %v3647_v58  ;;  %v1427_v25 = vadd.f32 %v1426_v18, %v3649_v60  ;;  %v1306_v39 = vpop.f32.mrf.mxu0  ;;  %v1347_v40 = vpop.f32.mrf.mxu1 }
0x105a   :  { %v1307_v34 = vadd.f32 %v1306_v39, %v3651_v63  ;;  %v1348_v3 = vadd.f32 %v1347_v40, %v3653_v1 }
0x1060   :  { %v1388_v26 = vpop.f32.mrf.mxu2  ;;  %v1429_v31 = vpop.f32.mrf.mxu3 }
0x1061   :  { %v1389_v8 = vadd.f32 %v1388_v26, %v3647_v58  ;;  %v1430_v62 = vadd.f32 %v1429_v31, %v3649_v60  ;;  %v1309_v36 = vpop.f32.mrf.mxu0  ;;  %v1350_v22 = vpop.f32.mrf.mxu1 }
0x1062   :  { %v1310_v14 = vadd.f32 %v1309_v36, %v3651_v63  ;;  %v1351_v5 = vadd.f32 %v1350_v22, %v3653_v1 }
0x1068   :  { %v1391_v48 = vpop.f32.mrf.mxu2  ;;  %v1432_v17 = vpop.f32.mrf.mxu3 }
0x1069   :  { %v1392_v32 = vadd.f32 %v1391_v48, %v3647_v58  ;;  %v1433_v29 = vadd.f32 %v1432_v17, %v3649_v60  ;;  %v1312_v21 = vpop.f32.mrf.mxu0  ;;  %v1353_v27 = vpop.f32.mrf.mxu1 }
0x106a   :  { %v1313_v30 = vadd.f32 %v1312_v21, %v3651_v63  ;;  %v1354_v45 = vadd.f32 %v1353_v27, %v3653_v1 }
0x106c   :  { %v3675_v46 = vadd.f32 %v1392_v32, %v1313_v30  ;;  %v3677_v37 = vadd.f32 %v1433_v29, %v1354_v45 }
0x1070   :  { %v1394_v51 = vpop.f32.mrf.mxu2  ;;  %v1435_v13 = vpop.f32.mrf.mxu3 }
0x1071   :  { %v1395_v35 = vadd.f32 %v1394_v51, %v3647_v58  ;;  %v1436_v55 = vadd.f32 %v1435_v13, %v3649_v60  ;;  %v1315_v10 = vpop.f32.mrf.mxu0  ;;  %v1356_v54 = vpop.f32.mrf.mxu1 }
0x1072   :  { %v1316_v2 = vadd.f32 %v1315_v10, %v3651_v63  ;;  %v1357_v6 = vadd.f32 %v1356_v54, %v3653_v1 }
0x1073   :  { %v3683_v59 = vadd.f32 %v1395_v35, %v1310_v14  ;;  %v3685_v44 = vadd.f32 %v1436_v55, %v1351_v5  ;;  %v1342_v55 = vadd.f32 %v3642_v7, %v3653_v1 }
0x1074   :  { %v3687_v16 = vadd.f32 %v1389_v8, %v1316_v2  ;;  %v3689_v18 = vadd.f32 %v1430_v62, %v1357_v6 }
0x1078   :  { %v1397_v39 = vpop.f32.mrf.mxu2  ;;  %v1438_v40 = vpop.f32.mrf.mxu3 }
0x1079   :  { %v1398_v26 = vadd.f32 %v1397_v39, %v3647_v58  ;;  %v1439_v31 = vadd.f32 %v1438_v40, %v3649_v60  ;;  %v1318_v36 = vpop.f32.mrf.mxu0  ;;  %v1359_v22 = vpop.f32.mrf.mxu1 }
0x107a   :  { %v1319_v48 = vadd.f32 %v1318_v36, %v3651_v63  ;;  %v1360_v17 = vadd.f32 %v1359_v22, %v3653_v1 }
0x107b   :  { %v3695_v14 = vadd.f32 %v1398_v26, %v1307_v34  ;;  %v3697_v5 = vadd.f32 %v1439_v31, %v1348_v3 }
0x107c   :  { %v3699_v8 = vadd.f32 %v1386_v20, %v1319_v48  ;;  %v3701_v62 = vadd.f32 %v1427_v25, %v1360_v17 }
0x1080   :  { %v1400_v32 = vpop.f32.mrf.mxu2  ;;  %v1441_v29 = vpop.f32.mrf.mxu3 }
0x1081   :  { %v1401_v21 = vadd.f32 %v1400_v32, %v3647_v58  ;;  %v1442_v27 = vadd.f32 %v1441_v29, %v3649_v60  ;;  %v1321_v30 = vpop.f32.mrf.mxu0  ;;  %v1362_v45 = vpop.f32.mrf.mxu1 }
0x1082   :  { %v1322_v51 = vadd.f32 %v1321_v30, %v3651_v63  ;;  %v1363_v13 = vadd.f32 %v1362_v45, %v3653_v1 }
0x1083   :  { %v3707_v34 = vadd.f32 %v1401_v21, %v1304_v4  ;;  %v3709_v3 = vadd.f32 %v1442_v27, %v1345_v12  ;;  %v1301_v21 = vadd.f32 %v3640_v56, %v3651_v63 }
0x1084   :  { %v3712_v20 = vadd.f32 %v3656_v9, %v1322_v51  ;;  %v3715_v25 = vadd.f32 %v3659_v57, %v1363_v13 }
0x1088   :  { %v1444_v35 = vpop.f32.mrf.mxu3  ;;  %v1403_v32 = vpop.f32.mrf.mxu2 }
0x1089   :  { %v1445_v10 = vadd.f32 %v1444_v35, %v3649_v60  ;;  %v1539_v54 = vpop.f32.mrf.mxu1  ;;  %v1404_v29 = vadd.f32 %v1403_v32, %v3647_v58  ;;  %v1519_v30 = vpop.f32.mrf.mxu0 }
0x108b   :  { %v1501_v2 = vadd.f32 %v1445_v10, %v1342_v55  ;;  %v1500_v27 = vadd.f32 %v1404_v29, %v1301_v21 }
0x108d   :  { %v1543_v6 = vadd.f32 %v1539_v54, %v1501_v2  ;;  %v1542_v45 = vadd.f32 %v1519_v30, %v1500_v27 }
0x108f   :  { %v2539_v39 = vmul.f32 -1.442695, %v1543_v6  ;;  %v2538_v51 = vmul.f32 -1.442695, %v1542_v45 }
0x1091   :  { %2667 = vpow2.f32 %v2539_v39 }
0x1097   :  { %v2668_v4 = vpop.eup %2667 }
0x1098   :  { %v1551_v12 = vadd.f32 1.0, %v2668_v4 }
0x109a   :  { %2669 = vrcp.f32 %v1551_v12  ;;  %v1578_v57 = vand.u32 2147483648, %v1551_v12  ;;  %v1576_v36 = vand.u32 2147483647, %v1551_v12  ;;  %vm1572_vm11 = vweird.f32 %v1551_v12 }
0x109b   :  { %2671 = vtanh.f32 %v1543_v6 }
0x109c   :  { %v1579_v7 = vor.u32 1.1754944e-38, %v1578_v57  ;;  %vm1577_vm7 = vcmp.eq.f32.partialorder %v1576_v36, 8.507059e+37  ;;  %2673 = vpow2.f32 %v2538_v51 }
0x10a0   :  { %v2670_v40 = vpop.eup %2669 }
0x10a1   :  { %v1568_v9 = vmul.f32 %v2670_v40, %v1551_v12  ;;  %vm1573_vm10 = vweird.f32 %v2670_v40  ;;  %v2672_v1 = vpop.eup %2671 }
0x10a2   :  { %vm1574_vm6 = vmor %vm1572_vm11, %vm1573_vm10  ;;  %v2674_v13 = vpop.eup %2673 }
0x10a3   :  { %v1569_v26 = vsub.f32 1.0, %v1568_v9  ;;  %v1550_v35 = vadd.f32 1.0, %v2674_v13 }
0x10a5   :  { %v1570_v31 = vmul.f32 %v2670_v40, %v1569_v26  ;;  %2675 = vrcp.f32 %v1550_v35  ;;  %v1563_v39 = vand.u32 2147483648, %v1550_v35  ;;  %vm1557_vm9 = vweird.f32 %v1550_v35 }
0x10a6   :  { %v1561_v58 = vand.u32 2147483647, %v1550_v35 }
0x10a7   :  { %v1571_v22 = vadd.f32 %v2670_v40, %v1570_v31  ;;  %v1564_v56 = vor.u32 1.1754944e-38, %v1563_v39 }
0x10a8   :  { %vm1562_vm13 = vcmp.eq.f32.partialorder %v1561_v58, 8.507059e+37 }
0x10a9   :  { %v1575_v60 = vsel %vm1574_vm6, %v2670_v40, %v1571_v22 }
0x10aa   :  { %v1580_v48 = vsel %vm1577_vm7, %v1579_v7, %v1575_v60 }
0x10ab   :  { %v1585_v17 = vsel %vm21_vm3, %v1580_v48, %v2672_v1  ;;  %v2676_v55 = vpop.eup %2675 }
0x10ac   :  { %1588 = vrot.lane.b32.xlu0 %v1585_v17, %s2764_s24  ;;  %v1553_v10 = vmul.f32 %v2676_v55, %v1550_v35  ;;  %vm1558_vm8 = vweird.f32 %v2676_v55 }
0x10ad   :  { %vm1559_vm12 = vmor %vm1557_vm9, %vm1558_vm8 }
0x10ae   :  { %v1554_v54 = vsub.f32 1.0, %v1553_v10 }
0x10b0   :  { %v1555_v2 = vmul.f32 %v2676_v55, %v1554_v54 }
0x10b2   :  { %v1556_v6 = vadd.f32 %v2676_v55, %v1555_v2 }
0x10b4   :  { %v1560_v4 = vsel %vm1559_vm12, %v2676_v55, %v1556_v6 }
0x10b5   :  { %v1565_v12 = vsel %vm1562_vm13, %v1564_v56, %v1560_v4 }
0x10b6   :  { %v1586_v9 = vmul.f32 0.0, %v1565_v12 }
0x111e   :  { %v1589_v63 = vpop.permute.xlu0 %1588 }
0x111f   :  { %v1591_v40 = vmul.f32 %v1589_v63, %v1565_v12 }
0x1121   :  { %1593 = vrot.lane.b32.xlu1 %v1591_v40, %s2764_s24 }
0x1193   :  { %v1594_v26 = vpop.permute.xlu1 %1593 }
0x1194   :  { %v3727_v57 = vadd.f32 %v1594_v26, %v1586_v9 }
0x1196   :  { %2677 = vtanh.f32 %v3727_v57 }
0x119c   :  { %v2678_v31 = vpop.eup %2677 }
0x119d   :  { %1599 = vrot.lane.b32.xlu2 %v2678_v31, %s2764_s24 }
0x11f7   :  { %v1600_v36 = vpop.permute.xlu2 %1599 }
0x11f8   :  { %v3731_v22 = vmul.f32 %v1600_v36, %v1585_v17 }
0x11fa   :  { %2540 = vmatmul.msk.f32.vlgmr.msra.gmra.mxu2 %vm72_vm0, %v3731_v22  ;;  %2541 = vmatmul.msk.f32.vlgmr.msra.gmra.mxu3 %vm72_vm0, %v3731_v22 }
0x11fb   :  { %2060 = vmatpush.msra.mxu2 %v3508_v41  ;;  %2080 = vmatpush.msra.mxu3 %v3446_v28 }
0x11fd   :  { %2061 = vmatpush.msra.mxu2 %v3513_v50  ;;  %2081 = vmatpush.msra.mxu3 %v3453_v23 }
0x11ff   :  { %2062 = vmatpush.msra.mxu2 %v3520_v43  ;;  %2082 = vmatpush.msra.mxu3 %v3460_v42 }
0x1201   :  { %2063 = vmatpush.msra.mxu2 %v3535_v52  ;;  %2083 = vmatpush.msra.mxu3 %v3470_v24 }
0x1203   :  { %2064 = vmatpush.msra.mxu2 %v3545_v38  ;;  %2084 = vmatpush.msra.mxu3 %v3481_v33 }
0x1205   :  { %2065 = vmatpush.msra.mxu2 %v3552_v0  ;;  %2085 = vmatpush.msra.mxu3 %v3492_v47 }
0x1207   :  { %2066 = vmatpush.msra.mxu2 %v3565_v15  ;;  %2086 = vmatpush.msra.mxu3 %v3503_v49 }
0x1209   :  { %2067 = vmatpush.msra.mxu2 %v3576_v19  ;;  %2087 = vmatpush.msra.mxu3 %v3540_v53 }
0x127d   :  { %v1649_v7 = vpop.f32.mrf.mxu3  ;;  %v1629_v54 = vpop.f32.mrf.mxu2 }
0x127e   :  { %v1653_v60 = vadd.f32 %v1649_v7, %v3709_v3  ;;  %v1652_v2 = vadd.f32 %v1629_v54, %v3707_v34 }
0x1280   :  { %v2543_v1 = vmul.f32 -1.442695, %v1653_v60  ;;  %v2542_v6 = vmul.f32 -1.442695, %v1652_v2 }
0x1282   :  { %2679 = vpow2.f32 %v2543_v1 }
0x1288   :  { %v2680_v48 = vpop.eup %2679 }
0x1289   :  { %v1661_v17 = vadd.f32 1.0, %v2680_v48 }
0x128b   :  { %2681 = vrcp.f32 %v1661_v17  ;;  %v1688_v27 = vand.u32 2147483648, %v1661_v17  ;;  %v1686_v45 = vand.u32 2147483647, %v1661_v17  ;;  %vm1682_vm15 = vweird.f32 %v1661_v17 }
0x128c   :  { %2683 = vtanh.f32 %v1653_v60 }
0x128d   :  { %v1689_v13 = vor.u32 1.1754944e-38, %v1688_v27  ;;  %vm1687_vm2 = vcmp.eq.f32.partialorder %v1686_v45, 8.507059e+37  ;;  %2685 = vpow2.f32 %v2542_v6 }
0x1291   :  { %v2682_v32 = vpop.eup %2681 }
0x1292   :  { %v1678_v29 = vmul.f32 %v2682_v32, %v1661_v17  ;;  %vm1683_vm14 = vweird.f32 %v2682_v32  ;;  %v2684_v3 = vpop.eup %2683 }
0x1293   :  { %vm1684_vm1 = vmor %vm1682_vm15, %vm1683_vm14  ;;  %v2686_v39 = vpop.eup %2685 }
0x1294   :  { %v1679_v21 = vsub.f32 1.0, %v1678_v29  ;;  %v1660_v58 = vadd.f32 1.0, %v2686_v39 }
0x1296   :  { %v1680_v30 = vmul.f32 %v2682_v32, %v1679_v21  ;;  %2687 = vrcp.f32 %v1660_v58  ;;  %v1673_v9 = vand.u32 2147483648, %v1660_v58  ;;  %vm1667_vm5 = vweird.f32 %v1660_v58 }
0x1297   :  { %v1671_v26 = vand.u32 2147483647, %v1660_v58 }
0x1298   :  { %v1681_v51 = vadd.f32 %v2682_v32, %v1680_v30  ;;  %v1674_v36 = vor.u32 1.1754944e-38, %v1673_v9 }
0x1299   :  { %vm1672_vm11 = vcmp.eq.f32.partialorder %v1671_v26, 8.507059e+37 }
0x129a   :  { %v1685_v35 = vsel %vm1684_vm1, %v2682_v32, %v1681_v51 }
0x129b   :  { %v1690_v55 = vsel %vm1687_vm2, %v1689_v13, %v1685_v35 }
0x129c   :  { %v1695_v10 = vsel %vm21_vm3, %v1690_v55, %v2684_v3  ;;  %v2688_v4 = vpop.eup %2687 }
0x129d   :  { %1698 = vrot.lane.b32.xlu0 %v1695_v10, %s2764_s24  ;;  %v1663_v56 = vmul.f32 %v2688_v4, %v1660_v58  ;;  %vm1668_vm4 = vweird.f32 %v2688_v4 }
0x129e   :  { %vm1669_vm10 = vmor %vm1667_vm5, %vm1668_vm4 }
0x129f   :  { %v1664_v63 = vsub.f32 1.0, %v1663_v56 }
0x12a1   :  { %v1665_v12 = vmul.f32 %v2688_v4, %v1664_v63 }
0x12a3   :  { %v1666_v40 = vadd.f32 %v2688_v4, %v1665_v12 }
0x12a5   :  { %v1670_v31 = vsel %vm1669_vm10, %v2688_v4, %v1666_v40 }
0x12a6   :  { %v1675_v34 = vsel %vm1672_vm11, %v1674_v36, %v1670_v31 }
0x12a7   :  { %v1696_v1 = vmul.f32 %v1675_v34, %v3727_v57 }
0x130f   :  { %v1699_v7 = vpop.permute.xlu0 %1698 }
0x1310   :  { %v1701_v60 = vmul.f32 %v1699_v7, %v1675_v34 }
0x1312   :  { %1703 = vrot.lane.b32.xlu1 %v1701_v60, %s2764_s24 }
0x1384   :  { %v1704_v48 = vpop.permute.xlu1 %1703 }
0x1385   :  { %v3760_v17 = vadd.f32 %v1704_v48, %v1696_v1 }
0x1387   :  { %2689 = vtanh.f32 %v3760_v17 }
0x138d   :  { %v2690_v32 = vpop.eup %2689 }
0x138e   :  { %1709 = vrot.lane.b32.xlu2 %v2690_v32, %s2764_s24 }
0x13e8   :  { %v1710_v29 = vpop.permute.xlu2 %1709 }
0x13e9   :  { %v1712_v21 = vmul.f32 %v1710_v29, %v1695_v10 }
0x13eb   :  { %2544 = vmatmul.msk.f32.vlgmr.msrb.gmra.mxu0 %vm72_vm0, %v1712_v21  ;;  %2545 = vmatmul.msk.f32.vlgmr.msrb.gmra.mxu1 %vm72_vm0, %v1712_v21 }
0x13ec   :  { %2170 = vmatpush.msrb.mxu0 %v3508_v41  ;;  %2190 = vmatpush.msrb.mxu1 %v3446_v28 }
0x13ee   :  { %2171 = vmatpush.msrb.mxu0 %v3513_v50  ;;  %2191 = vmatpush.msrb.mxu1 %v3453_v23 }
0x13f0   :  { %2172 = vmatpush.msrb.mxu0 %v3520_v43  ;;  %2192 = vmatpush.msrb.mxu1 %v3460_v42 }
0x13f2   :  { %2173 = vmatpush.msrb.mxu0 %v3535_v52  ;;  %2193 = vmatpush.msrb.mxu1 %v3470_v24 }
0x13f4   :  { %2174 = vmatpush.msrb.mxu0 %v3545_v38  ;;  %2194 = vmatpush.msrb.mxu1 %v3481_v33 }
0x13f6   :  { %2175 = vmatpush.msrb.mxu0 %v3552_v0  ;;  %2195 = vmatpush.msrb.mxu1 %v3492_v47 }
0x13f8   :  { %2176 = vmatpush.msrb.mxu0 %v3565_v15  ;;  %2196 = vmatpush.msrb.mxu1 %v3503_v49 }
0x13fa   :  { %2177 = vmatpush.msrb.mxu0 %v3576_v19  ;;  %2197 = vmatpush.msrb.mxu1 %v3540_v53 }
0x1468   :  { %v1759_v57 = vpop.f32.mrf.mxu1  ;;  %v1739_v56 = vpop.f32.mrf.mxu0 }
0x1469   :  { %v1763_v27 = vadd.f32 %v1759_v57, %v3697_v5  ;;  %v1762_v63 = vadd.f32 %v1739_v56, %v3695_v14 }
0x146b   :  { %v2547_v30 = vmul.f32 -1.442695, %v1763_v27  ;;  %v2546_v12 = vmul.f32 -1.442695, %v1762_v63 }
0x146d   :  { %2691 = vpow2.f32 %v2547_v30 }
0x1473   :  { %v2692_v45 = vpop.eup %2691 }
0x1474   :  { %v1771_v51 = vadd.f32 1.0, %v2692_v45 }
0x1476   :  { %2693 = vrcp.f32 %v1771_v51  ;;  %v1798_v55 = vand.u32 2147483648, %v1771_v51  ;;  %v1796_v54 = vand.u32 2147483647, %v1771_v51  ;;  %vm1792_vm7 = vweird.f32 %v1771_v51 }
0x1477   :  { %2695 = vtanh.f32 %v1763_v27 }
0x1478   :  { %v1799_v6 = vor.u32 1.1754944e-38, %v1798_v55  ;;  %vm1797_vm9 = vcmp.eq.f32.partialorder %v1796_v54, 8.507059e+37  ;;  %2697 = vpow2.f32 %v2546_v12 }
0x147c   :  { %v2694_v13 = vpop.eup %2693 }
0x147d   :  { %v1788_v35 = vmul.f32 %v2694_v13, %v1771_v51  ;;  %vm1793_vm6 = vweird.f32 %v2694_v13  ;;  %v2696_v5 = vpop.eup %2695 }
0x147e   :  { %vm1794_vm8 = vmor %vm1792_vm7, %vm1793_vm6  ;;  %v2698_v40 = vpop.eup %2697 }
0x147f   :  { %v1789_v3 = vsub.f32 1.0, %v1788_v35  ;;  %v1770_v9 = vadd.f32 1.0, %v2698_v40 }
0x1481   :  { %v1790_v10 = vmul.f32 %v2694_v13, %v1789_v3  ;;  %2699 = vrcp.f32 %v1770_v9  ;;  %v1783_v60 = vand.u32 2147483648, %v1770_v9  ;;  %vm1777_vm13 = vweird.f32 %v1770_v9 }
0x1482   :  { %v1781_v1 = vand.u32 2147483647, %v1770_v9 }
0x1483   :  { %v1791_v2 = vadd.f32 %v2694_v13, %v1790_v10  ;;  %v1784_v32 = vor.u32 1.1754944e-38, %v1783_v60 }
0x1484   :  { %vm1782_vm15 = vcmp.eq.f32.partialorder %v1781_v1, 8.507059e+37 }
0x1485   :  { %v1795_v39 = vsel %vm1794_vm8, %v2694_v13, %v1791_v2 }
0x1486   :  { %v1800_v58 = vsel %vm1797_vm9, %v1799_v6, %v1795_v39 }
0x1487   :  { %v1805_v4 = vsel %vm21_vm3, %v1800_v58, %v2696_v5  ;;  %v2700_v26 = vpop.eup %2699 }
0x1488   :  { %1808 = vrot.lane.b32.xlu0 %v1805_v4, %s2764_s24  ;;  %v1773_v31 = vmul.f32 %v2700_v26, %v1770_v9  ;;  %vm1778_vm12 = vweird.f32 %v2700_v26 }
0x1489   :  { %vm1779_vm14 = vmor %vm1777_vm13, %vm1778_vm12 }
0x148a   :  { %v1774_v36 = vsub.f32 1.0, %v1773_v31 }
0x148c   :  { %v1775_v7 = vmul.f32 %v2700_v26, %v1774_v36 }
0x148e   :  { %v1776_v34 = vadd.f32 %v2700_v26, %v1775_v7 }
0x1490   :  { %v1780_v48 = vsel %vm1779_vm14, %v2700_v26, %v1776_v34 }
0x1491   :  { %v1785_v14 = vsel %vm1782_vm15, %v1784_v32, %v1780_v48 }
0x1492   :  { %v1806_v57 = vmul.f32 %v1785_v14, %v3760_v17 }
0x14fa   :  { %v1809_v29 = vpop.permute.xlu0 %1808 }
0x14fb   :  { %v1811_v21 = vmul.f32 %v1809_v29, %v1785_v14 }
0x14fd   :  { %1813 = vrot.lane.b32.xlu1 %v1811_v21, %s2764_s24 }
0x156f   :  { %v1814_v27 = vpop.permute.xlu1 %1813 }
0x1570   :  { %v3789_v30 = vadd.f32 %v1814_v27, %v1806_v57 }
0x1572   :  { %2701 = vtanh.f32 %v3789_v30 }
0x1578   :  { %v2702_v45 = vpop.eup %2701 }
0x1579   :  { %1819 = vrot.lane.b32.xlu2 %v2702_v45, %s2764_s24 }
0x15d3   :  { %v1820_v51 = vpop.permute.xlu2 %1819 }
0x15d4   :  { %v1822_v13 = vmul.f32 %v1820_v51, %v1805_v4 }
0x15d6   :  { %2548 = vmatmul.msk.f32.vlgmr.msrb.gmra.mxu2 %vm72_vm0, %v1822_v13  ;;  %2549 = vmatmul.msk.f32.vlgmr.msrb.gmra.mxu3 %vm72_vm0, %v1822_v13 }
0x15d7   :  { %2280 = vmatpush.msrb.mxu2 %v3508_v41  ;;  %2300 = vmatpush.msrb.mxu3 %v3446_v28 }
0x15d9   :  { %2281 = vmatpush.msrb.mxu2 %v3513_v50  ;;  %2301 = vmatpush.msrb.mxu3 %v3453_v23 }
0x15db   :  { %2282 = vmatpush.msrb.mxu2 %v3520_v43  ;;  %2302 = vmatpush.msrb.mxu3 %v3460_v42 }
0x15dd   :  { %2283 = vmatpush.msrb.mxu2 %v3535_v52  ;;  %2303 = vmatpush.msrb.mxu3 %v3470_v24 }
0x15df   :  { %2284 = vmatpush.msrb.mxu2 %v3545_v38  ;;  %2304 = vmatpush.msrb.mxu3 %v3481_v33 }
0x15e1   :  { %2285 = vmatpush.msrb.mxu2 %v3552_v0  ;;  %2305 = vmatpush.msrb.mxu3 %v3492_v47 }
0x15e3   :  { %2286 = vmatpush.msrb.mxu2 %v3565_v15  ;;  %2306 = vmatpush.msrb.mxu3 %v3503_v49 }
0x15e5   :  { %2287 = vmatpush.msrb.mxu2 %v3576_v19  ;;  %2307 = vmatpush.msrb.mxu3 %v3540_v53 }
0x1659   :  { %v1869_v28 = vpop.f32.mrf.mxu3  ;;  %v1849_v17 = vpop.f32.mrf.mxu2 }
0x165a   :  { %v1873_v23 = vadd.f32 %v1869_v28, %v3685_v44  ;;  %v1872_v35 = vadd.f32 %v1849_v17, %v3683_v59 }
0x165c   :  { %v2551_v42 = vmul.f32 -1.442695, %v1873_v23  ;;  %v2550_v3 = vmul.f32 -1.442695, %v1872_v35 }
0x165e   :  { %2703 = vpow2.f32 %v2551_v42 }
0x1664   :  { %v2704_v24 = vpop.eup %2703 }
0x1665   :  { %v1881_v41 = vadd.f32 1.0, %v2704_v24 }
0x1667   :  { %2705 = vrcp.f32 %v1881_v41  ;;  %v1908_v47 = vand.u32 2147483648, %v1881_v41  ;;  %v1906_v49 = vand.u32 2147483647, %v1881_v41  ;;  %vm1902_vm2 = vweird.f32 %v1881_v41 }
0x1668   :  { %2707 = vtanh.f32 %v1873_v23 }
0x1669   :  { %v1909_v53 = vor.u32 1.1754944e-38, %v1908_v47  ;;  %vm1907_vm5 = vcmp.eq.f32.partialorder %v1906_v49, 8.507059e+37  ;;  %2709 = vpow2.f32 %v2550_v3 }
0x166d   :  { %v2706_v33 = vpop.eup %2705 }
0x166e   :  { %v1898_v50 = vmul.f32 %v2706_v33, %v1881_v41  ;;  %vm1903_vm1 = vweird.f32 %v2706_v33  ;;  %v2708_v15 = vpop.eup %2707 }
0x166f   :  { %vm1904_vm4 = vmor %vm1902_vm2, %vm1903_vm1  ;;  %v2710_v55 = vpop.eup %2709 }
0x1670   :  { %v1899_v43 = vsub.f32 1.0, %v1898_v50  ;;  %v1880_v10 = vadd.f32 1.0, %v2710_v55 }
0x1672   :  { %v1900_v52 = vmul.f32 %v2706_v33, %v1899_v43  ;;  %2711 = vrcp.f32 %v1880_v10  ;;  %v1893_v58 = vand.u32 2147483648, %v1880_v10  ;;  %vm1887_vm11 = vweird.f32 %v1880_v10 }
0x1673   :  { %v1891_v4 = vand.u32 2147483647, %v1880_v10 }
0x1674   :  { %v1901_v38 = vadd.f32 %v2706_v33, %v1900_v52  ;;  %v1894_v63 = vor.u32 1.1754944e-38, %v1893_v58 }
0x1675   :  { %vm1892_vm7 = vcmp.eq.f32.partialorder %v1891_v4, 8.507059e+37 }
0x1676   :  { %v1905_v0 = vsel %vm1904_vm4, %v2706_v33, %v1901_v38 }
0x1677   :  { %v1910_v19 = vsel %vm1907_vm5, %v1909_v53, %v1905_v0 }
0x1678   :  { %v1915_v44 = vsel %vm21_vm3, %v1910_v19, %v2708_v15  ;;  %v2712_v54 = vpop.eup %2711 }
0x1679   :  { %1918 = vrot.lane.b32.xlu0 %v1915_v44, %s2764_s24  ;;  %v1883_v2 = vmul.f32 %v2712_v54, %v1880_v10  ;;  %vm1888_vm10 = vweird.f32 %v2712_v54 }
0x167a   :  { %vm1889_vm6 = vmor %vm1887_vm11, %vm1888_vm10 }
0x167b   :  { %v1884_v6 = vsub.f32 1.0, %v1883_v2 }
0x167d   :  { %v1885_v39 = vmul.f32 %v2712_v54, %v1884_v6 }
0x167f   :  { %v1886_v5 = vadd.f32 %v2712_v54, %v1885_v39 }
0x1681   :  { %v1890_v56 = vsel %vm1889_vm6, %v2712_v54, %v1886_v5 }
0x1682   :  { %v1895_v59 = vsel %vm1892_vm7, %v1894_v63, %v1890_v56 }
0x1683   :  { %v1916_v9 = vmul.f32 %v1895_v59, %v3789_v30 }
0x16eb   :  { %v1919_v12 = vpop.permute.xlu0 %1918 }
0x16ec   :  { %v1921_v40 = vmul.f32 %v1919_v12, %v1895_v59 }
0x16ee   :  { %1923 = vrot.lane.b32.xlu1 %v1921_v40, %s2764_s24 }
0x1760   :  { %v1924_v26 = vpop.permute.xlu1 %1923 }
0x1761   :  { %v1926_v31 = vadd.f32 %v1924_v26, %v1916_v9 }
0x1763   :  { %2713 = vtanh.f32 %v1926_v31 }
0x1769   :  { %v2714_v36 = vpop.eup %2713 }
0x176a   :  { %1929 = vrot.lane.b32.xlu2 %v2714_v36, %s2764_s24 }
0x17c4   :  { %v1930_v7 = vpop.permute.xlu2 %1929 }
0x17c5   :  { %v1932_v34 = vmul.f32 %v1930_v7, %v1915_v44 }
0x17c7   :  { %2552 = vmatmul.msk.f32.vlgmr.msra.gmra.mxu0 %vm72_vm0, %v1932_v34  ;;  %2553 = vmatmul.msk.f32.vlgmr.msra.gmra.mxu1 %vm72_vm0, %v1932_v34 }
0x1844   :  { %v1979_v60 = vpop.f32.mrf.mxu1  ;;  %v1959_v24 = vpop.f32.mrf.mxu0 }
0x1845   :  { %v1983_v1 = vadd.f32 %v1979_v60, %v3677_v37  ;;  %v1982_v41 = vadd.f32 %v1959_v24, %v3675_v46 }
0x1847   :  { %v2555_v48 = vmul.f32 -1.442695, %v1983_v1  ;;  %v2554_v33 = vmul.f32 -1.442695, %v1982_v41 }
0x1849   :  { %2715 = vpow2.f32 %v2555_v48 }
0x184f   :  { %v2716_v32 = vpop.eup %2715 }
0x1850   :  { %v1991_v29 = vadd.f32 1.0, %v2716_v32 }
0x1852   :  { %2717 = vrcp.f32 %v1991_v29  ;;  %v2018_v27 = vand.u32 2147483648, %v1991_v29  ;;  %v2016_v45 = vand.u32 2147483647, %v1991_v29  ;;  %vm2012_vm9 = vweird.f32 %v1991_v29 }
0x1853   :  { %2719 = vtanh.f32 %v1983_v1 }
0x1854   :  { %v2019_v13 = vor.u32 1.1754944e-38, %v2018_v27  ;;  %vm2017_vm13 = vcmp.eq.f32.partialorder %v2016_v45, 8.507059e+37  ;;  %2721 = vpow2.f32 %v2554_v33 }
0x1858   :  { %v2718_v14 = vpop.eup %2717 }
0x1859   :  { %v2008_v21 = vmul.f32 %v2718_v14, %v1991_v29  ;;  %vm2013_vm8 = vweird.f32 %v2718_v14  ;;  %v2720_v37 = vpop.eup %2719 }
0x185a   :  { %vm2014_vm12 = vmor %vm2012_vm9, %vm2013_vm8  ;;  %v2722_v50 = vpop.eup %2721 }
0x185b   :  { %v2009_v57 = vsub.f32 1.0, %v2008_v21  ;;  %v1990_v43 = vadd.f32 1.0, %v2722_v50 }
0x185d   :  { %v2010_v30 = vmul.f32 %v2718_v14, %v2009_v57  ;;  %2723 = vrcp.f32 %v1990_v43  ;;  %v2003_v0 = vand.u32 2147483648, %v1990_v43  ;;  %vm1997_vm15 = vweird.f32 %v1990_v43 }
0x185e   :  { %v2001_v15 = vand.u32 2147483647, %v1990_v43 }
0x185f   :  { %v2011_v51 = vadd.f32 %v2718_v14, %v2010_v30  ;;  %v2004_v44 = vor.u32 1.1754944e-38, %v2003_v0 }
0x1860   :  { %vm2002_vm2 = vcmp.eq.f32.partialorder %v2001_v15, 8.507059e+37 }
0x1861   :  { %v2015_v28 = vsel %vm2014_vm12, %v2718_v14, %v2011_v51 }
0x1862   :  { %v2020_v23 = vsel %vm2017_vm13, %v2019_v13, %v2015_v28 }
0x1863   :  { %v2025_v42 = vsel %vm21_vm3, %v2020_v23, %v2720_v37  ;;  %v2724_v47 = vpop.eup %2723 }
0x1864   :  { %2028 = vrot.lane.b32.xlu0 %v2025_v42, %s2764_s24  ;;  %v1993_v52 = vmul.f32 %v2724_v47, %v1990_v43  ;;  %vm1998_vm14 = vweird.f32 %v2724_v47 }
0x1865   :  { %vm1999_vm1 = vmor %vm1997_vm15, %vm1998_vm14 }
0x1866   :  { %v1994_v49 = vsub.f32 1.0, %v1993_v52 }
0x1868   :  { %v1995_v38 = vmul.f32 %v2724_v47, %v1994_v49 }
0x186a   :  { %v1996_v53 = vadd.f32 %v2724_v47, %v1995_v38 }
0x186c   :  { %v2000_v19 = vsel %vm1999_vm1, %v2724_v47, %v1996_v53 }
0x186d   :  { %v2005_v46 = vsel %vm2002_vm2, %v2004_v44, %v2000_v19 }
0x186e   :  { %v2026_v3 = vmul.f32 %v2005_v46, %v1926_v31 }
0x18d6   :  { %v2029_v17 = vpop.permute.xlu0 %2028 }
0x18d7   :  { %v2031_v35 = vmul.f32 %v2029_v17, %v2005_v46 }
0x18d9   :  { %2033 = vrot.lane.b32.xlu1 %v2031_v35, %s2764_s24 }
0x194b   :  { %v2034_v55 = vpop.permute.xlu1 %2033 }
0x194c   :  { %v2036_v10 = vadd.f32 %v2034_v55, %v2026_v3 }
0x194e   :  { %2725 = vtanh.f32 %v2036_v10 }
0x1954   :  { %v2726_v54 = vpop.eup %2725 }
0x1955   :  { %2039 = vrot.lane.b32.xlu2 %v2726_v54, %s2764_s24 }
0x19af   :  { %v2040_v2 = vpop.permute.xlu2 %2039 }
0x19b0   :  { %v2042_v6 = vmul.f32 %v2040_v2, %v2025_v42 }
0x19b2   :  { %2556 = vmatmul.msk.f32.vlgmr.msra.gmra.mxu2 %vm72_vm0, %v2042_v6  ;;  %2557 = vmatmul.msk.f32.vlgmr.msra.gmra.mxu3 %vm72_vm0, %v2042_v6 }
0x1a35   :  { %v2089_v39 = vpop.f32.mrf.mxu3  ;;  %v2069_v1 = vpop.f32.mrf.mxu2 }
0x1a36   :  { %v2093_v5 = vadd.f32 %v2089_v39, %v3689_v18  ;;  %v2092_v48 = vadd.f32 %v2069_v1, %v3687_v16 }
0x1a38   :  { %v2559_v58 = vmul.f32 -1.442695, %v2093_v5  ;;  %v2558_v32 = vmul.f32 -1.442695, %v2092_v48 }
0x1a3a   :  { %2727 = vpow2.f32 %v2559_v58 }
0x1a40   :  { %v2728_v4 = vpop.eup %2727 }
0x1a41   :  { %v2101_v56 = vadd.f32 1.0, %v2728_v4 }
0x1a43   :  { %2729 = vrcp.f32 %v2101_v56  ;;  %v2128_v40 = vand.u32 2147483648, %v2101_v56  ;;  %v2126_v26 = vand.u32 2147483647, %v2101_v56  ;;  %vm2122_vm5 = vweird.f32 %v2101_v56 }
0x1a44   :  { %2731 = vtanh.f32 %v2093_v5 }
0x1a45   :  { %v2129_v36 = vor.u32 1.1754944e-38, %v2128_v40  ;;  %vm2127_vm11 = vcmp.eq.f32.partialorder %v2126_v26, 8.507059e+37  ;;  %2733 = vpow2.f32 %v2558_v32 }
0x1a49   :  { %v2730_v63 = vpop.eup %2729 }
0x1a4a   :  { %v2118_v12 = vmul.f32 %v2730_v63, %v2101_v56  ;;  %vm2123_vm4 = vweird.f32 %v2730_v63  ;;  %v2732_v18 = vpop.eup %2731 }
0x1a4b   :  { %vm2124_vm10 = vmor %vm2122_vm5, %vm2123_vm4  ;;  %v2734_v29 = vpop.eup %2733 }
0x1a4c   :  { %v2119_v59 = vsub.f32 1.0, %v2118_v12  ;;  %v2100_v14 = vadd.f32 1.0, %v2734_v29 }
0x1a4e   :  { %v2120_v9 = vmul.f32 %v2730_v63, %v2119_v59  ;;  %2735 = vrcp.f32 %v2100_v14  ;;  %v2113_v51 = vand.u32 2147483648, %v2100_v14  ;;  %vm2107_vm7 = vweird.f32 %v2100_v14 }
0x1a4f   :  { %v2111_v13 = vand.u32 2147483647, %v2100_v14 }
0x1a50   :  { %v2121_v31 = vadd.f32 %v2730_v63, %v2120_v9  ;;  %v2114_v37 = vor.u32 1.1754944e-38, %v2113_v51 }
0x1a51   :  { %vm2112_vm9 = vcmp.eq.f32.partialorder %v2111_v13, 8.507059e+37 }
0x1a52   :  { %v2125_v7 = vsel %vm2124_vm10, %v2730_v63, %v2121_v31 }
0x1a53   :  { %v2130_v34 = vsel %vm2127_vm11, %v2129_v36, %v2125_v7 }
0x1a54   :  { %v2135_v60 = vsel %vm21_vm3, %v2130_v34, %v2732_v18  ;;  %v2736_v21 = vpop.eup %2735 }
0x1a55   :  { %2138 = vrot.lane.b32.xlu0 %v2135_v60, %s2764_s24  ;;  %v2103_v57 = vmul.f32 %v2736_v21, %v2100_v14  ;;  %vm2108_vm6 = vweird.f32 %v2736_v21 }
0x1a56   :  { %vm2109_vm8 = vmor %vm2107_vm7, %vm2108_vm6 }
0x1a57   :  { %v2104_v27 = vsub.f32 1.0, %v2103_v57 }
0x1a59   :  { %v2105_v30 = vmul.f32 %v2736_v21, %v2104_v27 }
0x1a5b   :  { %v2106_v45 = vadd.f32 %v2736_v21, %v2105_v30 }
0x1a5d   :  { %v2110_v28 = vsel %vm2109_vm8, %v2736_v21, %v2106_v45 }
0x1a5e   :  { %v2115_v16 = vsel %vm2112_vm9, %v2114_v37, %v2110_v28 }
0x1a5f   :  { %v2136_v24 = vmul.f32 %v2115_v16, %v2036_v10 }
0x1ac7   :  { %v2139_v23 = vpop.permute.xlu0 %2138 }
0x1ac8   :  { %v2141_v42 = vmul.f32 %v2139_v23, %v2115_v16 }
0x1aca   :  { %2143 = vrot.lane.b32.xlu1 %v2141_v42, %s2764_s24 }
0x1b3c   :  { %v2144_v41 = vpop.permute.xlu1 %2143 }
0x1b3d   :  { %v2146_v33 = vadd.f32 %v2144_v41, %v2136_v24 }
0x1b3f   :  { %2737 = vtanh.f32 %v2146_v33 }
0x1b45   :  { %v2738_v50 = vpop.eup %2737 }
0x1b46   :  { %2149 = vrot.lane.b32.xlu2 %v2738_v50, %s2764_s24 }
0x1ba0   :  { %v2150_v43 = vpop.permute.xlu2 %2149 }
0x1ba1   :  { %v2152_v47 = vmul.f32 %v2150_v43, %v2135_v60 }
0x1ba3   :  { %2560 = vmatmul.msk.f32.vlgmr.msrb.gmra.mxu0 %vm72_vm0, %v2152_v47  ;;  %2561 = vmatmul.msk.f32.vlgmr.msrb.gmra.mxu1 %vm72_vm0, %v2152_v47 }
0x1c20   :  { %v2199_v52 = vpop.f32.mrf.mxu1  ;;  %v2179_v6 = vpop.f32.mrf.mxu0 }
0x1c21   :  { %v2203_v49 = vadd.f32 %v2199_v52, %v3701_v62  ;;  %v2202_v39 = vadd.f32 %v2179_v6, %v3699_v8 }
0x1c23   :  { %v2563_v38 = vmul.f32 -1.442695, %v2203_v49  ;;  %v2562_v5 = vmul.f32 -1.442695, %v2202_v39 }
0x1c25   :  { %2739 = vpow2.f32 %v2563_v38 }
0x1c2b   :  { %v2740_v53 = vpop.eup %2739 }
0x1c2c   :  { %v2211_v0 = vadd.f32 1.0, %v2740_v53 }
0x1c2e   :  { %2741 = vrcp.f32 %v2211_v0  ;;  %v2238_v17 = vand.u32 2147483648, %v2211_v0  ;;  %v2236_v35 = vand.u32 2147483647, %v2211_v0  ;;  %vm2232_vm13 = vweird.f32 %v2211_v0 }
0x1c2f   :  { %2743 = vtanh.f32 %v2203_v49 }
0x1c30   :  { %v2239_v55 = vor.u32 1.1754944e-38, %v2238_v17  ;;  %vm2237_vm15 = vcmp.eq.f32.partialorder %v2236_v35, 8.507059e+37  ;;  %2745 = vpow2.f32 %v2562_v5 }
0x1c34   :  { %v2742_v15 = vpop.eup %2741 }
0x1c35   :  { %v2228_v19 = vmul.f32 %v2742_v15, %v2211_v0  ;;  %vm2233_vm12 = vweird.f32 %v2742_v15  ;;  %v2744_v62 = vpop.eup %2743 }
0x1c36   :  { %vm2234_vm14 = vmor %vm2232_vm13, %vm2233_vm12  ;;  %v2746_v58 = vpop.eup %2745  ;;  %vm2373_vm13 = vcmp.lt.s32.totalorder %v3168_v61, 32 }
0x1c37   :  { %v2229_v44 = vsub.f32 1.0, %v2228_v19  ;;  %v2210_v4 = vadd.f32 1.0, %v2746_v58 }
0x1c39   :  { %v2230_v46 = vmul.f32 %v2742_v15, %v2229_v44  ;;  %2747 = vrcp.f32 %v2210_v4  ;;  %v2223_v9 = vand.u32 2147483648, %v2210_v4  ;;  %vm2217_vm2 = vweird.f32 %v2210_v4 }
0x1c3a   :  { %v2221_v26 = vand.u32 2147483647, %v2210_v4 }
0x1c3b   :  { %v2231_v3 = vadd.f32 %v2742_v15, %v2230_v46  ;;  %v2224_v36 = vor.u32 1.1754944e-38, %v2223_v9 }
0x1c3c   :  { %vm2222_vm5 = vcmp.eq.f32.partialorder %v2221_v26, 8.507059e+37 }
0x1c3d   :  { %v2235_v10 = vsel %vm2234_vm14, %v2742_v15, %v2231_v3  ;;  %vm2389_vm14 = vcmask 7168  }
0x1c3e   :  { %v2240_v54 = vsel %vm2237_vm15, %v2239_v55, %v2235_v10 }
0x1c3f   :  { %v2245_v2 = vsel %vm21_vm3, %v2240_v54, %v2744_v62  ;;  %v2748_v56 = vpop.eup %2747 }
0x1c40   :  { %2248 = vrot.lane.b32.xlu0 %v2245_v2, %s2764_s24  ;;  %v2213_v63 = vmul.f32 %v2748_v56, %v2210_v4  ;;  %vm2218_vm1 = vweird.f32 %v2748_v56 }
0x1c41   :  { %vm2219_vm4 = vmor %vm2217_vm2, %vm2218_vm1 }
0x1c42   :  { %v2214_v12 = vsub.f32 1.0, %v2213_v63 }
0x1c44   :  { %v2215_v59 = vmul.f32 %v2748_v56, %v2214_v12 }
0x1c46   :  { %v2216_v40 = vadd.f32 %v2748_v56, %v2215_v59 }
0x1c48   :  { %v2220_v31 = vsel %vm2219_vm4, %v2748_v56, %v2216_v40 }
0x1c49   :  { %v2225_v8 = vsel %vm2222_vm5, %v2224_v36, %v2220_v31 }
0x1c4a   :  { %v2246_v34 = vmul.f32 %v2225_v8, %v2146_v33 }
0x1cb2   :  { %v2249_v7 = vpop.permute.xlu0 %2248 }
0x1cb3   :  { %v2251_v18 = vmul.f32 %v2249_v7, %v2225_v8 }
0x1cb5   :  { %2253 = vrot.lane.b32.xlu1 %v2251_v18, %s2764_s24 }
0x1d27   :  { %v2254_v60 = vpop.permute.xlu1 %2253 }
0x1d28   :  { %v2256_v1 = vadd.f32 %v2254_v60, %v2246_v34 }
0x1d2a   :  { %2749 = vtanh.f32 %v2256_v1 }
0x1d30   :  { %v2750_v48 = vpop.eup %2749 }
0x1d31   :  { %2259 = vrot.lane.b32.xlu2 %v2750_v48, %s2764_s24 }
0x1d8b   :  { %v2260_v32 = vpop.permute.xlu2 %2259 }
0x1d8c   :  { %v2262_v29 = vmul.f32 %v2260_v32, %v2245_v2  ;;  %v2568_v2 = vld [vmem:[%s3868_s3 + $0x8] sm:$0xf] }
0x1d8d   :  { %v2378_v39 = vperm.slane %v2568_v2, 0 }
0x1d8e   :  { %2564 = vmatmul.msk.f32.vlgmr.msrb.gmra.mxu2 %vm72_vm0, %v2262_v29  ;;  %2565 = vmatmul.msk.f32.vlgmr.msrb.gmra.mxu3 %vm72_vm0, %v2262_v29 }
0x1e11   :  { %v2309_v14 = vpop.f32.mrf.mxu3  ;;  %v2289_v50 = vpop.f32.mrf.mxu2 }
0x1e12   :  { %v2313_v21 = vadd.f32 %v2309_v14, %v3715_v25  ;;  %v2312_v43 = vadd.f32 %v2289_v50, %v3712_v20 }
0x1e14   :  { %v2567_v57 = vmul.f32 -1.442695, %v2313_v21  ;;  %v2566_v47 = vmul.f32 -1.442695, %v2312_v43 }
0x1e16   :  { %2751 = vpow2.f32 %v2567_v57 }
0x1e1c   :  { %v2752_v27 = vpop.eup %2751 }
0x1e1d   :  { %v2321_v30 = vadd.f32 1.0, %v2752_v27 }
0x1e1f   :  { %2753 = vrcp.f32 %v2321_v30  ;;  %v2348_v28 = vand.u32 2147483648, %v2321_v30  ;;  %v2346_v23 = vand.u32 2147483647, %v2321_v30  ;;  %vm2342_vm11 = vweird.f32 %v2321_v30 }
0x1e20   :  { %2755 = vtanh.f32 %v2313_v21 }
0x1e21   :  { %v2349_v42 = vor.u32 1.1754944e-38, %v2348_v28  ;;  %vm2347_vm7 = vcmp.eq.f32.partialorder %v2346_v23, 8.507059e+37  ;;  %2757 = vpow2.f32 %v2566_v47 }
0x1e25   :  { %v2754_v45 = vpop.eup %2753 }
0x1e26   :  { %v2338_v51 = vmul.f32 %v2754_v45, %v2321_v30  ;;  %vm2343_vm10 = vweird.f32 %v2754_v45  ;;  %v2756_v25 = vpop.eup %2755 }
0x1e27   :  { %vm2344_vm6 = vmor %vm2342_vm11, %vm2343_vm10  ;;  %v2758_v52 = vpop.eup %2757 }
0x1e28   :  { %v2339_v13 = vsub.f32 1.0, %v2338_v51  ;;  %v2320_v49 = vadd.f32 1.0, %v2758_v52 }
0x1e2a   :  { %v2340_v37 = vmul.f32 %v2754_v45, %v2339_v13  ;;  %2759 = vrcp.f32 %v2320_v49  ;;  %v2333_v44 = vand.u32 2147483648, %v2320_v49  ;;  %vm2327_vm9 = vweird.f32 %v2320_v49 }
0x1e2b   :  { %v2331_v11 = vand.u32 2147483647, %v2320_v49 }
0x1e2c   :  { %v2341_v16 = vadd.f32 %v2754_v45, %v2340_v37  ;;  %v2334_v46 = vor.u32 1.1754944e-38, %v2333_v44 }
0x1e2d   :  { %vm2332_vm12 = vcmp.eq.f32.partialorder %v2331_v11, 8.507059e+37 }
0x1e2e   :  { %v2345_v24 = vsel %vm2344_vm6, %v2754_v45, %v2341_v16 }
0x1e2f   :  { %v2350_v41 = vsel %vm2347_vm7, %v2349_v42, %v2345_v24 }
0x1e30   :  { %v2355_v33 = vsel %vm21_vm3, %v2350_v41, %v2756_v25  ;;  %v2760_v38 = vpop.eup %2759 }
0x1e31   :  { %2358 = vrot.lane.b32.xlu0 %v2355_v33, %s2764_s24  ;;  %v2323_v53 = vmul.f32 %v2760_v38, %v2320_v49  ;;  %vm2328_vm8 = vweird.f32 %v2760_v38 }
0x1e32   :  { %vm2329_vm3 = vmor %vm2327_vm9, %vm2328_vm8 }
0x1e33   :  { %v2324_v0 = vsub.f32 1.0, %v2323_v53 }
0x1e35   :  { %v2325_v15 = vmul.f32 %v2760_v38, %v2324_v0 }
0x1e37   :  { %v2326_v19 = vadd.f32 %v2760_v38, %v2325_v15 }
0x1e39   :  { %v2330_v17 = vsel %vm2329_vm3, %v2760_v38, %v2326_v19 }
0x1e3a   :  { %v2335_v20 = vsel %vm2332_vm12, %v2334_v46, %v2330_v17 }
0x1e3b   :  { %v2356_v55 = vmul.f32 %v2335_v20, %v2256_v1 }
0x1ea3   :  { %v2359_v35 = vpop.permute.xlu0 %2358 }
0x1ea4   :  { %v2361_v3 = vmul.f32 %v2359_v35, %v2335_v20 }
0x1ea6   :  { %2363 = vrot.lane.b32.xlu1 %v2361_v3, %s2764_s24 }
0x1f18   :  { %v2364_v10 = vpop.permute.xlu1 %2363 }
0x1f19   :  { %v2366_v62 = vadd.f32 %v2364_v10, %v2356_v55 }
0x1f1b   :  { %2761 = vtanh.f32 %v2366_v62 }
0x1f21   :  { %v2762_v54 = vpop.eup %2761 }
0x1f22   :  { %2369 = vrot.lane.b32.xlu2 %v2762_v54, %s2764_s24 }
0x1f7c   :  { %v2370_v6 = vpop.permute.xlu2 %2369 }
0x1f7d   :  { %v2372_v5 = vmul.f32 %v2370_v6, %v2355_v33 }
0x1f7f   :  { %v2374_v58 = vsel %vm2373_vm13, %v2372_v5, %v3731_v22 }
0x1f80   :  { %v2380_v4 = vmul.f32 %v2378_v39, %v2374_v58 }
0x1f82   :  { %v2381_v56 = vsel %vm72_vm0, %v2380_v4, 0.0 }
0x1f83   :  { %2382 = vadd.xlane.f32.xlu0 %v2381_v56 }
0x1ff6   :  { %v2383_v63 = vpop.xlane.xlu0 %2382 }
0x1ff7   :  { %v2384_v12 = vadd.f32 %v2383_v63, %v2378_v39 }
0x1ff9   :  { %2386 = vrot.lane.b32.xlu1 %v2384_v12, %s2764_s24 }
0x206b   :  { %v2387_v59 = vpop.permute.xlu1 %2386 }
0x206c   :  { %2390 = vst.msk [vmem:[%s3869_s4] sm:$0xff] %vm2389_vm14, %v2387_v59 }

</bundles_post_ra>
